<compile_context>
chip_gen: v6e
topology: v6e:2x2x1
jax: 0.10.0
libtpu: 0.0.40
codegen_flags: <defaults>
</compile_context>

<pallas_src>
import functools

import jax
import jax.numpy as jnp
from jax.experimental import pallas as pl
from jax.experimental.pallas import tpu as pltpu

LEAKY_SLOPE = 0.01   # torch.nn.LeakyReLU default
BN_EPS = 1e-5        # torch.nn.BatchNorm2d default


def _round_up(x, m):
    return (x + m - 1) // m * m


def _pick_m_tile(m, cap=256):
    """Return (padded_M, tile_M) with tile | padded and tile capped."""
    if m <= cap:
        mp = _round_up(m, 8)
        return mp, mp
    mp = _round_up(m, cap)
    return mp, cap


def _pick_k_tile(kp, cap=1024):
    """Largest multiple of 128 that divides kp and is <= cap."""
    best = 128
    nblocks = kp // 128
    for mult in range(1, nblocks + 1):
        if nblocks % mult == 0 and mult * 128 <= cap:
            best = mult * 128
    return best


# ----------------------- Pallas kernels -----------------------------------

def _matmul_stats_kernel(p_ref, w_ref, y_ref, s1_ref, s2_ref, acc_ref):
    """Tiled bf16 matmul, f32 accumulator. On the last K step it writes the
    output tile plus per-tile sum(y) and sum(y*y) rows (fused BN statistics)."""
    k = pl.program_id(2)

    @pl.when(k == 0)
    def _():
        acc_ref[...] = jnp.zeros_like(acc_ref)

    acc_ref[...] += jnp.dot(p_ref[...], w_ref[...],
                            preferred_element_type=jnp.float32)

    @pl.when(k == pl.num_programs(2) - 1)
    def _():
        acc = acc_ref[...]
        y_ref[...] = acc
        s1_ref[...] = jnp.sum(acc, axis=0, keepdims=True)[None]
        s2_ref[...] = jnp.sum(acc * acc, axis=0, keepdims=True)[None]


def matmul_stats(patches, wmat):
    """patches: (M, Kp) bf16, wmat: (Kp, Coutp) bf16 (both already padded to
    multiples of 128 along K / Cout). Returns y (Mp, Coutp) f32 and the
    per-channel sum(y) / sum(y^2) vectors (Coutp,) f32."""
    M, Kp = patches.shape
    Coutp = wmat.shape[1]
    Mp, TM = _pick_m_tile(M)
    if Mp != M:                     # rare; demo shapes are already aligned
        patches = jnp.pad(patches, ((0, Mp - M), (0, 0)))
    TK = _pick_k_tile(Kp)
    TN = 128
    mi, nj, kk = Mp // TM, Coutp // TN, Kp // TK

    y, s1, s2 = pl.pallas_call(
        _matmul_stats_kernel,
        out_shape=(
            jax.ShapeDtypeStruct((Mp, Coutp), jnp.float32),
            jax.ShapeDtypeStruct((mi, 1, Coutp), jnp.float32),
            jax.ShapeDtypeStruct((mi, 1, Coutp), jnp.float32),
        ),
        grid_spec=pltpu.PrefetchScalarGridSpec(
            num_scalar_prefetch=0,
            grid=(mi, nj, kk),
            in_specs=[
                pl.BlockSpec((TM, TK), lambda i, j, k: (i, k)),
                pl.BlockSpec((TK, TN), lambda i, j, k: (k, j)),
            ],
            out_specs=[
                pl.BlockSpec((TM, TN), lambda i, j, k: (i, j)),
                pl.BlockSpec((1, 1, TN), lambda i, j, k: (i, 0, j)),
                pl.BlockSpec((1, 1, TN), lambda i, j, k: (i, 0, j)),
            ],
            scratch_shapes=[pltpu.VMEM((TM, TN), jnp.float32)],
        ),
        compiler_params=pltpu.CompilerParams(
            dimension_semantics=("parallel", "parallel", "arbitrary")),
    )(patches, wmat)
    return y, jnp.sum(s1, axis=(0, 1)), jnp.sum(s2, axis=(0, 1))


def _bn_lrelu_kernel(y_ref, scale_ref, shift_ref, o_ref):
    z = y_ref[...] * scale_ref[...] + shift_ref[...]
    o_ref[...] = jnp.where(z >= 0, z, LEAKY_SLOPE * z)


def bn_leaky_relu(y, scale, shift):
    """y: (Mp, Coutp) f32 (lane-dense); per-channel scale/shift (Coutp,)."""
    Mp, Coutp = y.shape
    _, TM = _pick_m_tile(Mp)
    row = lambda v: v.reshape(1, Coutp).astype(jnp.float32)
    row_spec = pl.BlockSpec((1, Coutp), lambda i: (0, 0))
    return pl.pallas_call(
        _bn_lrelu_kernel,
        out_shape=jax.ShapeDtypeStruct((Mp, Coutp), jnp.float32),
        grid_spec=pltpu.PrefetchScalarGridSpec(
            num_scalar_prefetch=0,
            grid=(Mp // TM,),
            in_specs=[pl.BlockSpec((TM, Coutp), lambda i: (i, 0)),
                      row_spec, row_spec],
            out_specs=pl.BlockSpec((TM, Coutp), lambda i: (i, 0)),
        ),
        compiler_params=pltpu.CompilerParams(
            dimension_semantics=("parallel",)),
    )(y, row(scale), row(shift))


# ----------------------- conv layer (NHWC glue + kernels) ------------------

def im2col_nhwc(x, kh, kw, stride, pad, kp):
    """x: (N, H, W, C) NHWC -> ((N*OH*OW, Kp) bf16, OH, OW).
    K ordering is (kh, kw, C); zero K-padding is part of the same concat."""
    N, H, W, C = x.shape
    OH = (H + 2 * pad - kh) // stride + 1
    OW = (W + 2 * pad - kw) // stride + 1
    xp = jnp.pad(x.astype(jnp.bfloat16),
                 ((0, 0), (pad, pad), (pad, pad), (0, 0)))
    cols = [xp[:, ih:ih + stride * OH:stride, iw:iw + stride * OW:stride, :]
            for ih in range(kh) for iw in range(kw)]
    k = kh * kw * C
    if kp > k:
        cols.append(jnp.zeros((N, OH, OW, kp - k), jnp.bfloat16))
    patches = jnp.concatenate(cols, axis=-1)
    return patches.reshape(N * OH * OW, kp), OH, OW


def conv_bn_lrelu_layer(x, p):
    """Equivalent of conv2d_bn_relu(...) on NHWC input x (training-mode BN).
    The conv bias is intentionally dropped: BN's mean subtraction cancels it."""
    N = x.shape[0]
    patches, OH, OW = im2col_nhwc(x, p["kh"], p["kw"], p["stride"],
                                  p["pad"], p["kp"])
    y, sum_y, sum_y2 = matmul_stats(patches, p["wmat"])     # Pallas MXU + stats
    m = N * OH * OW
    mean = sum_y / m
    var = sum_y2 / m - mean * mean                          # biased (training-mode)
    scale = p["gamma"] * jax.lax.rsqrt(var + BN_EPS)
    shift = p["beta"] - mean * scale
    z = bn_leaky_relu(y, scale, shift)                      # Pallas elementwise
    return z[:m, :p["cout"]].reshape(N, OH, OW, p["cout"])


# ----------------------- parameters & forward ------------------------------

def init_conv_params(key, cin, cout, k):
    k1, k2, k3, k4 = jax.random.split(key, 4)
    fan_in = cin * k * k
    w = jax.random.normal(k1, (cout, cin, k, k), jnp.float32) * 0.5 / (fan_in ** 0.5)
    b = 0.01 * jax.random.normal(k2, (cout,), jnp.float32)   # unused (BN cancels it)
    gamma = 1.0 + 0.1 * jax.random.normal(k3, (cout,), jnp.float32)
    beta = 0.1 * jax.random.normal(k4, (cout,), jnp.float32)
    return (w, b, gamma, beta)


def init_rebuild_encoder_params(key, in_channels):
    c2 = in_channels * 2
    specs = [
        # (cin, cout, kernel, stride, pad) — mirrors rebuild_encoder.__init__
        (c2, 16, 6, 2, 2), (16, 16, 3, 1, 1),        # conv_stack0
        (16, 64, 6, 2, 2), (64, 64, 3, 1, 1),        # conv_stack1
        (64, 256, 6, 2, 2), (256, 256, 3, 1, 1),     # conv_stack2
        (256, 512, 6, 2, 2), (512, 512, 3, 1, 1),    # conv_stack3
        (c2, 512, 24, 16, 4),                        # downres
    ]
    keys = jax.random.split(key, len(specs))
    return [(init_conv_params(keys[i], cin, cout, k), s, p)
            for i, (cin, cout, k, s, p) in enumerate(specs)]


def prepare_layer(raw, stride, pad):
    """One-time weight prep: K ordering (kh, kw, cin), pad K/Cout to multiples
    of 128 for lane-dense MXU tiles, cast to bf16. Bias is dropped (see above)."""
    w, _b, gamma, beta = raw
    cout, cin, kh, kw = w.shape
    k = kh * kw * cin
    kp = _round_up(k, 128)
    coutp = _round_up(cout, 128)
    wmat = jnp.transpose(w, (2, 3, 1, 0)).reshape(k, cout)
    wmat = jnp.pad(wmat, ((0, kp - k), (0, coutp - cout))).astype(jnp.bfloat16)
    return dict(
        wmat=wmat,
        gamma=jnp.pad(gamma, (0, coutp - cout)).astype(jnp.float32),
        beta=jnp.pad(beta, (0, coutp - cout)).astype(jnp.float32),
        cout=cout, kh=kh, kw=kw, kp=kp, stride=stride, pad=pad)


def prepare_encoder_params(raw_params):
    return [prepare_layer(raw, s, p) for raw, s, p in raw_params]


def rebuild_encoder_forward(prepped, data, label):
    x_nchw = jnp.concatenate([data, label], axis=1)     # module output #1 (NCHW)
    x = jnp.transpose(x_nchw, (0, 2, 3, 1))             # NHWC internally
    h = x
    stage_outs = []
    for idx in range(8):
        h = conv_bn_lrelu_layer(h, prepped[idx])
        if idx % 2 == 1:
            stage_outs.append(h)
    conv1, conv2, conv3, body = stage_outs
    conv4 = body + conv_bn_lrelu_layer(x, prepped[8])   # + downres(x)
    nchw = lambda t: jnp.transpose(t, (0, 3, 1, 2))     # API-boundary layout only
    return x_nchw, nchw(conv1), nchw(conv2), nchw(conv3), nchw(conv4)


# ----------------------- demo ----------------------------------------------

if __name__ == "__main__":
    key = jax.random.PRNGKey(0)
    k_param, k_data, k_label = jax.random.split(key, 3)

    in_channels = 3
    N, H, W = 2, 32, 32
    raw_params = init_rebuild_encoder_params(k_param, in_channels)
    prepped = prepare_encoder_params(raw_params)
    data = jax.random.normal(k_data, (N, in_channels, H, W), jnp.float32)
    label = jax.random.normal(k_label, (N, in_channels, H, W), jnp.float32)

    fwd = jax.jit(functools.partial(rebuild_encoder_forward, prepped))
    outs = jax.block_until_ready(fwd(data, label))

    x, c1, c2, c3, c4 = outs
    assert x.shape == (N, 2 * in_channels, H, W)
    assert c1.shape == (N, 16, H // 2, W // 2)
    assert c2.shape == (N, 64, H // 4, W // 4)
    assert c3.shape == (N, 256, H // 8, W // 8)
    assert c4.shape == (N, 512, H // 16, W // 16)
    assert all(bool(jnp.isfinite(o).all()) for o in outs)
    print("KERNEL_OK")
</pallas_src>

<mosaic_0001>
module attributes {stable_mosaic.version = 11 : i64} {
  func.func @_matmul_stats_kernel(%arg0: i32, %arg1: i32, %arg2: i32, %arg3: memref<8x384xbf16, #tpu.memory_space<vmem>>, %arg4: memref<384x128xbf16, #tpu.memory_space<vmem>>, %arg5: memref<8x128xf32, #tpu.memory_space<vmem>>, %arg6: memref<1x1x128xf32, #tpu.memory_space<vmem>>, %arg7: memref<1x1x128xf32, #tpu.memory_space<vmem>>, %arg8: memref<8x128xf32, #tpu.memory_space<vmem>>) attributes {dimension_semantics = [#tpu.dimension_semantics<parallel>, #tpu.dimension_semantics<parallel>, #tpu.dimension_semantics<arbitrary>], iteration_bounds = array<i64: 1, 4, 9>, scalar_prefetch = 0 : i64, scratch_operands = 1 : i64, tpu.core_type = #tpu.core_type<tc>, window_params = [{transform_indices = @transform_0, window_bounds = array<i64: 8, 384>}, {transform_indices = @transform_1, window_bounds = array<i64: 384, 128>}, {transform_indices = @transform_2, window_bounds = array<i64: 8, 128>}, {transform_indices = @transform_3, window_bounds = array<i64: 1, 1, 128>}, {transform_indices = @transform_4, window_bounds = array<i64: 1, 1, 128>}]} {
    %c0_i32 = arith.constant 0 : i32
    %0 = arith.cmpi eq, %arg2, %c0_i32 : i32
    %1 = arith.extui %0 : i1 to i32
    %c0_i32_0 = arith.constant 0 : i32
    %2 = arith.cmpi ne, %1, %c0_i32_0 : i32
    scf.if %2 {
      %cst_9 = arith.constant 0.000000e+00 : f32
      %12 = vector.broadcast %cst_9 : f32 to vector<8x128xf32>
      %c0_10 = arith.constant 0 : index
      %c0_11 = arith.constant 0 : index
      %13 = vector.load %arg8[%c0_10, %c0_11] : memref<8x128xf32, #tpu.memory_space<vmem>>, vector<8x128xf32>
      tpu.vector_store %arg8[%c0_10, %c0_11], %12 {strides = array<i32>} : memref<8x128xf32, #tpu.memory_space<vmem>>, vector<8x128xf32>,
    } else {
    }
    %c0 = arith.constant 0 : index
    %c0_1 = arith.constant 0 : index
    %3 = vector.load %arg8[%c0, %c0_1] : memref<8x128xf32, #tpu.memory_space<vmem>>, vector<8x128xf32>
    %c0_2 = arith.constant 0 : index
    %c0_3 = arith.constant 0 : index
    %4 = vector.load %arg3[%c0_2, %c0_3] : memref<8x384xbf16, #tpu.memory_space<vmem>>, vector<8x384xbf16>
    %c0_4 = arith.constant 0 : index
    %c0_5 = arith.constant 0 : index
    %5 = vector.load %arg4[%c0_4, %c0_5] : memref<384x128xbf16, #tpu.memory_space<vmem>>, vector<384x128xbf16>
    %cst = arith.constant dense<0.000000e+00> : vector<8x128xf32>
    %6 = tpu.matmul %4, %5, %cst {dimension_numbers = #tpu.dot_dimension_numbers<[1], [0], [0], [1], [0, 0, 1, 1], [], []>} : vector<8x384xbf16>, vector<384x128xbf16>, vector<8x128xf32> -> vector<8x128xf32>
    %7 = arith.addf %3, %6 : vector<8x128xf32>
    %c0_6 = arith.constant 0 : index
    %c0_7 = arith.constant 0 : index
    %8 = vector.load %arg8[%c0_6, %c0_7] : memref<8x128xf32, #tpu.memory_space<vmem>>, vector<8x128xf32>
    tpu.vector_store %arg8[%c0_6, %c0_7], %7 {strides = array<i32>} : memref<8x128xf32, #tpu.memory_space<vmem>>, vector<8x128xf32>,
    %c8_i32 = arith.constant 8 : i32
    %9 = arith.cmpi eq, %arg2, %c8_i32 : i32
    %10 = arith.extui %9 : i1 to i32
    %c0_i32_8 = arith.constant 0 : i32
    %11 = arith.cmpi ne, %10, %c0_i32_8 : i32
    scf.if %11 {
      %c0_9 = arith.constant 0 : index
      %c0_10 = arith.constant 0 : index
      %12 = vector.load %arg8[%c0_9, %c0_10] : memref<8x128xf32, #tpu.memory_space<vmem>>, vector<8x128xf32>
      %c0_11 = arith.constant 0 : index
      %c0_12 = arith.constant 0 : index
      %13 = vector.load %arg5[%c0_11, %c0_12] : memref<8x128xf32, #tpu.memory_space<vmem>>, vector<8x128xf32>
      tpu.vector_store %arg5[%c0_11, %c0_12], %12 {strides = array<i32>} : memref<8x128xf32, #tpu.memory_space<vmem>>, vector<8x128xf32>,
      %cst_13 = arith.constant dense<0.000000e+00> : vector<128xf32>
      %14 = vector.multi_reduction <add>, %12, %cst_13 [0] : vector<8x128xf32> to vector<128xf32>
      %15 = vector.shape_cast %14 : vector<128xf32> to vector<1x128xf32>
      %16 = vector.shape_cast %15 : vector<1x128xf32> to vector<1x1x128xf32>
      %c0_14 = arith.constant 0 : index
      %c0_15 = arith.constant 0 : index
      %c0_16 = arith.constant 0 : index
      %17 = vector.load %arg6[%c0_14, %c0_15, %c0_16] : memref<1x1x128xf32, #tpu.memory_space<vmem>>, vector<1x1x128xf32>
      tpu.vector_store %arg6[%c0_14, %c0_15, %c0_16], %16 {strides = array<i32>} : memref<1x1x128xf32, #tpu.memory_space<vmem>>, vector<1x1x128xf32>,
      %18 = arith.mulf %12, %12 : vector<8x128xf32>
      %cst_17 = arith.constant dense<0.000000e+00> : vector<128xf32>
      %19 = vector.multi_reduction <add>, %18, %cst_17 [0] : vector<8x128xf32> to vector<128xf32>
      %20 = vector.shape_cast %19 : vector<128xf32> to vector<1x128xf32>
      %21 = vector.shape_cast %20 : vector<1x128xf32> to vector<1x1x128xf32>
      %c0_18 = arith.constant 0 : index
      %c0_19 = arith.constant 0 : index
      %c0_20 = arith.constant 0 : index
      %22 = vector.load %arg7[%c0_18, %c0_19, %c0_20] : memref<1x1x128xf32, #tpu.memory_space<vmem>>, vector<1x1x128xf32>
      tpu.vector_store %arg7[%c0_18, %c0_19, %c0_20], %21 {strides = array<i32>} : memref<1x1x128xf32, #tpu.memory_space<vmem>>, vector<1x1x128xf32>,
    } else {
    }
    return
  }
  func.func @transform_0(%arg0: i32, %arg1: i32, %arg2: i32) -> (i32, i32) {
    %c0_i32 = arith.constant 0 : i32
    return %arg0, %arg2 : i32, i32
  }
  func.func @transform_1(%arg0: i32, %arg1: i32, %arg2: i32) -> (i32, i32) {
    %c0_i32 = arith.constant 0 : i32
    return %arg2, %arg1 : i32, i32
  }
  func.func @transform_2(%arg0: i32, %arg1: i32, %arg2: i32) -> (i32, i32) {
    %c0_i32 = arith.constant 0 : i32
    return %arg0, %arg1 : i32, i32
  }
  func.func @transform_3(%arg0: i32, %arg1: i32, %arg2: i32) -> (i32, i32, i32) {
    %c0_i32 = arith.constant 0 : i32
    %c0_i32_0 = arith.constant 0 : i32
    return %arg0, %c0_i32, %arg1 : i32, i32, i32
  }
  func.func @transform_4(%arg0: i32, %arg1: i32, %arg2: i32) -> (i32, i32, i32) {
    %c0_i32 = arith.constant 0 : i32
    %c0_i32_0 = arith.constant 0 : i32
    return %arg0, %c0_i32, %arg1 : i32, i32, i32
  }
}

module attributes {stable_mosaic.version = 11 : i64} {
  func.func @_bn_lrelu_kernel(%arg0: i32, %arg1: memref<8x512xf32, #tpu.memory_space<vmem>>, %arg2: memref<1x512xf32, #tpu.memory_space<vmem>>, %arg3: memref<1x512xf32, #tpu.memory_space<vmem>>, %arg4: memref<8x512xf32, #tpu.memory_space<vmem>>) attributes {dimension_semantics = [#tpu.dimension_semantics<parallel>], iteration_bounds = array<i64: 1>, scalar_prefetch = 0 : i64, scratch_operands = 0 : i64, tpu.core_type = #tpu.core_type<tc>, window_params = [{transform_indices = @transform_0, window_bounds = array<i64: 8, 512>}, {pipeline_mode = #tpu.pipeline_mode<synchronous>, transform_indices = @transform_1, window_bounds = array<i64: 1, 512>}, {pipeline_mode = #tpu.pipeline_mode<synchronous>, transform_indices = @transform_2, window_bounds = array<i64: 1, 512>}, {transform_indices = @transform_3, window_bounds = array<i64: 8, 512>}]} {
    %c0 = arith.constant 0 : index
    %c0_0 = arith.constant 0 : index
    %0 = vector.load %arg1[%c0, %c0_0] : memref<8x512xf32, #tpu.memory_space<vmem>>, vector<8x512xf32>
    %c0_1 = arith.constant 0 : index
    %c0_2 = arith.constant 0 : index
    %1 = vector.load %arg2[%c0_1, %c0_2] : memref<1x512xf32, #tpu.memory_space<vmem>>, vector<1x512xf32>
    %2 = vector.broadcast %1 : vector<1x512xf32> to vector<8x512xf32>
    %3 = arith.mulf %0, %2 : vector<8x512xf32>
    %c0_3 = arith.constant 0 : index
    %c0_4 = arith.constant 0 : index
    %4 = vector.load %arg3[%c0_3, %c0_4] : memref<1x512xf32, #tpu.memory_space<vmem>>, vector<1x512xf32>
    %5 = vector.broadcast %4 : vector<1x512xf32> to vector<8x512xf32>
    %6 = arith.addf %3, %5 : vector<8x512xf32>
    %cst = arith.constant 0.000000e+00 : f32
    %7 = vector.broadcast %cst : f32 to vector<8x512xf32>
    %8 = arith.cmpf oge, %6, %7 : vector<8x512xf32>
    %cst_5 = arith.constant 0.00999999977 : f32
    %9 = vector.broadcast %cst_5 : f32 to vector<8x512xf32>
    %10 = arith.mulf %9, %6 : vector<8x512xf32>
    %11 = arith.select %8, %6, %10 : vector<8x512xi1>, vector<8x512xf32>
    %c0_6 = arith.constant 0 : index
    %c0_7 = arith.constant 0 : index
    %12 = vector.load %arg4[%c0_6, %c0_7] : memref<8x512xf32, #tpu.memory_space<vmem>>, vector<8x512xf32>
    tpu.vector_store %arg4[%c0_6, %c0_7], %11 {strides = array<i32>} : memref<8x512xf32, #tpu.memory_space<vmem>>, vector<8x512xf32>,
    return
  }
  func.func @transform_0(%arg0: i32) -> (i32, i32) {
    %c0_i32 = arith.constant 0 : i32
    %c0_i32_0 = arith.constant 0 : i32
    return %arg0, %c0_i32 : i32, i32
  }
  func.func @transform_1(%arg0: i32) -> (i32, i32) {
    %c0_i32 = arith.constant 0 : i32
    %c0_i32_0 = arith.constant 0 : i32
    %c0_i32_1 = arith.constant 0 : i32
    return %c0_i32, %c0_i32_0 : i32, i32
  }
  func.func @transform_2(%arg0: i32) -> (i32, i32) {
    %c0_i32 = arith.constant 0 : i32
    %c0_i32_0 = arith.constant 0 : i32
    %c0_i32_1 = arith.constant 0 : i32
    return %c0_i32, %c0_i32_0 : i32, i32
  }
  func.func @transform_3(%arg0: i32) -> (i32, i32) {
    %c0_i32 = arith.constant 0 : i32
    %c0_i32_0 = arith.constant 0 : i32
    return %arg0, %c0_i32 : i32, i32
  }
}

module attributes {stable_mosaic.version = 11 : i64} {
  func.func @_matmul_stats_kernel(%arg0: i32, %arg1: i32, %arg2: i32, %arg3: memref<256x256xbf16, #tpu.memory_space<vmem>>, %arg4: memref<256x128xbf16, #tpu.memory_space<vmem>>, %arg5: memref<256x128xf32, #tpu.memory_space<vmem>>, %arg6: memref<1x1x128xf32, #tpu.memory_space<vmem>>, %arg7: memref<1x1x128xf32, #tpu.memory_space<vmem>>, %arg8: memref<256x128xf32, #tpu.memory_space<vmem>>) attributes {dimension_semantics = [#tpu.dimension_semantics<parallel>, #tpu.dimension_semantics<parallel>, #tpu.dimension_semantics<arbitrary>], iteration_bounds = array<i64: 2, 1, 1>, scalar_prefetch = 0 : i64, scratch_operands = 1 : i64, tpu.core_type = #tpu.core_type<tc>, window_params = [{transform_indices = @transform_0, window_bounds = array<i64: 256, 256>}, {transform_indices = @transform_1, window_bounds = array<i64: 256, 128>}, {transform_indices = @transform_2, window_bounds = array<i64: 256, 128>}, {transform_indices = @transform_3, window_bounds = array<i64: 1, 1, 128>}, {transform_indices = @transform_4, window_bounds = array<i64: 1, 1, 128>}]} {
    %c0_i32 = arith.constant 0 : i32
    %0 = arith.cmpi eq, %arg2, %c0_i32 : i32
    %1 = arith.extui %0 : i1 to i32
    %c0_i32_0 = arith.constant 0 : i32
    %2 = arith.cmpi ne, %1, %c0_i32_0 : i32
    scf.if %2 {
      %cst_10 = arith.constant 0.000000e+00 : f32
      %12 = vector.broadcast %cst_10 : f32 to vector<256x128xf32>
      %c0_11 = arith.constant 0 : index
      %c0_12 = arith.constant 0 : index
      %13 = vector.load %arg8[%c0_11, %c0_12] : memref<256x128xf32, #tpu.memory_space<vmem>>, vector<256x128xf32>
      tpu.vector_store %arg8[%c0_11, %c0_12], %12 {strides = array<i32>} : memref<256x128xf32, #tpu.memory_space<vmem>>, vector<256x128xf32>,
    } else {
    }
    %c0 = arith.constant 0 : index
    %c0_1 = arith.constant 0 : index
    %3 = vector.load %arg8[%c0, %c0_1] : memref<256x128xf32, #tpu.memory_space<vmem>>, vector<256x128xf32>
    %c0_2 = arith.constant 0 : index
    %c0_3 = arith.constant 0 : index
    %4 = vector.load %arg3[%c0_2, %c0_3] : memref<256x256xbf16, #tpu.memory_space<vmem>>, vector<256x256xbf16>
    %c0_4 = arith.constant 0 : index
    %c0_5 = arith.constant 0 : index
    %5 = vector.load %arg4[%c0_4, %c0_5] : memref<256x128xbf16, #tpu.memory_space<vmem>>, vector<256x128xbf16>
    %cst = arith.constant dense<0.000000e+00> : vector<256x128xf32>
    %6 = tpu.matmul %4, %5, %cst {dimension_numbers = #tpu.dot_dimension_numbers<[1], [0], [0], [1], [0, 0, 1, 1], [], []>} : vector<256x256xbf16>, vector<256x128xbf16>, vector<256x128xf32> -> vector<256x128xf32>
    %7 = arith.addf %3, %6 : vector<256x128xf32>
    %c0_6 = arith.constant 0 : index
    %c0_7 = arith.constant 0 : index
    %8 = vector.load %arg8[%c0_6, %c0_7] : memref<256x128xf32, #tpu.memory_space<vmem>>, vector<256x128xf32>
    tpu.vector_store %arg8[%c0_6, %c0_7], %7 {strides = array<i32>} : memref<256x128xf32, #tpu.memory_space<vmem>>, vector<256x128xf32>,
    %c0_i32_8 = arith.constant 0 : i32
    %9 = arith.cmpi eq, %arg2, %c0_i32_8 : i32
    %10 = arith.extui %9 : i1 to i32
    %c0_i32_9 = arith.constant 0 : i32
    %11 = arith.cmpi ne, %10, %c0_i32_9 : i32
    scf.if %11 {
      %c0_10 = arith.constant 0 : index
      %c0_11 = arith.constant 0 : index
      %12 = vector.load %arg8[%c0_10, %c0_11] : memref<256x128xf32, #tpu.memory_space<vmem>>, vector<256x128xf32>
      %c0_12 = arith.constant 0 : index
      %c0_13 = arith.constant 0 : index
      %13 = vector.load %arg5[%c0_12, %c0_13] : memref<256x128xf32, #tpu.memory_space<vmem>>, vector<256x128xf32>
      tpu.vector_store %arg5[%c0_12, %c0_13], %12 {strides = array<i32>} : memref<256x128xf32, #tpu.memory_space<vmem>>, vector<256x128xf32>,
      %cst_14 = arith.constant dense<0.000000e+00> : vector<128xf32>
      %14 = vector.multi_reduction <add>, %12, %cst_14 [0] : vector<256x128xf32> to vector<128xf32>
      %15 = vector.shape_cast %14 : vector<128xf32> to vector<1x128xf32>
      %16 = vector.shape_cast %15 : vector<1x128xf32> to vector<1x1x128xf32>
      %c0_15 = arith.constant 0 : index
      %c0_16 = arith.constant 0 : index
      %c0_17 = arith.constant 0 : index
      %17 = vector.load %arg6[%c0_15, %c0_16, %c0_17] : memref<1x1x128xf32, #tpu.memory_space<vmem>>, vector<1x1x128xf32>
      tpu.vector_store %arg6[%c0_15, %c0_16, %c0_17], %16 {strides = array<i32>} : memref<1x1x128xf32, #tpu.memory_space<vmem>>, vector<1x1x128xf32>,
      %18 = arith.mulf %12, %12 : vector<256x128xf32>
      %cst_18 = arith.constant dense<0.000000e+00> : vector<128xf32>
      %19 = vector.multi_reduction <add>, %18, %cst_18 [0] : vector<256x128xf32> to vector<128xf32>
      %20 = vector.shape_cast %19 : vector<128xf32> to vector<1x128xf32>
      %21 = vector.shape_cast %20 : vector<1x128xf32> to vector<1x1x128xf32>
      %c0_19 = arith.constant 0 : index
      %c0_20 = arith.constant 0 : index
      %c0_21 = arith.constant 0 : index
      %22 = vector.load %arg7[%c0_19, %c0_20, %c0_21] : memref<1x1x128xf32, #tpu.memory_space<vmem>>, vector<1x1x128xf32>
      tpu.vector_store %arg7[%c0_19, %c0_20, %c0_21], %21 {strides = array<i32>} : memref<1x1x128xf32, #tpu.memory_space<vmem>>, vector<1x1x128xf32>,
    } else {
    }
    return
  }
  func.func @transform_0(%arg0: i32, %arg1: i32, %arg2: i32) -> (i32, i32) {
    %c0_i32 = arith.constant 0 : i32
    return %arg0, %arg2 : i32, i32
  }
  func.func @transform_1(%arg0: i32, %arg1: i32, %arg2: i32) -> (i32, i32) {
    %c0_i32 = arith.constant 0 : i32
    return %arg2, %arg1 : i32, i32
  }
  func.func @transform_2(%arg0: i32, %arg1: i32, %arg2: i32) -> (i32, i32) {
    %c0_i32 = arith.constant 0 : i32
    return %arg0, %arg1 : i32, i32
  }
  func.func @transform_3(%arg0: i32, %arg1: i32, %arg2: i32) -> (i32, i32, i32) {
    %c0_i32 = arith.constant 0 : i32
    %c0_i32_0 = arith.constant 0 : i32
    return %arg0, %c0_i32, %arg1 : i32, i32, i32
  }
  func.func @transform_4(%arg0: i32, %arg1: i32, %arg2: i32) -> (i32, i32, i32) {
    %c0_i32 = arith.constant 0 : i32
    %c0_i32_0 = arith.constant 0 : i32
    return %arg0, %c0_i32, %arg1 : i32, i32, i32
  }
}

module attributes {stable_mosaic.version = 11 : i64} {
  func.func @_bn_lrelu_kernel(%arg0: i32, %arg1: memref<256x128xf32, #tpu.memory_space<vmem>>, %arg2: memref<1x128xf32, #tpu.memory_space<vmem>>, %arg3: memref<1x128xf32, #tpu.memory_space<vmem>>, %arg4: memref<256x128xf32, #tpu.memory_space<vmem>>) attributes {dimension_semantics = [#tpu.dimension_semantics<parallel>], iteration_bounds = array<i64: 2>, scalar_prefetch = 0 : i64, scratch_operands = 0 : i64, tpu.core_type = #tpu.core_type<tc>, window_params = [{transform_indices = @transform_0, window_bounds = array<i64: 256, 128>}, {pipeline_mode = #tpu.pipeline_mode<synchronous>, transform_indices = @transform_1, window_bounds = array<i64: 1, 128>}, {pipeline_mode = #tpu.pipeline_mode<synchronous>, transform_indices = @transform_2, window_bounds = array<i64: 1, 128>}, {transform_indices = @transform_3, window_bounds = array<i64: 256, 128>}]} {
    %c0 = arith.constant 0 : index
    %c0_0 = arith.constant 0 : index
    %0 = vector.load %arg1[%c0, %c0_0] : memref<256x128xf32, #tpu.memory_space<vmem>>, vector<256x128xf32>
    %c0_1 = arith.constant 0 : index
    %c0_2 = arith.constant 0 : index
    %1 = vector.load %arg2[%c0_1, %c0_2] : memref<1x128xf32, #tpu.memory_space<vmem>>, vector<1x128xf32>
    %2 = vector.broadcast %1 : vector<1x128xf32> to vector<256x128xf32>
    %3 = arith.mulf %0, %2 : vector<256x128xf32>
    %c0_3 = arith.constant 0 : index
    %c0_4 = arith.constant 0 : index
    %4 = vector.load %arg3[%c0_3, %c0_4] : memref<1x128xf32, #tpu.memory_space<vmem>>, vector<1x128xf32>
    %5 = vector.broadcast %4 : vector<1x128xf32> to vector<256x128xf32>
    %6 = arith.addf %3, %5 : vector<256x128xf32>
    %cst = arith.constant 0.000000e+00 : f32
    %7 = vector.broadcast %cst : f32 to vector<256x128xf32>
    %8 = arith.cmpf oge, %6, %7 : vector<256x128xf32>
    %cst_5 = arith.constant 0.00999999977 : f32
    %9 = vector.broadcast %cst_5 : f32 to vector<256x128xf32>
    %10 = arith.mulf %9, %6 : vector<256x128xf32>
    %11 = arith.select %8, %6, %10 : vector<256x128xi1>, vector<256x128xf32>
    %c0_6 = arith.constant 0 : index
    %c0_7 = arith.constant 0 : index
    %12 = vector.load %arg4[%c0_6, %c0_7] : memref<256x128xf32, #tpu.memory_space<vmem>>, vector<256x128xf32>
    tpu.vector_store %arg4[%c0_6, %c0_7], %11 {strides = array<i32>} : memref<256x128xf32, #tpu.memory_space<vmem>>, vector<256x128xf32>,
    return
  }
  func.func @transform_0(%arg0: i32) -> (i32, i32) {
    %c0_i32 = arith.constant 0 : i32
    %c0_i32_0 = arith.constant 0 : i32
    return %arg0, %c0_i32 : i32, i32
  }
  func.func @transform_1(%arg0: i32) -> (i32, i32) {
    %c0_i32 = arith.constant 0 : i32
    %c0_i32_0 = arith.constant 0 : i32
    %c0_i32_1 = arith.constant 0 : i32
    return %c0_i32, %c0_i32_0 : i32, i32
  }
  func.func @transform_2(%arg0: i32) -> (i32, i32) {
    %c0_i32 = arith.constant 0 : i32
    %c0_i32_0 = arith.constant 0 : i32
    %c0_i32_1 = arith.constant 0 : i32
    return %c0_i32, %c0_i32_0 : i32, i32
  }
  func.func @transform_3(%arg0: i32) -> (i32, i32) {
    %c0_i32 = arith.constant 0 : i32
    %c0_i32_0 = arith.constant 0 : i32
    return %arg0, %c0_i32 : i32, i32
  }
}

module attributes {stable_mosaic.version = 11 : i64} {
  func.func @_matmul_stats_kernel(%arg0: i32, %arg1: i32, %arg2: i32, %arg3: memref<128x640xbf16, #tpu.memory_space<vmem>>, %arg4: memref<640x128xbf16, #tpu.memory_space<vmem>>, %arg5: memref<128x128xf32, #tpu.memory_space<vmem>>, %arg6: memref<1x1x128xf32, #tpu.memory_space<vmem>>, %arg7: memref<1x1x128xf32, #tpu.memory_space<vmem>>, %arg8: memref<128x128xf32, #tpu.memory_space<vmem>>) attributes {dimension_semantics = [#tpu.dimension_semantics<parallel>, #tpu.dimension_semantics<parallel>, #tpu.dimension_semantics<arbitrary>], iteration_bounds = array<i64: 1, 1, 1>, scalar_prefetch = 0 : i64, scratch_operands = 1 : i64, tpu.core_type = #tpu.core_type<tc>, window_params = [{transform_indices = @transform_0, window_bounds = array<i64: 128, 640>}, {transform_indices = @transform_1, window_bounds = array<i64: 640, 128>}, {transform_indices = @transform_2, window_bounds = array<i64: 128, 128>}, {transform_indices = @transform_3, window_bounds = array<i64: 1, 1, 128>}, {transform_indices = @transform_4, window_bounds = array<i64: 1, 1, 128>}]} {
    %c0_i32 = arith.constant 0 : i32
    %0 = arith.cmpi eq, %arg2, %c0_i32 : i32
    %1 = arith.extui %0 : i1 to i32
    %c0_i32_0 = arith.constant 0 : i32
    %2 = arith.cmpi ne, %1, %c0_i32_0 : i32
    scf.if %2 {
      %cst_10 = arith.constant 0.000000e+00 : f32
      %12 = vector.broadcast %cst_10 : f32 to vector<128x128xf32>
      %c0_11 = arith.constant 0 : index
      %c0_12 = arith.constant 0 : index
      %13 = vector.load %arg8[%c0_11, %c0_12] : memref<128x128xf32, #tpu.memory_space<vmem>>, vector<128x128xf32>
      tpu.vector_store %arg8[%c0_11, %c0_12], %12 {strides = array<i32>} : memref<128x128xf32, #tpu.memory_space<vmem>>, vector<128x128xf32>,
    } else {
    }
    %c0 = arith.constant 0 : index
    %c0_1 = arith.constant 0 : index
    %3 = vector.load %arg8[%c0, %c0_1] : memref<128x128xf32, #tpu.memory_space<vmem>>, vector<128x128xf32>
    %c0_2 = arith.constant 0 : index
    %c0_3 = arith.constant 0 : index
    %4 = vector.load %arg3[%c0_2, %c0_3] : memref<128x640xbf16, #tpu.memory_space<vmem>>, vector<128x640xbf16>
    %c0_4 = arith.constant 0 : index
    %c0_5 = arith.constant 0 : index
    %5 = vector.load %arg4[%c0_4, %c0_5] : memref<640x128xbf16, #tpu.memory_space<vmem>>, vector<640x128xbf16>
    %cst = arith.constant dense<0.000000e+00> : vector<128x128xf32>
    %6 = tpu.matmul %4, %5, %cst {dimension_numbers = #tpu.dot_dimension_numbers<[1], [0], [0], [1], [0, 0, 1, 1], [], []>} : vector<128x640xbf16>, vector<640x128xbf16>, vector<128x128xf32> -> vector<128x128xf32>
    %7 = arith.addf %3, %6 : vector<128x128xf32>
    %c0_6 = arith.constant 0 : index
    %c0_7 = arith.constant 0 : index
    %8 = vector.load %arg8[%c0_6, %c0_7] : memref<128x128xf32, #tpu.memory_space<vmem>>, vector<128x128xf32>
    tpu.vector_store %arg8[%c0_6, %c0_7], %7 {strides = array<i32>} : memref<128x128xf32, #tpu.memory_space<vmem>>, vector<128x128xf32>,
    %c0_i32_8 = arith.constant 0 : i32
    %9 = arith.cmpi eq, %arg2, %c0_i32_8 : i32
    %10 = arith.extui %9 : i1 to i32
    %c0_i32_9 = arith.constant 0 : i32
    %11 = arith.cmpi ne, %10, %c0_i32_9 : i32
    scf.if %11 {
      %c0_10 = arith.constant 0 : index
      %c0_11 = arith.constant 0 : index
      %12 = vector.load %arg8[%c0_10, %c0_11] : memref<128x128xf32, #tpu.memory_space<vmem>>, vector<128x128xf32>
      %c0_12 = arith.constant 0 : index
      %c0_13 = arith.constant 0 : index
      %13 = vector.load %arg5[%c0_12, %c0_13] : memref<128x128xf32, #tpu.memory_space<vmem>>, vector<128x128xf32>
      tpu.vector_store %arg5[%c0_12, %c0_13], %12 {strides = array<i32>} : memref<128x128xf32, #tpu.memory_space<vmem>>, vector<128x128xf32>,
      %cst_14 = arith.constant dense<0.000000e+00> : vector<128xf32>
      %14 = vector.multi_reduction <add>, %12, %cst_14 [0] : vector<128x128xf32> to vector<128xf32>
      %15 = vector.shape_cast %14 : vector<128xf32> to vector<1x128xf32>
      %16 = vector.shape_cast %15 : vector<1x128xf32> to vector<1x1x128xf32>
      %c0_15 = arith.constant 0 : index
      %c0_16 = arith.constant 0 : index
      %c0_17 = arith.constant 0 : index
      %17 = vector.load %arg6[%c0_15, %c0_16, %c0_17] : memref<1x1x128xf32, #tpu.memory_space<vmem>>, vector<1x1x128xf32>
      tpu.vector_store %arg6[%c0_15, %c0_16, %c0_17], %16 {strides = array<i32>} : memref<1x1x128xf32, #tpu.memory_space<vmem>>, vector<1x1x128xf32>,
      %18 = arith.mulf %12, %12 : vector<128x128xf32>
      %cst_18 = arith.constant dense<0.000000e+00> : vector<128xf32>
      %19 = vector.multi_reduction <add>, %18, %cst_18 [0] : vector<128x128xf32> to vector<128xf32>
      %20 = vector.shape_cast %19 : vector<128xf32> to vector<1x128xf32>
      %21 = vector.shape_cast %20 : vector<1x128xf32> to vector<1x1x128xf32>
      %c0_19 = arith.constant 0 : index
      %c0_20 = arith.constant 0 : index
      %c0_21 = arith.constant 0 : index
      %22 = vector.load %arg7[%c0_19, %c0_20, %c0_21] : memref<1x1x128xf32, #tpu.memory_space<vmem>>, vector<1x1x128xf32>
      tpu.vector_store %arg7[%c0_19, %c0_20, %c0_21], %21 {strides = array<i32>} : memref<1x1x128xf32, #tpu.memory_space<vmem>>, vector<1x1x128xf32>,
    } else {
    }
    return
  }
  func.func @transform_0(%arg0: i32, %arg1: i32, %arg2: i32) -> (i32, i32) {
    %c0_i32 = arith.constant 0 : i32
    return %arg0, %arg2 : i32, i32
  }
  func.func @transform_1(%arg0: i32, %arg1: i32, %arg2: i32) -> (i32, i32) {
    %c0_i32 = arith.constant 0 : i32
    return %arg2, %arg1 : i32, i32
  }
  func.func @transform_2(%arg0: i32, %arg1: i32, %arg2: i32) -> (i32, i32) {
    %c0_i32 = arith.constant 0 : i32
    return %arg0, %arg1 : i32, i32
  }
  func.func @transform_3(%arg0: i32, %arg1: i32, %arg2: i32) -> (i32, i32, i32) {
    %c0_i32 = arith.constant 0 : i32
    %c0_i32_0 = arith.constant 0 : i32
    return %arg0, %c0_i32, %arg1 : i32, i32, i32
  }
  func.func @transform_4(%arg0: i32, %arg1: i32, %arg2: i32) -> (i32, i32, i32) {
    %c0_i32 = arith.constant 0 : i32
    %c0_i32_0 = arith.constant 0 : i32
    return %arg0, %c0_i32, %arg1 : i32, i32, i32
  }
}

module attributes {stable_mosaic.version = 11 : i64} {
  func.func @_bn_lrelu_kernel(%arg0: i32, %arg1: memref<128x128xf32, #tpu.memory_space<vmem>>, %arg2: memref<1x128xf32, #tpu.memory_space<vmem>>, %arg3: memref<1x128xf32, #tpu.memory_space<vmem>>, %arg4: memref<128x128xf32, #tpu.memory_space<vmem>>) attributes {dimension_semantics = [#tpu.dimension_semantics<parallel>], iteration_bounds = array<i64: 1>, scalar_prefetch = 0 : i64, scratch_operands = 0 : i64, tpu.core_type = #tpu.core_type<tc>, window_params = [{transform_indices = @transform_0, window_bounds = array<i64: 128, 128>}, {pipeline_mode = #tpu.pipeline_mode<synchronous>, transform_indices = @transform_1, window_bounds = array<i64: 1, 128>}, {pipeline_mode = #tpu.pipeline_mode<synchronous>, transform_indices = @transform_2, window_bounds = array<i64: 1, 128>}, {transform_indices = @transform_3, window_bounds = array<i64: 128, 128>}]} {
    %c0 = arith.constant 0 : index
    %c0_0 = arith.constant 0 : index
    %0 = vector.load %arg1[%c0, %c0_0] : memref<128x128xf32, #tpu.memory_space<vmem>>, vector<128x128xf32>
    %c0_1 = arith.constant 0 : index
    %c0_2 = arith.constant 0 : index
    %1 = vector.load %arg2[%c0_1, %c0_2] : memref<1x128xf32, #tpu.memory_space<vmem>>, vector<1x128xf32>
    %2 = vector.broadcast %1 : vector<1x128xf32> to vector<128x128xf32>
    %3 = arith.mulf %0, %2 : vector<128x128xf32>
    %c0_3 = arith.constant 0 : index
    %c0_4 = arith.constant 0 : index
    %4 = vector.load %arg3[%c0_3, %c0_4] : memref<1x128xf32, #tpu.memory_space<vmem>>, vector<1x128xf32>
    %5 = vector.broadcast %4 : vector<1x128xf32> to vector<128x128xf32>
    %6 = arith.addf %3, %5 : vector<128x128xf32>
    %cst = arith.constant 0.000000e+00 : f32
    %7 = vector.broadcast %cst : f32 to vector<128x128xf32>
    %8 = arith.cmpf oge, %6, %7 : vector<128x128xf32>
    %cst_5 = arith.constant 0.00999999977 : f32
    %9 = vector.broadcast %cst_5 : f32 to vector<128x128xf32>
    %10 = arith.mulf %9, %6 : vector<128x128xf32>
    %11 = arith.select %8, %6, %10 : vector<128x128xi1>, vector<128x128xf32>
    %c0_6 = arith.constant 0 : index
    %c0_7 = arith.constant 0 : index
    %12 = vector.load %arg4[%c0_6, %c0_7] : memref<128x128xf32, #tpu.memory_space<vmem>>, vector<128x128xf32>
    tpu.vector_store %arg4[%c0_6, %c0_7], %11 {strides = array<i32>} : memref<128x128xf32, #tpu.memory_space<vmem>>, vector<128x128xf32>,
    return
  }
  func.func @transform_0(%arg0: i32) -> (i32, i32) {
    %c0_i32 = arith.constant 0 : i32
    %c0_i32_0 = arith.constant 0 : i32
    return %arg0, %c0_i32 : i32, i32
  }
  func.func @transform_1(%arg0: i32) -> (i32, i32) {
    %c0_i32 = arith.constant 0 : i32
    %c0_i32_0 = arith.constant 0 : i32
    %c0_i32_1 = arith.constant 0 : i32
    return %c0_i32, %c0_i32_0 : i32, i32
  }
  func.func @transform_2(%arg0: i32) -> (i32, i32) {
    %c0_i32 = arith.constant 0 : i32
    %c0_i32_0 = arith.constant 0 : i32
    %c0_i32_1 = arith.constant 0 : i32
    return %c0_i32, %c0_i32_0 : i32, i32
  }
  func.func @transform_3(%arg0: i32) -> (i32, i32) {
    %c0_i32 = arith.constant 0 : i32
    %c0_i32_0 = arith.constant 0 : i32
    return %arg0, %c0_i32 : i32, i32
  }
}

module attributes {stable_mosaic.version = 11 : i64} {
  func.func @_matmul_stats_kernel(%arg0: i32, %arg1: i32, %arg2: i32, %arg3: memref<32x768xbf16, #tpu.memory_space<vmem>>, %arg4: memref<768x128xbf16, #tpu.memory_space<vmem>>, %arg5: memref<32x128xf32, #tpu.memory_space<vmem>>, %arg6: memref<1x1x128xf32, #tpu.memory_space<vmem>>, %arg7: memref<1x1x128xf32, #tpu.memory_space<vmem>>, %arg8: memref<32x128xf32, #tpu.memory_space<vmem>>) attributes {dimension_semantics = [#tpu.dimension_semantics<parallel>, #tpu.dimension_semantics<parallel>, #tpu.dimension_semantics<arbitrary>], iteration_bounds = array<i64: 1, 2, 3>, scalar_prefetch = 0 : i64, scratch_operands = 1 : i64, tpu.core_type = #tpu.core_type<tc>, window_params = [{transform_indices = @transform_0, window_bounds = array<i64: 32, 768>}, {transform_indices = @transform_1, window_bounds = array<i64: 768, 128>}, {transform_indices = @transform_2, window_bounds = array<i64: 32, 128>}, {transform_indices = @transform_3, window_bounds = array<i64: 1, 1, 128>}, {transform_indices = @transform_4, window_bounds = array<i64: 1, 1, 128>}]} {
    %c0_i32 = arith.constant 0 : i32
    %0 = arith.cmpi eq, %arg2, %c0_i32 : i32
    %1 = arith.extui %0 : i1 to i32
    %c0_i32_0 = arith.constant 0 : i32
    %2 = arith.cmpi ne, %1, %c0_i32_0 : i32
    scf.if %2 {
      %cst_9 = arith.constant 0.000000e+00 : f32
      %12 = vector.broadcast %cst_9 : f32 to vector<32x128xf32>
      %c0_10 = arith.constant 0 : index
      %c0_11 = arith.constant 0 : index
      %13 = vector.load %arg8[%c0_10, %c0_11] : memref<32x128xf32, #tpu.memory_space<vmem>>, vector<32x128xf32>
      tpu.vector_store %arg8[%c0_10, %c0_11], %12 {strides = array<i32>} : memref<32x128xf32, #tpu.memory_space<vmem>>, vector<32x128xf32>,
    } else {
    }
    %c0 = arith.constant 0 : index
    %c0_1 = arith.constant 0 : index
    %3 = vector.load %arg8[%c0, %c0_1] : memref<32x128xf32, #tpu.memory_space<vmem>>, vector<32x128xf32>
    %c0_2 = arith.constant 0 : index
    %c0_3 = arith.constant 0 : index
    %4 = vector.load %arg3[%c0_2, %c0_3] : memref<32x768xbf16, #tpu.memory_space<vmem>>, vector<32x768xbf16>
    %c0_4 = arith.constant 0 : index
    %c0_5 = arith.constant 0 : index
    %5 = vector.load %arg4[%c0_4, %c0_5] : memref<768x128xbf16, #tpu.memory_space<vmem>>, vector<768x128xbf16>
    %cst = arith.constant dense<0.000000e+00> : vector<32x128xf32>
    %6 = tpu.matmul %4, %5, %cst {dimension_numbers = #tpu.dot_dimension_numbers<[1], [0], [0], [1], [0, 0, 1, 1], [], []>} : vector<32x768xbf16>, vector<768x128xbf16>, vector<32x128xf32> -> vector<32x128xf32>
    %7 = arith.addf %3, %6 : vector<32x128xf32>
    %c0_6 = arith.constant 0 : index
    %c0_7 = arith.constant 0 : index
    %8 = vector.load %arg8[%c0_6, %c0_7] : memref<32x128xf32, #tpu.memory_space<vmem>>, vector<32x128xf32>
    tpu.vector_store %arg8[%c0_6, %c0_7], %7 {strides = array<i32>} : memref<32x128xf32, #tpu.memory_space<vmem>>, vector<32x128xf32>,
    %c2_i32 = arith.constant 2 : i32
    %9 = arith.cmpi eq, %arg2, %c2_i32 : i32
    %10 = arith.extui %9 : i1 to i32
    %c0_i32_8 = arith.constant 0 : i32
    %11 = arith.cmpi ne, %10, %c0_i32_8 : i32
    scf.if %11 {
      %c0_9 = arith.constant 0 : index
      %c0_10 = arith.constant 0 : index
      %12 = vector.load %arg8[%c0_9, %c0_10] : memref<32x128xf32, #tpu.memory_space<vmem>>, vector<32x128xf32>
      %c0_11 = arith.constant 0 : index
      %c0_12 = arith.constant 0 : index
      %13 = vector.load %arg5[%c0_11, %c0_12] : memref<32x128xf32, #tpu.memory_space<vmem>>, vector<32x128xf32>
      tpu.vector_store %arg5[%c0_11, %c0_12], %12 {strides = array<i32>} : memref<32x128xf32, #tpu.memory_space<vmem>>, vector<32x128xf32>,
      %cst_13 = arith.constant dense<0.000000e+00> : vector<128xf32>
      %14 = vector.multi_reduction <add>, %12, %cst_13 [0] : vector<32x128xf32> to vector<128xf32>
      %15 = vector.shape_cast %14 : vector<128xf32> to vector<1x128xf32>
      %16 = vector.shape_cast %15 : vector<1x128xf32> to vector<1x1x128xf32>
      %c0_14 = arith.constant 0 : index
      %c0_15 = arith.constant 0 : index
      %c0_16 = arith.constant 0 : index
      %17 = vector.load %arg6[%c0_14, %c0_15, %c0_16] : memref<1x1x128xf32, #tpu.memory_space<vmem>>, vector<1x1x128xf32>
      tpu.vector_store %arg6[%c0_14, %c0_15, %c0_16], %16 {strides = array<i32>} : memref<1x1x128xf32, #tpu.memory_space<vmem>>, vector<1x1x128xf32>,
      %18 = arith.mulf %12, %12 : vector<32x128xf32>
      %cst_17 = arith.constant dense<0.000000e+00> : vector<128xf32>
      %19 = vector.multi_reduction <add>, %18, %cst_17 [0] : vector<32x128xf32> to vector<128xf32>
      %20 = vector.shape_cast %19 : vector<128xf32> to vector<1x128xf32>
      %21 = vector.shape_cast %20 : vector<1x128xf32> to vector<1x1x128xf32>
      %c0_18 = arith.constant 0 : index
      %c0_19 = arith.constant 0 : index
      %c0_20 = arith.constant 0 : index
      %22 = vector.load %arg7[%c0_18, %c0_19, %c0_20] : memref<1x1x128xf32, #tpu.memory_space<vmem>>, vector<1x1x128xf32>
      tpu.vector_store %arg7[%c0_18, %c0_19, %c0_20], %21 {strides = array<i32>} : memref<1x1x128xf32, #tpu.memory_space<vmem>>, vector<1x1x128xf32>,
    } else {
    }
    return
  }
  func.func @transform_0(%arg0: i32, %arg1: i32, %arg2: i32) -> (i32, i32) {
    %c0_i32 = arith.constant 0 : i32
    return %arg0, %arg2 : i32, i32
  }
  func.func @transform_1(%arg0: i32, %arg1: i32, %arg2: i32) -> (i32, i32) {
    %c0_i32 = arith.constant 0 : i32
    return %arg2, %arg1 : i32, i32
  }
  func.func @transform_2(%arg0: i32, %arg1: i32, %arg2: i32) -> (i32, i32) {
    %c0_i32 = arith.constant 0 : i32
    return %arg0, %arg1 : i32, i32
  }
  func.func @transform_3(%arg0: i32, %arg1: i32, %arg2: i32) -> (i32, i32, i32) {
    %c0_i32 = arith.constant 0 : i32
    %c0_i32_0 = arith.constant 0 : i32
    return %arg0, %c0_i32, %arg1 : i32, i32, i32
  }
  func.func @transform_4(%arg0: i32, %arg1: i32, %arg2: i32) -> (i32, i32, i32) {
    %c0_i32 = arith.constant 0 : i32
    %c0_i32_0 = arith.constant 0 : i32
    return %arg0, %c0_i32, %arg1 : i32, i32, i32
  }
}

module attributes {stable_mosaic.version = 11 : i64} {
  func.func @_bn_lrelu_kernel(%arg0: i32, %arg1: memref<32x256xf32, #tpu.memory_space<vmem>>, %arg2: memref<1x256xf32, #tpu.memory_space<vmem>>, %arg3: memref<1x256xf32, #tpu.memory_space<vmem>>, %arg4: memref<32x256xf32, #tpu.memory_space<vmem>>) attributes {dimension_semantics = [#tpu.dimension_semantics<parallel>], iteration_bounds = array<i64: 1>, scalar_prefetch = 0 : i64, scratch_operands = 0 : i64, tpu.core_type = #tpu.core_type<tc>, window_params = [{transform_indices = @transform_0, window_bounds = array<i64: 32, 256>}, {pipeline_mode = #tpu.pipeline_mode<synchronous>, transform_indices = @transform_1, window_bounds = array<i64: 1, 256>}, {pipeline_mode = #tpu.pipeline_mode<synchronous>, transform_indices = @transform_2, window_bounds = array<i64: 1, 256>}, {transform_indices = @transform_3, window_bounds = array<i64: 32, 256>}]} {
    %c0 = arith.constant 0 : index
    %c0_0 = arith.constant 0 : index
    %0 = vector.load %arg1[%c0, %c0_0] : memref<32x256xf32, #tpu.memory_space<vmem>>, vector<32x256xf32>
    %c0_1 = arith.constant 0 : index
    %c0_2 = arith.constant 0 : index
    %1 = vector.load %arg2[%c0_1, %c0_2] : memref<1x256xf32, #tpu.memory_space<vmem>>, vector<1x256xf32>
    %2 = vector.broadcast %1 : vector<1x256xf32> to vector<32x256xf32>
    %3 = arith.mulf %0, %2 : vector<32x256xf32>
    %c0_3 = arith.constant 0 : index
    %c0_4 = arith.constant 0 : index
    %4 = vector.load %arg3[%c0_3, %c0_4] : memref<1x256xf32, #tpu.memory_space<vmem>>, vector<1x256xf32>
    %5 = vector.broadcast %4 : vector<1x256xf32> to vector<32x256xf32>
    %6 = arith.addf %3, %5 : vector<32x256xf32>
    %cst = arith.constant 0.000000e+00 : f32
    %7 = vector.broadcast %cst : f32 to vector<32x256xf32>
    %8 = arith.cmpf oge, %6, %7 : vector<32x256xf32>
    %cst_5 = arith.constant 0.00999999977 : f32
    %9 = vector.broadcast %cst_5 : f32 to vector<32x256xf32>
    %10 = arith.mulf %9, %6 : vector<32x256xf32>
    %11 = arith.select %8, %6, %10 : vector<32x256xi1>, vector<32x256xf32>
    %c0_6 = arith.constant 0 : index
    %c0_7 = arith.constant 0 : index
    %12 = vector.load %arg4[%c0_6, %c0_7] : memref<32x256xf32, #tpu.memory_space<vmem>>, vector<32x256xf32>
    tpu.vector_store %arg4[%c0_6, %c0_7], %11 {strides = array<i32>} : memref<32x256xf32, #tpu.memory_space<vmem>>, vector<32x256xf32>,
    return
  }
  func.func @transform_0(%arg0: i32) -> (i32, i32) {
    %c0_i32 = arith.constant 0 : i32
    %c0_i32_0 = arith.constant 0 : i32
    return %arg0, %c0_i32 : i32, i32
  }
  func.func @transform_1(%arg0: i32) -> (i32, i32) {
    %c0_i32 = arith.constant 0 : i32
    %c0_i32_0 = arith.constant 0 : i32
    %c0_i32_1 = arith.constant 0 : i32
    return %c0_i32, %c0_i32_0 : i32, i32
  }
  func.func @transform_2(%arg0: i32) -> (i32, i32) {
    %c0_i32 = arith.constant 0 : i32
    %c0_i32_0 = arith.constant 0 : i32
    %c0_i32_1 = arith.constant 0 : i32
    return %c0_i32, %c0_i32_0 : i32, i32
  }
  func.func @transform_3(%arg0: i32) -> (i32, i32) {
    %c0_i32 = arith.constant 0 : i32
    %c0_i32_0 = arith.constant 0 : i32
    return %arg0, %c0_i32 : i32, i32
  }
}

module attributes {stable_mosaic.version = 11 : i64} {
  func.func @_matmul_stats_kernel(%arg0: i32, %arg1: i32, %arg2: i32, %arg3: memref<8x1024xbf16, #tpu.memory_space<vmem>>, %arg4: memref<1024x128xbf16, #tpu.memory_space<vmem>>, %arg5: memref<8x128xf32, #tpu.memory_space<vmem>>, %arg6: memref<1x1x128xf32, #tpu.memory_space<vmem>>, %arg7: memref<1x1x128xf32, #tpu.memory_space<vmem>>, %arg8: memref<8x128xf32, #tpu.memory_space<vmem>>) attributes {dimension_semantics = [#tpu.dimension_semantics<parallel>, #tpu.dimension_semantics<parallel>, #tpu.dimension_semantics<arbitrary>], iteration_bounds = array<i64: 1, 4, 9>, scalar_prefetch = 0 : i64, scratch_operands = 1 : i64, tpu.core_type = #tpu.core_type<tc>, window_params = [{transform_indices = @transform_0, window_bounds = array<i64: 8, 1024>}, {transform_indices = @transform_1, window_bounds = array<i64: 1024, 128>}, {transform_indices = @transform_2, window_bounds = array<i64: 8, 128>}, {transform_indices = @transform_3, window_bounds = array<i64: 1, 1, 128>}, {transform_indices = @transform_4, window_bounds = array<i64: 1, 1, 128>}]} {
    %c0_i32 = arith.constant 0 : i32
    %0 = arith.cmpi eq, %arg2, %c0_i32 : i32
    %1 = arith.extui %0 : i1 to i32
    %c0_i32_0 = arith.constant 0 : i32
    %2 = arith.cmpi ne, %1, %c0_i32_0 : i32
    scf.if %2 {
      %cst_9 = arith.constant 0.000000e+00 : f32
      %12 = vector.broadcast %cst_9 : f32 to vector<8x128xf32>
      %c0_10 = arith.constant 0 : index
      %c0_11 = arith.constant 0 : index
      %13 = vector.load %arg8[%c0_10, %c0_11] : memref<8x128xf32, #tpu.memory_space<vmem>>, vector<8x128xf32>
      tpu.vector_store %arg8[%c0_10, %c0_11], %12 {strides = array<i32>} : memref<8x128xf32, #tpu.memory_space<vmem>>, vector<8x128xf32>,
    } else {
    }
    %c0 = arith.constant 0 : index
    %c0_1 = arith.constant 0 : index
    %3 = vector.load %arg8[%c0, %c0_1] : memref<8x128xf32, #tpu.memory_space<vmem>>, vector<8x128xf32>
    %c0_2 = arith.constant 0 : index
    %c0_3 = arith.constant 0 : index
    %4 = vector.load %arg3[%c0_2, %c0_3] : memref<8x1024xbf16, #tpu.memory_space<vmem>>, vector<8x1024xbf16>
    %c0_4 = arith.constant 0 : index
    %c0_5 = arith.constant 0 : index
    %5 = vector.load %arg4[%c0_4, %c0_5] : memref<1024x128xbf16, #tpu.memory_space<vmem>>, vector<1024x128xbf16>
    %cst = arith.constant dense<0.000000e+00> : vector<8x128xf32>
    %6 = tpu.matmul %4, %5, %cst {dimension_numbers = #tpu.dot_dimension_numbers<[1], [0], [0], [1], [0, 0, 1, 1], [], []>} : vector<8x1024xbf16>, vector<1024x128xbf16>, vector<8x128xf32> -> vector<8x128xf32>
    %7 = arith.addf %3, %6 : vector<8x128xf32>
    %c0_6 = arith.constant 0 : index
    %c0_7 = arith.constant 0 : index
    %8 = vector.load %arg8[%c0_6, %c0_7] : memref<8x128xf32, #tpu.memory_space<vmem>>, vector<8x128xf32>
    tpu.vector_store %arg8[%c0_6, %c0_7], %7 {strides = array<i32>} : memref<8x128xf32, #tpu.memory_space<vmem>>, vector<8x128xf32>,
    %c8_i32 = arith.constant 8 : i32
    %9 = arith.cmpi eq, %arg2, %c8_i32 : i32
    %10 = arith.extui %9 : i1 to i32
    %c0_i32_8 = arith.constant 0 : i32
    %11 = arith.cmpi ne, %10, %c0_i32_8 : i32
    scf.if %11 {
      %c0_9 = arith.constant 0 : index
      %c0_10 = arith.constant 0 : index
      %12 = vector.load %arg8[%c0_9, %c0_10] : memref<8x128xf32, #tpu.memory_space<vmem>>, vector<8x128xf32>
      %c0_11 = arith.constant 0 : index
      %c0_12 = arith.constant 0 : index
      %13 = vector.load %arg5[%c0_11, %c0_12] : memref<8x128xf32, #tpu.memory_space<vmem>>, vector<8x128xf32>
      tpu.vector_store %arg5[%c0_11, %c0_12], %12 {strides = array<i32>} : memref<8x128xf32, #tpu.memory_space<vmem>>, vector<8x128xf32>,
      %cst_13 = arith.constant dense<0.000000e+00> : vector<128xf32>
      %14 = vector.multi_reduction <add>, %12, %cst_13 [0] : vector<8x128xf32> to vector<128xf32>
      %15 = vector.shape_cast %14 : vector<128xf32> to vector<1x128xf32>
      %16 = vector.shape_cast %15 : vector<1x128xf32> to vector<1x1x128xf32>
      %c0_14 = arith.constant 0 : index
      %c0_15 = arith.constant 0 : index
      %c0_16 = arith.constant 0 : index
      %17 = vector.load %arg6[%c0_14, %c0_15, %c0_16] : memref<1x1x128xf32, #tpu.memory_space<vmem>>, vector<1x1x128xf32>
      tpu.vector_store %arg6[%c0_14, %c0_15, %c0_16], %16 {strides = array<i32>} : memref<1x1x128xf32, #tpu.memory_space<vmem>>, vector<1x1x128xf32>,
      %18 = arith.mulf %12, %12 : vector<8x128xf32>
      %cst_17 = arith.constant dense<0.000000e+00> : vector<128xf32>
      %19 = vector.multi_reduction <add>, %18, %cst_17 [0] : vector<8x128xf32> to vector<128xf32>
      %20 = vector.shape_cast %19 : vector<128xf32> to vector<1x128xf32>
      %21 = vector.shape_cast %20 : vector<1x128xf32> to vector<1x1x128xf32>
      %c0_18 = arith.constant 0 : index
      %c0_19 = arith.constant 0 : index
      %c0_20 = arith.constant 0 : index
      %22 = vector.load %arg7[%c0_18, %c0_19, %c0_20] : memref<1x1x128xf32, #tpu.memory_space<vmem>>, vector<1x1x128xf32>
      tpu.vector_store %arg7[%c0_18, %c0_19, %c0_20], %21 {strides = array<i32>} : memref<1x1x128xf32, #tpu.memory_space<vmem>>, vector<1x1x128xf32>,
    } else {
    }
    return
  }
  func.func @transform_0(%arg0: i32, %arg1: i32, %arg2: i32) -> (i32, i32) {
    %c0_i32 = arith.constant 0 : i32
    return %arg0, %arg2 : i32, i32
  }
  func.func @transform_1(%arg0: i32, %arg1: i32, %arg2: i32) -> (i32, i32) {
    %c0_i32 = arith.constant 0 : i32
    return %arg2, %arg1 : i32, i32
  }
  func.func @transform_2(%arg0: i32, %arg1: i32, %arg2: i32) -> (i32, i32) {
    %c0_i32 = arith.constant 0 : i32
    return %arg0, %arg1 : i32, i32
  }
  func.func @transform_3(%arg0: i32, %arg1: i32, %arg2: i32) -> (i32, i32, i32) {
    %c0_i32 = arith.constant 0 : i32
    %c0_i32_0 = arith.constant 0 : i32
    return %arg0, %c0_i32, %arg1 : i32, i32, i32
  }
  func.func @transform_4(%arg0: i32, %arg1: i32, %arg2: i32) -> (i32, i32, i32) {
    %c0_i32 = arith.constant 0 : i32
    %c0_i32_0 = arith.constant 0 : i32
    return %arg0, %c0_i32, %arg1 : i32, i32, i32
  }
}

module attributes {stable_mosaic.version = 11 : i64} {
  func.func @_matmul_stats_kernel(%arg0: i32, %arg1: i32, %arg2: i32, %arg3: memref<8x768xbf16, #tpu.memory_space<vmem>>, %arg4: memref<768x128xbf16, #tpu.memory_space<vmem>>, %arg5: memref<8x128xf32, #tpu.memory_space<vmem>>, %arg6: memref<1x1x128xf32, #tpu.memory_space<vmem>>, %arg7: memref<1x1x128xf32, #tpu.memory_space<vmem>>, %arg8: memref<8x128xf32, #tpu.memory_space<vmem>>) attributes {dimension_semantics = [#tpu.dimension_semantics<parallel>, #tpu.dimension_semantics<parallel>, #tpu.dimension_semantics<arbitrary>], iteration_bounds = array<i64: 1, 4, 6>, scalar_prefetch = 0 : i64, scratch_operands = 1 : i64, tpu.core_type = #tpu.core_type<tc>, window_params = [{transform_indices = @transform_0, window_bounds = array<i64: 8, 768>}, {transform_indices = @transform_1, window_bounds = array<i64: 768, 128>}, {transform_indices = @transform_2, window_bounds = array<i64: 8, 128>}, {transform_indices = @transform_3, window_bounds = array<i64: 1, 1, 128>}, {transform_indices = @transform_4, window_bounds = array<i64: 1, 1, 128>}]} {
    %c0_i32 = arith.constant 0 : i32
    %0 = arith.cmpi eq, %arg2, %c0_i32 : i32
    %1 = arith.extui %0 : i1 to i32
    %c0_i32_0 = arith.constant 0 : i32
    %2 = arith.cmpi ne, %1, %c0_i32_0 : i32
    scf.if %2 {
      %cst_9 = arith.constant 0.000000e+00 : f32
      %12 = vector.broadcast %cst_9 : f32 to vector<8x128xf32>
      %c0_10 = arith.constant 0 : index
      %c0_11 = arith.constant 0 : index
      %13 = vector.load %arg8[%c0_10, %c0_11] : memref<8x128xf32, #tpu.memory_space<vmem>>, vector<8x128xf32>
      tpu.vector_store %arg8[%c0_10, %c0_11], %12 {strides = array<i32>} : memref<8x128xf32, #tpu.memory_space<vmem>>, vector<8x128xf32>,
    } else {
    }
    %c0 = arith.constant 0 : index
    %c0_1 = arith.constant 0 : index
    %3 = vector.load %arg8[%c0, %c0_1] : memref<8x128xf32, #tpu.memory_space<vmem>>, vector<8x128xf32>
    %c0_2 = arith.constant 0 : index
    %c0_3 = arith.constant 0 : index
    %4 = vector.load %arg3[%c0_2, %c0_3] : memref<8x768xbf16, #tpu.memory_space<vmem>>, vector<8x768xbf16>
    %c0_4 = arith.constant 0 : index
    %c0_5 = arith.constant 0 : index
    %5 = vector.load %arg4[%c0_4, %c0_5] : memref<768x128xbf16, #tpu.memory_space<vmem>>, vector<768x128xbf16>
    %cst = arith.constant dense<0.000000e+00> : vector<8x128xf32>
    %6 = tpu.matmul %4, %5, %cst {dimension_numbers = #tpu.dot_dimension_numbers<[1], [0], [0], [1], [0, 0, 1, 1], [], []>} : vector<8x768xbf16>, vector<768x128xbf16>, vector<8x128xf32> -> vector<8x128xf32>
    %7 = arith.addf %3, %6 : vector<8x128xf32>
    %c0_6 = arith.constant 0 : index
    %c0_7 = arith.constant 0 : index
    %8 = vector.load %arg8[%c0_6, %c0_7] : memref<8x128xf32, #tpu.memory_space<vmem>>, vector<8x128xf32>
    tpu.vector_store %arg8[%c0_6, %c0_7], %7 {strides = array<i32>} : memref<8x128xf32, #tpu.memory_space<vmem>>, vector<8x128xf32>,
    %c5_i32 = arith.constant 5 : i32
    %9 = arith.cmpi eq, %arg2, %c5_i32 : i32
    %10 = arith.extui %9 : i1 to i32
    %c0_i32_8 = arith.constant 0 : i32
    %11 = arith.cmpi ne, %10, %c0_i32_8 : i32
    scf.if %11 {
      %c0_9 = arith.constant 0 : index
      %c0_10 = arith.constant 0 : index
      %12 = vector.load %arg8[%c0_9, %c0_10] : memref<8x128xf32, #tpu.memory_space<vmem>>, vector<8x128xf32>
      %c0_11 = arith.constant 0 : index
      %c0_12 = arith.constant 0 : index
      %13 = vector.load %arg5[%c0_11, %c0_12] : memref<8x128xf32, #tpu.memory_space<vmem>>, vector<8x128xf32>
      tpu.vector_store %arg5[%c0_11, %c0_12], %12 {strides = array<i32>} : memref<8x128xf32, #tpu.memory_space<vmem>>, vector<8x128xf32>,
      %cst_13 = arith.constant dense<0.000000e+00> : vector<128xf32>
      %14 = vector.multi_reduction <add>, %12, %cst_13 [0] : vector<8x128xf32> to vector<128xf32>
      %15 = vector.shape_cast %14 : vector<128xf32> to vector<1x128xf32>
      %16 = vector.shape_cast %15 : vector<1x128xf32> to vector<1x1x128xf32>
      %c0_14 = arith.constant 0 : index
      %c0_15 = arith.constant 0 : index
      %c0_16 = arith.constant 0 : index
      %17 = vector.load %arg6[%c0_14, %c0_15, %c0_16] : memref<1x1x128xf32, #tpu.memory_space<vmem>>, vector<1x1x128xf32>
      tpu.vector_store %arg6[%c0_14, %c0_15, %c0_16], %16 {strides = array<i32>} : memref<1x1x128xf32, #tpu.memory_space<vmem>>, vector<1x1x128xf32>,
      %18 = arith.mulf %12, %12 : vector<8x128xf32>
      %cst_17 = arith.constant dense<0.000000e+00> : vector<128xf32>
      %19 = vector.multi_reduction <add>, %18, %cst_17 [0] : vector<8x128xf32> to vector<128xf32>
      %20 = vector.shape_cast %19 : vector<128xf32> to vector<1x128xf32>
      %21 = vector.shape_cast %20 : vector<1x128xf32> to vector<1x1x128xf32>
      %c0_18 = arith.constant 0 : index
      %c0_19 = arith.constant 0 : index
      %c0_20 = arith.constant 0 : index
      %22 = vector.load %arg7[%c0_18, %c0_19, %c0_20] : memref<1x1x128xf32, #tpu.memory_space<vmem>>, vector<1x1x128xf32>
      tpu.vector_store %arg7[%c0_18, %c0_19, %c0_20], %21 {strides = array<i32>} : memref<1x1x128xf32, #tpu.memory_space<vmem>>, vector<1x1x128xf32>,
    } else {
    }
    return
  }
  func.func @transform_0(%arg0: i32, %arg1: i32, %arg2: i32) -> (i32, i32) {
    %c0_i32 = arith.constant 0 : i32
    return %arg0, %arg2 : i32, i32
  }
  func.func @transform_1(%arg0: i32, %arg1: i32, %arg2: i32) -> (i32, i32) {
    %c0_i32 = arith.constant 0 : i32
    return %arg2, %arg1 : i32, i32
  }
  func.func @transform_2(%arg0: i32, %arg1: i32, %arg2: i32) -> (i32, i32) {
    %c0_i32 = arith.constant 0 : i32
    return %arg0, %arg1 : i32, i32
  }
  func.func @transform_3(%arg0: i32, %arg1: i32, %arg2: i32) -> (i32, i32, i32) {
    %c0_i32 = arith.constant 0 : i32
    %c0_i32_0 = arith.constant 0 : i32
    return %arg0, %c0_i32, %arg1 : i32, i32, i32
  }
  func.func @transform_4(%arg0: i32, %arg1: i32, %arg2: i32) -> (i32, i32, i32) {
    %c0_i32 = arith.constant 0 : i32
    %c0_i32_0 = arith.constant 0 : i32
    return %arg0, %c0_i32, %arg1 : i32, i32, i32
  }
}

</mosaic_0001>

<bundles_post_ra>
// kernel: rebuild_encoder_forward.35
= control target key start
LH: loop header
LB: loop body
LE: loop exit
PB: predicated region body
PF: predicated region fallthrough
CT: control target
= control target key end

     0   :  { %v20_v0 = vlaneseq  ;;  %s140_s1 = inlined_call_operand.vmem [shape: f32[1,512], index: 1, kind: input, shape index: {}]   ;;  %s141_s2 = inlined_call_operand.vmem [shape: f32[1,512], index: 2, kind: input, shape index: {}]   ;;  %s142_s0 = inlined_call_operand.vmem [shape: f32[8,512], index: 0, kind: input, shape index: {}]   ;;  %s143_s3 = inlined_call_operand.vmem [shape: f32[8,512], index: 3, kind: output, shape index: {}]  }
   0x1   :  { %v18_v2 = vld [vmem:[%s140_s1] sm:$0xf]  ;;  %v15_v9 = vld [vmem:[%s142_s0 + $0x8] sm:$0xff]  ;;  %v16_v14 = vld [vmem:[%s142_s0 + $0x10] sm:$0xff] }
   0x2   :  { %v21_v1 = vshrl.u32 %v20_v0, 7  ;;  %v44_v3 = vld [vmem:[%s141_s2] sm:$0xf]  ;;  %v17_v15 = vld [vmem:[%s142_s0 + $0x18] sm:$0xff] }
   0x3   :  { %v14_v8 = vld [vmem:[%s142_s0] sm:$0xff] }
   0x4   :  { %v22_v4 = vsub.s32 0, %v21_v1  ;;  %v26_v5 = vsub.s32 1, %v21_v1  ;;  %v30_v6 = vsub.s32 2, %v21_v1  ;;  %v34_v7 = vsub.s32 3, %v21_v1 }
   0x6   :  { %v23_v10 = vrot.slane %v18_v2, %v22_v4  ;;  %v49_v11 = vrot.slane %v44_v3, %v22_v4  ;;  %v27_v12 = vrot.slane %v18_v2, %v26_v5  ;;  %v53_v13 = vrot.slane %v44_v3, %v26_v5 }
   0x7   :  { %v31_v16 = vrot.slane %v18_v2, %v30_v6  ;;  %v57_v17 = vrot.slane %v44_v3, %v30_v6  ;;  %v35_v18 = vrot.slane %v18_v2, %v34_v7  ;;  %v61_v19 = vrot.slane %v44_v3, %v34_v7 }
   0x8   :  { %v40_v20 = vmul.f32 %v23_v10, %v14_v8  ;;  %v41_v21 = vmul.f32 %v27_v12, %v15_v9 }
   0x9   :  { %v42_v22 = vmul.f32 %v31_v16, %v16_v14  ;;  %v43_v23 = vmul.f32 %v35_v18, %v17_v15 }
   0xa   :  { %v66_v24 = vadd.f32 %v49_v11, %v40_v20  ;;  %v67_v25 = vadd.f32 %v53_v13, %v41_v21 }
   0xb   :  { %v68_v26 = vadd.f32 %v57_v17, %v42_v22  ;;  %v69_v27 = vadd.f32 %v61_v19, %v43_v23 }
   0xc   :  { %vm70_vm0 = vcmp.ge.f32.partialorder %v66_v24, 0.0  ;;  %v74_v28 = vmul.f32 0.01, %v66_v24  ;;  %vm71_vm1 = vcmp.ge.f32.partialorder %v67_v25, 0.0  ;;  %v75_v29 = vmul.f32 0.01, %v67_v25 }
   0xd   :  { %vm72_vm2 = vcmp.ge.f32.partialorder %v68_v26, 0.0  ;;  %v76_v30 = vmul.f32 0.01, %v68_v26  ;;  %vm73_vm3 = vcmp.ge.f32.partialorder %v69_v27, 0.0  ;;  %v77_v31 = vmul.f32 0.01, %v69_v27 }
   0xe   :  { %v78_v32 = vsel %vm70_vm0, %v66_v24, %v74_v28  ;;  %v79_v33 = vsel %vm71_vm1, %v67_v25, %v75_v29 }
   0xf   :  { %82 = vst [vmem:[%s143_s3] sm:$0xff] %v78_v32  ;;  %83 = vst [vmem:[%s143_s3 + $0x8] sm:$0xff] %v79_v33  ;;  %v80_v34 = vsel %vm72_vm2, %v68_v26, %v76_v30  ;;  %v81_v35 = vsel %vm73_vm3, %v69_v27, %v77_v31 }
  0x10   :  { %84 = vst [vmem:[%s143_s3 + $0x10] sm:$0xff] %v80_v34  ;;  %85 = vst [vmem:[%s143_s3 + $0x18] sm:$0xff] %v81_v35 }

// kernel: rebuild_encoder_forward.34
= control target key start
LH: loop header
LB: loop body
LE: loop exit
PB: predicated region body
PF: predicated region fallthrough
CT: control target
= control target key end

     0   :  { %s1305_s15 = smov 0   ;;  %s1307_s16 = smov 0   ;;  %s1554_s0 = inlined_call_operand.vmem [shape: bf16[8,3456], index: 0, kind: input, shape index: {}]   ;;  %s1555_s1 = inlined_call_operand.vmem [shape: bf16[3456,512], index: 1, kind: input, shape index: {}]   ;;  %s1556_s2 = inlined_call_operand.vmem [shape: f32[8,512], index: 2, kind: output, shape index: {0}]   ;;  %s1557_s3 = inlined_call_operand.vmem [shape: f32[1,1,512], index: 3, kind: output, shape index: {1}]   ;;  %s1558_s4 = inlined_call_operand.vmem [shape: f32[1,1,512], index: 4, kind: output, shape index: {2}]  }
   0x1   :  { %s1309_s17 = smov 0   ;;  %s1311_s18 = smov 0  }
   0x2   :  { %s1313_s19 = smov 0   ;;  %s1315_s20 = smov 0  }
   0x3   :  { %s1317_s21 = smov 0  }
   0x4 LB: > { %s27_s22 = sadd.s32 1, %s1267_s19  ;;  %s30_s23 = sadd.s32 1, %s1271_s20  ;;  %s1275_s21 = sphi %s1317_s21, %s15_s21   ;;  %s1271_s20 = sphi %s1315_s20, %s1564_s20   ;;  %s1267_s19 = sphi %s1313_s19, %s1563_s19   ;;  %s1263_s18 = sphi %s1311_s18, %s1562_s18   ;;  %s1259_s17 = sphi %s1309_s17, %s1561_s17   ;;  %s1255_s16 = sphi %s1307_s16, %s1560_s16   ;;  %s1251_s15 = sphi %s1305_s15, %s1559_s15  }
   0x5   : > { %p28_p0 = scmp.ge.s32.totalorder %s27_s22, 9  ;;  %p78_p1 = scmp.ne.s32.totalorder %s1255_s16, %s1251_s15 }
   0x6   : > { %p79_p2 = scmp.eq.s32.totalorder %s1275_s21, 0  ;;  %s71_s27 = sadd.s32 1, %s1255_s16 }
   0x7   : > { %s1566_s22 = smov (%p28_p0, %s27_s22), 0  ;;  %s1568_s23 = smov (!%p28_p0, %s30_s23), %s1271_s20 }
   0x8   : > { %p80_p3 = por %p79_p2, %p78_p1  ;;  %p32_p4 = scmp.ge.s32.totalorder %s1568_s23, 4 }
   0x9   : > { %s66_s24 = ssub.s32 %s1267_s19, %s1566_s22  ;;  %p1044_p6 = scmp.ge.s32.totalorder %s1275_s21, 36 }
   0xa   : > { %s1570_s23 = smov (%p32_p4, %s1568_s23), 0 }
   0xb   : > { %s67_s25 = ssub.s32 %s1271_s20, %s1570_s23  ;;  %188 = sbr.rel (%p1044_p6) target bundleno = 55 (0x37), region = 16 }
   0xc   : > { %s68_s26 = sor.u32 %s67_s25, %s66_s24 }
   0xd   : > { %p69_p5 = scmp.eq.s32.totalorder %s68_s26, 0 }
   0xf   : > { %s1356_s28 = scalar_select %p69_p5, %s1255_s16, %s71_s27  }
  0x10   : > { %204 = sbr.rel (!%p80_p3) target bundleno = 55 (0x37), region = 24  ;;  %s206_s29 = sand.u32 (%p80_p3), 1, %s1255_s16  }
  0x11   : > { %s1081_s30 = smul.u32 (%p80_p3), 192, %s1267_s19 }
  0x12   : > { %s1133_s5 = smul.u32 (%p80_p3), 192, %s206_s29 }
  0x13   : > { %s211_s6 = sadd.s32 (%p80_p3), %s1271_s20, %s1081_s30 }
  0x14   : > { %s1046_s7 = sshll.u32 (%p80_p3), %s211_s6, 2  ;;  %s1370_s11 = scalar_lea.vmem (%p80_p3), [#allocation3], %s1133_s5 }
  0x15   : > { %s1365_s10 = scalar_lea.vmem %s1555_s1, %s1046_s7 }
  0x16   : > { %v230_v0 = vld [vmem:[%s1365_s10] sm:$0xf]  ;;  %v232_v1 = vld [vmem:[%s1365_s10 + $0x10] sm:$0xf] }
  0x17   : > { %v234_v2 = vld [vmem:[%s1365_s10 + $0x20] sm:$0xf]  ;;  %231 = vst [vmem:[%s1370_s11] sm:$0xf] %v230_v0  ;;  %233 = vst [vmem:[%s1370_s11 + $0x4] sm:$0xf] %v232_v1 }
  0x18   : > { %235 = vst [vmem:[%s1370_s11 + $0x8] sm:$0xf] %v234_v2  ;;  %v236_v3 = vld [vmem:[%s1365_s10 + $0x30] sm:$0xf]  ;;  %v238_v4 = vld [vmem:[%s1365_s10 + $0x40] sm:$0xf] }
  0x19   : > { %v240_v5 = vld [vmem:[%s1365_s10 + $0x50] sm:$0xf]  ;;  %237 = vst [vmem:[%s1370_s11 + $0xc] sm:$0xf] %v236_v3  ;;  %239 = vst [vmem:[%s1370_s11 + $0x10] sm:$0xf] %v238_v4 }
  0x1a   : > { %241 = vst [vmem:[%s1370_s11 + $0x14] sm:$0xf] %v240_v5  ;;  %v242_v6 = vld [vmem:[%s1365_s10 + $0x60] sm:$0xf]  ;;  %v244_v7 = vld [vmem:[%s1365_s10 + $0x70] sm:$0xf] }
  0x1b   : > { %v246_v8 = vld [vmem:[%s1365_s10 + $0x80] sm:$0xf]  ;;  %243 = vst [vmem:[%s1370_s11 + $0x18] sm:$0xf] %v242_v6  ;;  %245 = vst [vmem:[%s1370_s11 + $0x1c] sm:$0xf] %v244_v7 }
  0x1c   : > { %247 = vst [vmem:[%s1370_s11 + $0x20] sm:$0xf] %v246_v8  ;;  %v248_v9 = vld [vmem:[%s1365_s10 + $0x90] sm:$0xf]  ;;  %v250_v10 = vld [vmem:[%s1365_s10 + $0xa0] sm:$0xf] }
  0x1d   : > { %v252_v11 = vld [vmem:[%s1365_s10 + $0xb0] sm:$0xf]  ;;  %249 = vst [vmem:[%s1370_s11 + $0x24] sm:$0xf] %v248_v9  ;;  %251 = vst [vmem:[%s1370_s11 + $0x28] sm:$0xf] %v250_v10 }
  0x1e   : > { %253 = vst [vmem:[%s1370_s11 + $0x2c] sm:$0xf] %v252_v11  ;;  %v254_v12 = vld [vmem:[%s1365_s10 + $0xc0] sm:$0xf]  ;;  %v256_v13 = vld [vmem:[%s1365_s10 + $0xd0] sm:$0xf] }
  0x1f   : > { %v258_v14 = vld [vmem:[%s1365_s10 + $0xe0] sm:$0xf]  ;;  %255 = vst [vmem:[%s1370_s11 + $0x30] sm:$0xf] %v254_v12  ;;  %257 = vst [vmem:[%s1370_s11 + $0x34] sm:$0xf] %v256_v13 }
  0x20   : > { %259 = vst [vmem:[%s1370_s11 + $0x38] sm:$0xf] %v258_v14  ;;  %v260_v15 = vld [vmem:[%s1365_s10 + $0xf0] sm:$0xf]  ;;  %v262_v16 = vld [vmem:[%s1365_s10 + $0x100] sm:$0xf] }
  0x21   : > { %v264_v17 = vld [vmem:[%s1365_s10 + $0x110] sm:$0xf]  ;;  %261 = vst [vmem:[%s1370_s11 + $0x3c] sm:$0xf] %v260_v15  ;;  %263 = vst [vmem:[%s1370_s11 + $0x40] sm:$0xf] %v262_v16 }
  0x22   : > { %265 = vst [vmem:[%s1370_s11 + $0x44] sm:$0xf] %v264_v17  ;;  %v266_v18 = vld [vmem:[%s1365_s10 + $0x120] sm:$0xf]  ;;  %v268_v19 = vld [vmem:[%s1365_s10 + $0x130] sm:$0xf] }
  0x23   : > { %v270_v20 = vld [vmem:[%s1365_s10 + $0x140] sm:$0xf]  ;;  %267 = vst [vmem:[%s1370_s11 + $0x48] sm:$0xf] %v266_v18  ;;  %269 = vst [vmem:[%s1370_s11 + $0x4c] sm:$0xf] %v268_v19 }
  0x24   : > { %271 = vst [vmem:[%s1370_s11 + $0x50] sm:$0xf] %v270_v20  ;;  %v272_v21 = vld [vmem:[%s1365_s10 + $0x150] sm:$0xf]  ;;  %v274_v22 = vld [vmem:[%s1365_s10 + $0x160] sm:$0xf] }
  0x25   : > { %v276_v23 = vld [vmem:[%s1365_s10 + $0x170] sm:$0xf]  ;;  %273 = vst [vmem:[%s1370_s11 + $0x54] sm:$0xf] %v272_v21  ;;  %275 = vst [vmem:[%s1370_s11 + $0x58] sm:$0xf] %v274_v22 }
  0x26   : > { %277 = vst [vmem:[%s1370_s11 + $0x5c] sm:$0xf] %v276_v23  ;;  %v278_v24 = vld [vmem:[%s1365_s10 + $0x180] sm:$0xf]  ;;  %v280_v25 = vld [vmem:[%s1365_s10 + $0x190] sm:$0xf] }
  0x27   : > { %v282_v26 = vld [vmem:[%s1365_s10 + $0x1a0] sm:$0xf]  ;;  %279 = vst [vmem:[%s1370_s11 + $0x60] sm:$0xf] %v278_v24  ;;  %281 = vst [vmem:[%s1370_s11 + $0x64] sm:$0xf] %v280_v25 }
  0x28   : > { %283 = vst [vmem:[%s1370_s11 + $0x68] sm:$0xf] %v282_v26  ;;  %v284_v27 = vld [vmem:[%s1365_s10 + $0x1b0] sm:$0xf]  ;;  %v286_v28 = vld [vmem:[%s1365_s10 + $0x1c0] sm:$0xf] }
  0x29   : > { %v288_v29 = vld [vmem:[%s1365_s10 + $0x1d0] sm:$0xf]  ;;  %285 = vst [vmem:[%s1370_s11 + $0x6c] sm:$0xf] %v284_v27  ;;  %287 = vst [vmem:[%s1370_s11 + $0x70] sm:$0xf] %v286_v28 }
  0x2a   : > { %289 = vst [vmem:[%s1370_s11 + $0x74] sm:$0xf] %v288_v29  ;;  %v290_v30 = vld [vmem:[%s1365_s10 + $0x1e0] sm:$0xf]  ;;  %v292_v31 = vld [vmem:[%s1365_s10 + $0x1f0] sm:$0xf] }
  0x2b   : > { %v294_v32 = vld [vmem:[%s1365_s10 + $0x200] sm:$0xf]  ;;  %291 = vst [vmem:[%s1370_s11 + $0x78] sm:$0xf] %v290_v30  ;;  %293 = vst [vmem:[%s1370_s11 + $0x7c] sm:$0xf] %v292_v31 }
  0x2c   : > { %295 = vst [vmem:[%s1370_s11 + $0x80] sm:$0xf] %v294_v32  ;;  %v296_v33 = vld [vmem:[%s1365_s10 + $0x210] sm:$0xf]  ;;  %v298_v34 = vld [vmem:[%s1365_s10 + $0x220] sm:$0xf] }
  0x2d   : > { %v300_v35 = vld [vmem:[%s1365_s10 + $0x230] sm:$0xf]  ;;  %297 = vst [vmem:[%s1370_s11 + $0x84] sm:$0xf] %v296_v33  ;;  %299 = vst [vmem:[%s1370_s11 + $0x88] sm:$0xf] %v298_v34 }
  0x2e   : > { %301 = vst [vmem:[%s1370_s11 + $0x8c] sm:$0xf] %v300_v35  ;;  %v302_v36 = vld [vmem:[%s1365_s10 + $0x240] sm:$0xf]  ;;  %v304_v37 = vld [vmem:[%s1365_s10 + $0x250] sm:$0xf] }
  0x2f   : > { %v306_v38 = vld [vmem:[%s1365_s10 + $0x260] sm:$0xf]  ;;  %303 = vst [vmem:[%s1370_s11 + $0x90] sm:$0xf] %v302_v36  ;;  %305 = vst [vmem:[%s1370_s11 + $0x94] sm:$0xf] %v304_v37 }
  0x30   : > { %307 = vst [vmem:[%s1370_s11 + $0x98] sm:$0xf] %v306_v38  ;;  %v308_v39 = vld [vmem:[%s1365_s10 + $0x270] sm:$0xf]  ;;  %v310_v40 = vld [vmem:[%s1365_s10 + $0x280] sm:$0xf] }
  0x31   : > { %v312_v41 = vld [vmem:[%s1365_s10 + $0x290] sm:$0xf]  ;;  %309 = vst [vmem:[%s1370_s11 + $0x9c] sm:$0xf] %v308_v39  ;;  %311 = vst [vmem:[%s1370_s11 + $0xa0] sm:$0xf] %v310_v40 }
  0x32   : > { %313 = vst [vmem:[%s1370_s11 + $0xa4] sm:$0xf] %v312_v41  ;;  %v314_v42 = vld [vmem:[%s1365_s10 + $0x2a0] sm:$0xf]  ;;  %v316_v43 = vld [vmem:[%s1365_s10 + $0x2b0] sm:$0xf] }
  0x33   : > { %v318_v44 = vld [vmem:[%s1365_s10 + $0x2c0] sm:$0xf]  ;;  %315 = vst [vmem:[%s1370_s11 + $0xa8] sm:$0xf] %v314_v42  ;;  %317 = vst [vmem:[%s1370_s11 + $0xac] sm:$0xf] %v316_v43 }
  0x34   : > { %319 = vst [vmem:[%s1370_s11 + $0xb0] sm:$0xf] %v318_v44  ;;  %v320_v45 = vld [vmem:[%s1365_s10 + $0x2d0] sm:$0xf]  ;;  %v322_v46 = vld [vmem:[%s1365_s10 + $0x2e0] sm:$0xf] }
  0x35   : > { %v324_v47 = vld [vmem:[%s1365_s10 + $0x2f0] sm:$0xf]  ;;  %321 = vst [vmem:[%s1370_s11 + $0xb4] sm:$0xf] %v320_v45  ;;  %323 = vst [vmem:[%s1370_s11 + $0xb8] sm:$0xf] %v322_v46 }
  0x36   : > { %325 = vst [vmem:[%s1370_s11 + $0xbc] sm:$0xf] %v324_v47 }
  0x37 PF: > { %p1047_p7 = scmp.ge.s32.totalorder %s1275_s21, 1  ;;  %p444_p8 = scmp.lt.s32.totalorder %s1275_s21, 37 }
  0x39   : > { %p445_p9 = pnand %p1047_p7, %p444_p8 }
  0x3a   : > { %s451_s12 = sand.u32 (!%p445_p9), 1, %s1251_s15   ;;  %s502_s13 = smul.u32 (!%p445_p9), 3, %s1259_s17 }
  0x3b   : > { %448 = sbr.rel (%p445_p9) target bundleno = 333 (0x14d), region = 65  ;;  %p515_p10 = scmp.lt.s32.totalorder (!%p445_p9), %s1263_s18, 3 }
  0x3c   : > { %s1134_s14 = smul.u32 (!%p445_p9), 192, %s451_s12  ;;  %p505_p11 = scmp.lt.s32.totalorder (!%p445_p9), %s502_s13, 26 }
  0x3d   : > { %p1050_p12 = scmp.ne.s32.totalorder (!%p445_p9), %s1259_s17, 0 }
  0x3e   : > { %s1492_s12 = scalar_lea.vmem (!%p445_p9), [#allocation3], %s1134_s14 }
  0x40   : > { %s1572_s13 = smov (!%p505_p11, %s502_s13), 26  ;;  %s1574_s18 = smov (!%p515_p10, %s1263_s18), 3 }
  0x41   : > { %s1048_s24 = sshll.u32 %s1572_s13, 2  ;;  %s1049_s29 = sshll.u32 %s1574_s18, 3 }
  0x42   : > { %s1476_s27 = scalar_lea.vmem %s1554_s0, %s1048_s24  ;;  %s1482_s15 = scalar_lea.vmem %s1556_s2, %s1049_s29 }
  0x43   : > { %s527_s8 = scalar_lea.vmem %s1557_s3, %s1574_s18  ;;  %s534_s11 = scalar_lea.vmem %s1558_s4, %s1574_s18 }
  0x44   : > { %539 = sbr.rel (%p1050_p12) target bundleno = 75 (0x4b), region = 73 }
  0x49   : > { %v1277_v48 = vmov 0.0  }
  0x4a   : > { %540 = vst [vmem:[#allocation2] sm:$0xff] %v1277_v48 }
  0x4b PF: > { %v1194_v49 = vld [vmem:[%s1492_s12 + $0x78] sm:$0xff]   ;;  %v1278_v50 = vmov 0.0   ;;  %vm1279_vm0 = vmmov 0   ;;  %v1197_v53 = vld [vmem:[%s1492_s12 + $0x70] sm:$0xff]   ;;  %v1200_v56 = vld [vmem:[%s1492_s12 + $0x68] sm:$0xff]   ;;  %p1078_p13 = scmp.ne.s32.totalorder %s1259_s17, 8 }
  0x4c   : > { %1113 = vmatprep.subr.bf16.mxu1 %v1278_v50  ;;  %v1195_v51 = vld [vmem:[%s1492_s12 + $0xb8] sm:$0xff]   ;;  %1082 = vmatprep.subr.bf16.mxu0 %v1194_v49  ;;  %v1198_v54 = vld [vmem:[%s1492_s12 + $0xb0] sm:$0xff]   ;;  %v1201_v57 = vld [vmem:[%s1492_s12 + $0xa8] sm:$0xff]  }
  0x4d   : > { %v1196_v52 = vld [vmem:[%s1492_s12 + $0x38] sm:$0xff]   ;;  %1129 = vmatprep.mubr.msk.bf16.mxu1 %vm1279_vm0, %v1278_v50  ;;  %1114 = vmatpush3.bf16.msra.mxu1 %v1195_v51  ;;  %v1199_v55 = vld [vmem:[%s1492_s12 + $0x30] sm:$0xff]   ;;  %v1202_v58 = vld [vmem:[%s1492_s12 + $0x28] sm:$0xff]  }
  0x4e   : > { %1083 = vmatpush3.bf16.msra.mxu0 %v1196_v52  ;;  %1115 = vmatprep.subr.bf16.mxu1 %v1278_v50  ;;  %v1203_v59 = vld [vmem:[%s1492_s12 + $0x60] sm:$0xff]   ;;  %v1206_v62 = vld [vmem:[%s1492_s12 + $0x58] sm:$0xff]   ;;  %v1209_v1 = vld [vmem:[%s1492_s12 + $0x50] sm:$0xff]  }
  0x4f   : > { %1084 = vmatprep.subr.bf16.mxu0 %v1197_v53  ;;  %v1204_v60 = vld [vmem:[%s1492_s12 + $0xa0] sm:$0xff]   ;;  %v1207_v63 = vld [vmem:[%s1492_s12 + $0x98] sm:$0xff]   ;;  %v1210_v2 = vld [vmem:[%s1492_s12 + $0x90] sm:$0xff]  }
  0x50   : > { %v1205_v61 = vld [vmem:[%s1492_s12 + $0x20] sm:$0xff]   ;;  %v1208_v0 = vld [vmem:[%s1492_s12 + $0x18] sm:$0xff]   ;;  %v1211_v3 = vld [vmem:[%s1492_s12 + $0x10] sm:$0xff]  }
  0x51   : > { %1116 = vmatpush3.bf16.msra.mxu1 %v1198_v54  ;;  %v1212_v4 = vld [vmem:[%s1492_s12 + $0x48] sm:$0xff]   ;;  %v542_v7 = vld [vmem:[%s1476_s27] sm:$0xff]  ;;  %v1215_v8 = vld [vmem:[%s1492_s12 + $0x40] sm:$0xff]  }
  0x52   : > { %1085 = vmatpush3.bf16.msra.mxu0 %v1199_v55  ;;  %1117 = vmatprep.subr.bf16.mxu1 %v1278_v50  ;;  %v1213_v5 = vld [vmem:[%s1492_s12 + $0x88] sm:$0xff]   ;;  %v1052_v9 = vcombine.high %v542_v7, %v542_v7  ;;  %v1216_v10 = vld [vmem:[%s1492_s12 + $0x80] sm:$0xff]   ;;  %v1051_v13 = vcombine.low %v542_v7, %v542_v7  ;;  %v541_v20 = vld [vmem:[#allocation2] sm:$0xff] }
  0x53   : > { %1086 = vmatprep.subr.bf16.mxu0 %v1200_v56  ;;  %v1214_v6 = vld [vmem:[%s1492_s12 + $0x8] sm:$0xff]   ;;  %v1217_v11 = vld [vmem:[%s1492_s12] sm:$0xff]  }
  0x54   : > { %779 = vmatprep.mubr.bf16.mxu0 %v1052_v9  ;;  %v1220_v12 = vld [vmem:[%s1476_s27 + $0x8] ss:$0 sps:$4 sm:$0xff]  }
  0x55   : > { %1118 = vmatpush3.bf16.msra.mxu1 %v1201_v57 }
  0x56   : > { %1087 = vmatpush3.bf16.msra.mxu0 %v1202_v58  ;;  %1119 = vmatprep.subr.bf16.mxu1 %v1278_v50 }
  0x57   : > { %1088 = vmatprep.subr.bf16.mxu0 %v1203_v59 }
  0x59   : > { %1120 = vmatpush3.bf16.msra.mxu1 %v1204_v60 }
  0x5a   : > { %1089 = vmatpush3.bf16.msra.mxu0 %v1205_v61  ;;  %1121 = vmatprep.subr.bf16.mxu1 %v1278_v50 }
  0x5b   : > { %1090 = vmatprep.subr.bf16.mxu0 %v1206_v62 }
  0x5d   : > { %1122 = vmatpush3.bf16.msra.mxu1 %v1207_v63 }
  0x5e   : > { %1091 = vmatpush3.bf16.msra.mxu0 %v1208_v0  ;;  %1123 = vmatprep.subr.bf16.mxu1 %v1278_v50 }
  0x5f   : > { %1092 = vmatprep.subr.bf16.mxu0 %v1209_v1 }
  0x61   : > { %1124 = vmatpush3.bf16.msra.mxu1 %v1210_v2 }
  0x62   : > { %1093 = vmatpush3.bf16.msra.mxu0 %v1211_v3  ;;  %1125 = vmatprep.subr.bf16.mxu1 %v1278_v50 }
  0x63   : > { %1094 = vmatprep.subr.bf16.mxu0 %v1212_v4 }
  0x65   : > { %1126 = vmatpush3.bf16.msra.mxu1 %v1213_v5 }
  0x66   : > { %1095 = vmatpush3.bf16.msra.mxu0 %v1214_v6  ;;  %1127 = vmatprep.subr.bf16.mxu1 %v1278_v50 }
  0x67   : > { %1096 = vmatprep.subr.bf16.mxu0 %v1215_v8 }
  0x69   : > { %1128 = vmatpush3.bf16.msra.mxu1 %v1216_v10 }
  0x6a   : > { %1097 = vmatpush3.bf16.msra.mxu0 %v1217_v11 }
  0x6c   : > { %1130 = vmatmul.mubr.bf16.vlgmr.msra.gmra.mxu1 %v1220_v12 }
  0x6d   : > { %780 = vmatmul.mubr.bf16.vlgmr.msra.gmra.mxu0 %v1051_v13 }
 0x12c   : > { %v821_v14 = vpop.f32.mrf.mxu1 }
 0x12d   : > { %v1098_v15 = vpop.f32.mrf.mxu0 }
 0x12e   : > { %v1131_v16 = vpop.f32.mrf.mxu1 }
 0x12f   : > { %v1099_v17 = vpop.f32.mrf.mxu0 }
 0x130   : > { %v1100_v18 = vadd.f32 %v1099_v17, %v1098_v15  ;;  %v824_v19 = vpop.f32.mrf.mxu1 }
 0x131   : > { %v1101_v21 = vpop.f32.mrf.mxu0 }
 0x132   : > { %v822_v22 = vadd.f32 %v1100_v18, %v821_v14  ;;  %v1132_v23 = vpop.f32.mrf.mxu1  ;;  %832 = sbr.rel (%p1078_p13) target bundleno = 333 (0x14d), region = 77 }
 0x133   : > { %v1102_v24 = vpop.f32.mrf.mxu0 }
 0x134   : > { %v827_v25 = vadd.f32 %v822_v22, %v541_v20 }
 0x136   : > { %828 = vst [vmem:[#allocation2] sm:$0xff] %v827_v25 }
 0x13d   : > { %v833_v26 = vld [vmem:[#allocation2] sm:$0xff] }
 0x13e   : > { %834 = vst [vmem:[%s1482_s15] sm:$0xff] %v833_v26  ;;  %v835_v27 = vrot.slane %v833_v26, 4  ;;  %v842_v28 = vmul.f32 %v833_v26, %v833_v26 }
 0x140   : > { %v836_v29 = vadd.f32 %v835_v27, %v833_v26  ;;  %v843_v30 = vrot.slane %v842_v28, 4 }
 0x142   : > { %v837_v31 = vrot.slane %v836_v29, 2  ;;  %v844_v32 = vadd.f32 %v843_v30, %v842_v28 }
 0x144   : > { %v838_v33 = vadd.f32 %v837_v31, %v836_v29  ;;  %v845_v34 = vrot.slane %v844_v32, 2 }
 0x146   : > { %v839_v35 = vrot.slane %v838_v33, 1  ;;  %v846_v36 = vadd.f32 %v845_v34, %v844_v32 }
 0x148   : > { %v840_v37 = vadd.f32 %v839_v35, %v838_v33  ;;  %v847_v38 = vrot.slane %v846_v36, 1 }
 0x14a   : > { %841 = vst [vmem:[%s527_s8] sm:$0x1] %v840_v37  ;;  %v848_v39 = vadd.f32 %v847_v38, %v846_v36 }
 0x14c   : > { %849 = vst [vmem:[%s534_s11] sm:$0x1] %v848_v39 }
 0x14d PF: > { %s15_s21 = sadd.s32 1, %s1275_s21   ;;  %s1559_s15 = smov %s1255_s16 }
 0x14e   : > { %p12_p0 = scmp.ge.s32.totalorder %s15_s21, 38   ;;  %s1560_s16 = smov %s1356_s28 }
 0x14f   : > { %s1561_s17 = smov %s1267_s19  ;;  %s1562_s18 = smov %s1271_s20 }
 0x150   : > { %s1563_s19 = smov %s1566_s22  ;;  %s1564_s20 = smov %s1570_s23 }
 0x151   :  { %14 = sbr.rel (!%p12_p0) target bundleno = 4 (0x4), region = 139 }

// kernel: rebuild_encoder_forward.18
= control target key start
LH: loop header
LB: loop body
LE: loop exit
PB: predicated region body
PF: predicated region fallthrough
CT: control target
= control target key end

     0   :  { %s1601_s15 = smov 0   ;;  %s1603_s16 = smov 0   ;;  %s1858_s0 = inlined_call_operand.vmem [shape: bf16[512,256], index: 0, kind: input, shape index: {}]   ;;  %s1859_s1 = inlined_call_operand.vmem [shape: bf16[256,128], index: 1, kind: input, shape index: {}]   ;;  %s1860_s2 = inlined_call_operand.vmem [shape: f32[512,128], index: 2, kind: output, shape index: {0}]   ;;  %s1861_s3 = inlined_call_operand.vmem [shape: f32[2,1,128], index: 3, kind: output, shape index: {1}]   ;;  %s1862_s4 = inlined_call_operand.vmem [shape: f32[2,1,128], index: 4, kind: output, shape index: {2}]  }
   0x1   :  { %s1605_s17 = smov 0  }
   0x2 LB: > { %s34_s18 = sadd.s32 1, %s1570_s16  ;;  %p1279_p0 = scmp.ge.s32.totalorder %s1574_s17, 1  ;;  %s1574_s17 = sphi %s1605_s17, %s15_s17   ;;  %s1570_s16 = sphi %s1603_s16, %s1864_s16   ;;  %s1566_s15 = sphi %s1601_s15, %s1863_s15  }
   0x3   : > { %p36_p1 = scmp.ge.s32.totalorder %s34_s18, 2  ;;  %p217_p2 = scmp.lt.s32.totalorder %s1574_s17, 3 }
   0x5   : > { %s1866_s18 = smov (%p36_p1, %s34_s18), 0  ;;  %p218_p3 = pnand %p1279_p0, %p217_p2 }
   0x6   : > { %s1280_s21 = sshll.u32 (!%p218_p3), %s1566_s15, 5  ;;  %p301_p5 = scmp.lt.s32.totalorder (!%p218_p3), %s1566_s15, 1 }
   0x7   : > { %221 = sbr.rel (%p218_p3) target bundleno = 351 (0x15f), region = 28  ;;  %p273_p4 = scmp.lt.s32.totalorder (!%p218_p3), %s1280_s21, 63 }
   0xc   : > { %v1488_v0 = vld [vmem:[%s1859_s1 + $0x78] sm:$0xff]   ;;  %v1490_v2 = vld [vmem:[%s1859_s1 + $0x70] sm:$0xff]   ;;  %v1492_v4 = vld [vmem:[%s1859_s1 + $0x68] sm:$0xff]   ;;  %s1868_s21 = smov (!%p273_p4, %s1280_s21), 63  ;;  %s1870_s15 = smov (!%p301_p5, %s1566_s15), 1 }
   0xd   : > { %v1489_v1 = vld [vmem:[%s1859_s1 + $0x38] sm:$0xff]   ;;  %1336 = vmatprep.subr.bf16.mxu0 %v1488_v0  ;;  %1448 = vmatprep.subr.bf16.mxu1 %v1488_v0  ;;  %v1491_v3 = vld [vmem:[%s1859_s1 + $0x30] sm:$0xff]   ;;  %v1493_v5 = vld [vmem:[%s1859_s1 + $0x28] sm:$0xff]   ;;  %s1335_s10 = sshll.u32 %s1868_s21, 3  ;;  %s306_s13 = scalar_lea.vmem %s1861_s3, %s1870_s15 }
   0xe   : > { %1337 = vmatpush3.bf16.msra.mxu0 %v1489_v1  ;;  %1456 = vmatpush3.bf16.msra.mxu1 %v1489_v1  ;;  %v1494_v6 = vld [vmem:[%s1859_s1 + $0x60] sm:$0xff]   ;;  %v1496_v8 = vld [vmem:[%s1859_s1 + $0x58] sm:$0xff]   ;;  %s1657_s19 = scalar_lea.vmem %s1858_s0, %s1335_s10  ;;  %v1498_v10 = vld [vmem:[%s1859_s1 + $0x50] sm:$0xff]   ;;  %s1717_s12 = scalar_lea.vmem %s1860_s2, %s1335_s10 }
   0xf   : > { %1338 = vmatprep.subr.bf16.mxu0 %v1490_v2  ;;  %1449 = vmatprep.subr.bf16.mxu1 %v1490_v2  ;;  %v1495_v7 = vld [vmem:[%s1859_s1 + $0x20] sm:$0xff]   ;;  %v1497_v9 = vld [vmem:[%s1859_s1 + $0x18] sm:$0xff]   ;;  %v1499_v12 = vld [vmem:[%s1859_s1 + $0x10] sm:$0xff]   ;;  %s312_s20 = scalar_lea.vmem %s1862_s4, %s1870_s15 }
  0x10   : > { %v1506_v11 = vld [vmem:[%s1657_s19 + $0x4] ss:$8 sps:$4 sm:$0xff]   ;;  %v1504_v18 = vld [vmem:[%s1657_s19] ss:$8 sps:$4 sm:$0xff]   ;;  %v1507_v19 = vld [vmem:[%s1657_s19 + $0x14] ss:$8 sps:$4 sm:$0xff]  }
  0x11   : > { %734 = vmatprep.mubr.bf16.mxu0 %v1506_v11  ;;  %v1500_v13 = vld [vmem:[%s1859_s1 + $0x48] sm:$0xff]   ;;  %v1502_v16 = vld [vmem:[%s1859_s1 + $0x40] sm:$0xff]   ;;  %v1522_v21 = vld [vmem:[%s1657_s19 + $0x94] ss:$8 sps:$4 sm:$0xff]  }
  0x12   : > { %1339 = vmatpush3.bf16.msra.mxu0 %v1491_v3  ;;  %1457 = vmatpush3.bf16.msra.mxu1 %v1491_v3  ;;  %v1518_v14 = vld [vmem:[%s1657_s19 + $0x84] ss:$8 sps:$4 sm:$0xff]   ;;  %v1516_v20 = vld [vmem:[%s1657_s19 + $0x80] ss:$8 sps:$4 sm:$0xff]   ;;  %v1509_v22 = vld [vmem:[%s1657_s19 + $0x10] ss:$8 sps:$4 sm:$0xff]  }
  0x13   : > { %1340 = vmatprep.subr.bf16.mxu0 %v1492_v4  ;;  %1450 = vmatprep.subr.bf16.mxu1 %v1492_v4  ;;  %v1501_v15 = vld [vmem:[%s1859_s1 + $0x8] sm:$0xff]   ;;  %v1503_v17 = vld [vmem:[%s1859_s1] sm:$0xff]   ;;  %v1524_v24 = vld [vmem:[%s1657_s19 + $0x90] ss:$8 sps:$4 sm:$0xff]  }
  0x14   : > { %798 = vmatprep.mubr.bf16.mxu1 %v1518_v14  ;;  %v1510_v23 = vld [vmem:[%s1657_s19 + $0x24] ss:$8 sps:$4 sm:$0xff]   ;;  %v1512_v26 = vld [vmem:[%s1657_s19 + $0x20] ss:$8 sps:$4 sm:$0xff]   ;;  %v1513_v27 = vld [vmem:[%s1657_s19 + $0x34] ss:$8 sps:$4 sm:$0xff]  }
  0x15   : > { %v1528_v25 = vld [vmem:[%s1657_s19 + $0xa4] ss:$8 sps:$4 sm:$0xff]   ;;  %v1530_v28 = vld [vmem:[%s1657_s19 + $0xa0] ss:$8 sps:$4 sm:$0xff]   ;;  %v1534_v29 = vld [vmem:[%s1657_s19 + $0xb4] ss:$8 sps:$4 sm:$0xff]  }
  0x16   : > { %1341 = vmatpush3.bf16.msra.mxu0 %v1493_v5  ;;  %1458 = vmatpush3.bf16.msra.mxu1 %v1493_v5  ;;  %v1515_v30 = vld [vmem:[%s1657_s19 + $0x30] ss:$8 sps:$4 sm:$0xff]   ;;  %v1519_v31 = vld [vmem:[%s1657_s19 + $0x44] ss:$8 sps:$4 sm:$0xff]   ;;  %v1521_v34 = vld [vmem:[%s1657_s19 + $0x40] ss:$8 sps:$4 sm:$0xff]  }
  0x17   : > { %1342 = vmatprep.subr.bf16.mxu0 %v1494_v6  ;;  %1451 = vmatprep.subr.bf16.mxu1 %v1494_v6  ;;  %v1536_v32 = vld [vmem:[%s1657_s19 + $0xb0] ss:$8 sps:$4 sm:$0xff]   ;;  %v1540_v33 = vld [vmem:[%s1657_s19 + $0xc4] ss:$8 sps:$4 sm:$0xff]   ;;  %v1525_v35 = vld [vmem:[%s1657_s19 + $0x54] ss:$8 sps:$4 sm:$0xff]  }
  0x18   : > { %v1542_v36 = vld [vmem:[%s1657_s19 + $0xc0] ss:$8 sps:$4 sm:$0xff]   ;;  %v1543_v37 = vld [vmem:[%s1657_s19 + $0xd4] ss:$8 sps:$4 sm:$0xff]   ;;  %v1527_v38 = vld [vmem:[%s1657_s19 + $0x50] ss:$8 sps:$4 sm:$0xff]  }
  0x19   : > { %v1531_v39 = vld [vmem:[%s1657_s19 + $0x64] ss:$8 sps:$4 sm:$0xff]   ;;  %v1545_v40 = vld [vmem:[%s1657_s19 + $0xd0] ss:$8 sps:$4 sm:$0xff]   ;;  %v1533_v42 = vld [vmem:[%s1657_s19 + $0x60] ss:$8 sps:$4 sm:$0xff]  }
  0x1a   : > { %1343 = vmatpush3.bf16.msra.mxu0 %v1495_v7  ;;  %1459 = vmatpush3.bf16.msra.mxu1 %v1495_v7  ;;  %v1546_v41 = vld [vmem:[%s1657_s19 + $0xe4] ss:$8 sps:$4 sm:$0xff]   ;;  %v1537_v43 = vld [vmem:[%s1657_s19 + $0x74] ss:$8 sps:$4 sm:$0xff]   ;;  %v1548_v44 = vld [vmem:[%s1657_s19 + $0xe0] ss:$8 sps:$4 sm:$0xff]  }
  0x1b   : > { %1344 = vmatprep.subr.bf16.mxu0 %v1496_v8  ;;  %1452 = vmatprep.subr.bf16.mxu1 %v1496_v8  ;;  %v1549_v45 = vld [vmem:[%s1657_s19 + $0xf4] ss:$8 sps:$4 sm:$0xff]   ;;  %v1539_v46 = vld [vmem:[%s1657_s19 + $0x70] ss:$8 sps:$4 sm:$0xff]  }
  0x1c   : > { %v1551_v47 = vld [vmem:[%s1657_s19 + $0xf0] ss:$8 sps:$4 sm:$0xff]  }
  0x1e   : > { %1345 = vmatpush3.bf16.msra.mxu0 %v1497_v9  ;;  %1460 = vmatpush3.bf16.msra.mxu1 %v1497_v9 }
  0x1f   : > { %1346 = vmatprep.subr.bf16.mxu0 %v1498_v10  ;;  %1453 = vmatprep.subr.bf16.mxu1 %v1498_v10 }
  0x22   : > { %1347 = vmatpush3.bf16.msra.mxu0 %v1499_v12  ;;  %1461 = vmatpush3.bf16.msra.mxu1 %v1499_v12 }
  0x23   : > { %1348 = vmatprep.subr.bf16.mxu0 %v1500_v13  ;;  %1454 = vmatprep.subr.bf16.mxu1 %v1500_v13 }
  0x26   : > { %1349 = vmatpush3.bf16.msra.mxu0 %v1501_v15  ;;  %1462 = vmatpush3.bf16.msra.mxu1 %v1501_v15 }
  0x27   : > { %1350 = vmatprep.subr.bf16.mxu0 %v1502_v16  ;;  %1455 = vmatprep.subr.bf16.mxu1 %v1502_v16 }
  0x2a   : > { %1351 = vmatpush3.bf16.msra.mxu0 %v1503_v17  ;;  %1463 = vmatpush3.bf16.msra.mxu1 %v1503_v17 }
  0x2d   : > { %735 = vmatmul.mubr.bf16.vlgmr.msra.gmra.mxu0 %v1504_v18  ;;  %799 = vmatmul.mubr.bf16.vlgmr.msra.gmra.mxu1 %v1516_v20 }
  0x2e   : > { %742 = vmatprep.mubr.bf16.mxu0 %v1507_v19  ;;  %806 = vmatprep.mubr.bf16.mxu1 %v1522_v21 }
  0x35   : > { %743 = vmatmul.mubr.bf16.gmra.mxu0 %v1509_v22  ;;  %807 = vmatmul.mubr.bf16.gmra.mxu1 %v1524_v24 }
  0x36   : > { %750 = vmatprep.mubr.bf16.mxu0 %v1510_v23  ;;  %814 = vmatprep.mubr.bf16.mxu1 %v1528_v25 }
  0x3d   : > { %751 = vmatmul.mubr.bf16.gmra.mxu0 %v1512_v26  ;;  %815 = vmatmul.mubr.bf16.gmra.mxu1 %v1530_v28 }
  0x3e   : > { %758 = vmatprep.mubr.bf16.mxu0 %v1513_v27  ;;  %822 = vmatprep.mubr.bf16.mxu1 %v1534_v29 }
  0x45   : > { %759 = vmatmul.mubr.bf16.gmra.mxu0 %v1515_v30  ;;  %823 = vmatmul.mubr.bf16.gmra.mxu1 %v1536_v32 }
  0x46   : > { %766 = vmatprep.mubr.bf16.mxu0 %v1519_v31  ;;  %830 = vmatprep.mubr.bf16.mxu1 %v1540_v33 }
  0x4d   : > { %767 = vmatmul.mubr.bf16.gmra.mxu0 %v1521_v34  ;;  %831 = vmatmul.mubr.bf16.gmra.mxu1 %v1542_v36 }
  0x4e   : > { %774 = vmatprep.mubr.bf16.mxu0 %v1525_v35  ;;  %838 = vmatprep.mubr.bf16.mxu1 %v1543_v37 }
  0x55   : > { %775 = vmatmul.mubr.bf16.gmra.mxu0 %v1527_v38  ;;  %839 = vmatmul.mubr.bf16.gmra.mxu1 %v1545_v40 }
  0x56   : > { %782 = vmatprep.mubr.bf16.mxu0 %v1531_v39  ;;  %846 = vmatprep.mubr.bf16.mxu1 %v1546_v41 }
  0x5d   : > { %783 = vmatmul.mubr.bf16.gmra.mxu0 %v1533_v42  ;;  %847 = vmatmul.mubr.bf16.gmra.mxu1 %v1548_v44 }
  0x5e   : > { %790 = vmatprep.mubr.bf16.mxu0 %v1537_v43  ;;  %854 = vmatprep.mubr.bf16.mxu1 %v1549_v45 }
  0x65   : > { %791 = vmatmul.mubr.bf16.gmra.mxu0 %v1539_v46  ;;  %855 = vmatmul.mubr.bf16.gmra.mxu1 %v1551_v47 }
  0xed   : > { %v1352_v48 = vpop.f32.mrf.mxu0  ;;  %v1400_v49 = vpop.f32.mrf.mxu1 }
  0xef   : > { %v1353_v50 = vpop.f32.mrf.mxu0  ;;  %v1401_v52 = vpop.f32.mrf.mxu1 }
  0xf0   : > { %v1719_v51 = vadd.f32 %v1353_v50, %v1352_v48  ;;  %v1721_v54 = vadd.f32 %v1401_v52, %v1400_v49 }
  0xf1   : > { %v1355_v53 = vpop.f32.mrf.mxu0  ;;  %v1403_v55 = vpop.f32.mrf.mxu1 }
  0xf2   : > { %962 = vst [vmem:[%s1717_s12] sm:$0xff] %v1719_v51  ;;  %978 = vst [vmem:[%s1717_s12 + $0x80] sm:$0xff] %v1721_v54  ;;  %v1032_v40 = vmul.f32 %v1719_v51, %v1719_v51 }
  0xf3   : > { %v1356_v56 = vpop.f32.mrf.mxu0  ;;  %v1404_v58 = vpop.f32.mrf.mxu1 }
  0xf4   : > { %v1357_v57 = vadd.f32 %v1356_v56, %v1355_v53  ;;  %v1727_v60 = vadd.f32 %v1404_v58, %v1403_v55 }
  0xf5   : > { %v1358_v59 = vpop.f32.mrf.mxu0  ;;  %v1406_v61 = vpop.f32.mrf.mxu1 }
  0xf6   : > { %963 = vst [vmem:[%s1717_s12 + $0x8] sm:$0xff] %v1357_v57  ;;  %979 = vst [vmem:[%s1717_s12 + $0x88] sm:$0xff] %v1727_v60  ;;  %v1033_v35 = vmul.f32 %v1357_v57, %v1357_v57  ;;  %v994_v41 = vadd.f32 %v1357_v57, %v1719_v51 }
  0xf7   : > { %v1359_v62 = vpop.f32.mrf.mxu0  ;;  %v1407_v0 = vpop.f32.mrf.mxu1 }
  0xf8   : > { %v1360_v63 = vadd.f32 %v1359_v62, %v1358_v59  ;;  %v1732_v2 = vadd.f32 %v1407_v0, %v1406_v61  ;;  %v1064_v45 = vadd.f32 %v1033_v35, %v1032_v40 }
  0xf9   : > { %v1361_v1 = vpop.f32.mrf.mxu0  ;;  %v1409_v3 = vpop.f32.mrf.mxu1 }
  0xfa   : > { %964 = vst [vmem:[%s1717_s12 + $0x10] sm:$0xff] %v1360_v63  ;;  %980 = vst [vmem:[%s1717_s12 + $0x90] sm:$0xff] %v1732_v2  ;;  %v1034_v42 = vmul.f32 %v1360_v63, %v1360_v63  ;;  %v995_v46 = vadd.f32 %v1360_v63, %v994_v41 }
  0xfb   : > { %v1362_v4 = vpop.f32.mrf.mxu0  ;;  %v1410_v6 = vpop.f32.mrf.mxu1 }
  0xfc   : > { %v1363_v5 = vadd.f32 %v1362_v4, %v1361_v1  ;;  %v1737_v8 = vadd.f32 %v1410_v6, %v1409_v3  ;;  %v1065_v53 = vadd.f32 %v1064_v45, %v1034_v42 }
  0xfd   : > { %v1364_v7 = vpop.f32.mrf.mxu0  ;;  %v1412_v9 = vpop.f32.mrf.mxu1 }
  0xfe   : > { %965 = vst [vmem:[%s1717_s12 + $0x18] sm:$0xff] %v1363_v5  ;;  %981 = vst [vmem:[%s1717_s12 + $0x98] sm:$0xff] %v1737_v8  ;;  %v1035_v47 = vmul.f32 %v1363_v5, %v1363_v5  ;;  %v996_v55 = vadd.f32 %v1363_v5, %v995_v46 }
  0xff   : > { %v1365_v10 = vpop.f32.mrf.mxu0  ;;  %v1413_v12 = vpop.f32.mrf.mxu1 }
 0x100   : > { %v1366_v11 = vadd.f32 %v1365_v10, %v1364_v7  ;;  %v1742_v14 = vadd.f32 %v1413_v12, %v1412_v9  ;;  %v1066_v58 = vadd.f32 %v1065_v53, %v1035_v47 }
 0x101   : > { %v1367_v13 = vpop.f32.mrf.mxu0  ;;  %v1415_v15 = vpop.f32.mrf.mxu1 }
 0x102   : > { %966 = vst [vmem:[%s1717_s12 + $0x20] sm:$0xff] %v1366_v11  ;;  %982 = vst [vmem:[%s1717_s12 + $0xa0] sm:$0xff] %v1742_v14  ;;  %v1036_v51 = vmul.f32 %v1366_v11, %v1366_v11  ;;  %v997_v59 = vadd.f32 %v1366_v11, %v996_v55 }
 0x103   : > { %v1368_v16 = vpop.f32.mrf.mxu0  ;;  %v1416_v18 = vpop.f32.mrf.mxu1 }
 0x104   : > { %v1369_v17 = vadd.f32 %v1368_v16, %v1367_v13  ;;  %v1747_v20 = vadd.f32 %v1416_v18, %v1415_v15  ;;  %v1067_v3 = vadd.f32 %v1066_v58, %v1036_v51 }
 0x105   : > { %v1370_v19 = vpop.f32.mrf.mxu0  ;;  %v1418_v21 = vpop.f32.mrf.mxu1 }
 0x106   : > { %967 = vst [vmem:[%s1717_s12 + $0x28] sm:$0xff] %v1369_v17  ;;  %983 = vst [vmem:[%s1717_s12 + $0xa8] sm:$0xff] %v1747_v20  ;;  %v1037_v61 = vmul.f32 %v1369_v17, %v1369_v17  ;;  %v998_v4 = vadd.f32 %v1369_v17, %v997_v59 }
 0x107   : > { %v1371_v22 = vpop.f32.mrf.mxu0  ;;  %v1419_v24 = vpop.f32.mrf.mxu1 }
 0x108   : > { %v1372_v23 = vadd.f32 %v1371_v22, %v1370_v19  ;;  %v1752_v26 = vadd.f32 %v1419_v24, %v1418_v21  ;;  %v1068_v9 = vadd.f32 %v1067_v3, %v1037_v61 }
 0x109   : > { %v1373_v25 = vpop.f32.mrf.mxu0  ;;  %v1421_v27 = vpop.f32.mrf.mxu1 }
 0x10a   : > { %968 = vst [vmem:[%s1717_s12 + $0x30] sm:$0xff] %v1372_v23  ;;  %984 = vst [vmem:[%s1717_s12 + $0xb0] sm:$0xff] %v1752_v26  ;;  %v1038_v5 = vmul.f32 %v1372_v23, %v1372_v23  ;;  %v999_v10 = vadd.f32 %v1372_v23, %v998_v4 }
 0x10b   : > { %v1374_v28 = vpop.f32.mrf.mxu0  ;;  %v1422_v30 = vpop.f32.mrf.mxu1 }
 0x10c   : > { %v1375_v29 = vadd.f32 %v1374_v28, %v1373_v25  ;;  %v1757_v32 = vadd.f32 %v1422_v30, %v1421_v27  ;;  %v1069_v18 = vadd.f32 %v1068_v9, %v1038_v5 }
 0x10d   : > { %v1376_v31 = vpop.f32.mrf.mxu0  ;;  %v1424_v33 = vpop.f32.mrf.mxu1 }
 0x10e   : > { %969 = vst [vmem:[%s1717_s12 + $0x38] sm:$0xff] %v1375_v29  ;;  %985 = vst [vmem:[%s1717_s12 + $0xb8] sm:$0xff] %v1757_v32  ;;  %v1039_v12 = vmul.f32 %v1375_v29, %v1375_v29  ;;  %v1000_v19 = vadd.f32 %v1375_v29, %v999_v10 }
 0x10f   : > { %v1377_v34 = vpop.f32.mrf.mxu0  ;;  %v1425_v37 = vpop.f32.mrf.mxu1 }
 0x110   : > { %v1378_v36 = vadd.f32 %v1377_v34, %v1376_v31  ;;  %v1762_v39 = vadd.f32 %v1425_v37, %v1424_v33  ;;  %v1070_v24 = vadd.f32 %v1069_v18, %v1039_v12  ;;  %v1049_v18 = vmul.f32 %v1727_v60, %v1727_v60 }
 0x111   : > { %v1379_v38 = vpop.f32.mrf.mxu0  ;;  %v1427_v43 = vpop.f32.mrf.mxu1 }
 0x112   : > { %970 = vst [vmem:[%s1717_s12 + $0x40] sm:$0xff] %v1378_v36  ;;  %986 = vst [vmem:[%s1717_s12 + $0xc0] sm:$0xff] %v1762_v39  ;;  %v1040_v17 = vmul.f32 %v1378_v36, %v1378_v36  ;;  %v1001_v25 = vadd.f32 %v1378_v36, %v1000_v19 }
 0x113   : > { %v1380_v44 = vpop.f32.mrf.mxu0  ;;  %v1428_v49 = vpop.f32.mrf.mxu1 }
 0x114   : > { %v1381_v48 = vadd.f32 %v1380_v44, %v1379_v38  ;;  %v1770_v52 = vadd.f32 %v1428_v49, %v1427_v43  ;;  %v1071_v33 = vadd.f32 %v1070_v24, %v1040_v17 }
 0x115   : > { %v1382_v50 = vpop.f32.mrf.mxu0  ;;  %v1430_v56 = vpop.f32.mrf.mxu1 }
 0x116   : > { %971 = vst [vmem:[%s1717_s12 + $0x48] sm:$0xff] %v1381_v48  ;;  %987 = vst [vmem:[%s1717_s12 + $0xc8] sm:$0xff] %v1770_v52  ;;  %v1041_v27 = vmul.f32 %v1381_v48, %v1381_v48  ;;  %v1002_v34 = vadd.f32 %v1381_v48, %v1001_v25  ;;  %v1051_v25 = vmul.f32 %v1737_v8, %v1737_v8 }
 0x117   : > { %v1383_v57 = vpop.f32.mrf.mxu0  ;;  %v1431_v63 = vpop.f32.mrf.mxu1 }
 0x118   : > { %v1384_v62 = vadd.f32 %v1383_v57, %v1382_v50  ;;  %v1775_v1 = vadd.f32 %v1431_v63, %v1430_v56  ;;  %v1072_v38 = vadd.f32 %v1071_v33, %v1041_v27 }
 0x119   : > { %v1385_v0 = vpop.f32.mrf.mxu0  ;;  %v1433_v6 = vpop.f32.mrf.mxu1 }
 0x11a   : > { %972 = vst [vmem:[%s1717_s12 + $0x50] sm:$0xff] %v1384_v62  ;;  %988 = vst [vmem:[%s1717_s12 + $0xd0] sm:$0xff] %v1775_v1  ;;  %v1042_v29 = vmul.f32 %v1384_v62, %v1384_v62  ;;  %v1003_v40 = vadd.f32 %v1384_v62, %v1002_v34 }
 0x11b   : > { %v1386_v7 = vpop.f32.mrf.mxu0  ;;  %v1434_v13 = vpop.f32.mrf.mxu1 }
 0x11c   : > { %v1387_v11 = vadd.f32 %v1386_v7, %v1385_v0  ;;  %v1780_v16 = vadd.f32 %v1434_v13, %v1433_v6  ;;  %v1073_v45 = vadd.f32 %v1072_v38, %v1042_v29 }
 0x11d   : > { %v1388_v15 = vpop.f32.mrf.mxu0  ;;  %v1436_v21 = vpop.f32.mrf.mxu1 }
 0x11e   : > { %973 = vst [vmem:[%s1717_s12 + $0x58] sm:$0xff] %v1387_v11  ;;  %989 = vst [vmem:[%s1717_s12 + $0xd8] sm:$0xff] %v1780_v16  ;;  %v1043_v41 = vmul.f32 %v1387_v11, %v1387_v11  ;;  %v1004_v46 = vadd.f32 %v1387_v11, %v1003_v40  ;;  %v1048_v11 = vmul.f32 %v1721_v54, %v1721_v54 }
 0x11f   : > { %v1389_v22 = vpop.f32.mrf.mxu0  ;;  %v1437_v28 = vpop.f32.mrf.mxu1 }
 0x120   : > { %v1390_v23 = vadd.f32 %v1389_v22, %v1388_v15  ;;  %v1785_v31 = vadd.f32 %v1437_v28, %v1436_v21  ;;  %v1074_v50 = vadd.f32 %v1073_v45, %v1043_v41  ;;  %v1050_v21 = vmul.f32 %v1732_v2, %v1732_v2 }
 0x121   : > { %v1391_v30 = vpop.f32.mrf.mxu0  ;;  %v1439_v35 = vpop.f32.mrf.mxu1  ;;  %v1058_v45 = vmul.f32 %v1775_v1, %v1775_v1 }
 0x122   : > { %974 = vst [vmem:[%s1717_s12 + $0x60] sm:$0xff] %v1390_v23  ;;  %990 = vst [vmem:[%s1717_s12 + $0xe0] sm:$0xff] %v1785_v31  ;;  %v1044_v47 = vmul.f32 %v1390_v23, %v1390_v23  ;;  %v1005_v53 = vadd.f32 %v1390_v23, %v1004_v46 }
 0x123   : > { %v1392_v37 = vpop.f32.mrf.mxu0  ;;  %v1440_v42 = vpop.f32.mrf.mxu1 }
 0x124   : > { %v1393_v36 = vadd.f32 %v1392_v37, %v1391_v30  ;;  %v1790_v44 = vadd.f32 %v1440_v42, %v1439_v35  ;;  %v1075_v59 = vadd.f32 %v1074_v50, %v1044_v47 }
 0x125   : > { %v1394_v43 = vpop.f32.mrf.mxu0  ;;  %v1442_v48 = vpop.f32.mrf.mxu1 }
 0x126   : > { %975 = vst [vmem:[%s1717_s12 + $0x68] sm:$0xff] %v1393_v36  ;;  %991 = vst [vmem:[%s1717_s12 + $0xe8] sm:$0xff] %v1790_v44  ;;  %v1045_v55 = vmul.f32 %v1393_v36, %v1393_v36  ;;  %v1006_v61 = vadd.f32 %v1393_v36, %v1005_v53  ;;  %v1057_v36 = vmul.f32 %v1770_v52, %v1770_v52 }
 0x127   : > { %v1395_v49 = vpop.f32.mrf.mxu0  ;;  %v1443_v56 = vpop.f32.mrf.mxu1 }
 0x128   : > { %v1396_v51 = vadd.f32 %v1395_v49, %v1394_v43  ;;  %v1444_v58 = vadd.f32 %v1443_v56, %v1442_v48  ;;  %v1076_v3 = vadd.f32 %v1075_v59, %v1045_v55 }
 0x129   : > { %v1397_v57 = vpop.f32.mrf.mxu0  ;;  %v1445_v63 = vpop.f32.mrf.mxu1 }
 0x12a   : > { %976 = vst [vmem:[%s1717_s12 + $0x70] sm:$0xff] %v1396_v51  ;;  %v1046_v62 = vmul.f32 %v1396_v51, %v1396_v51  ;;  %992 = vst [vmem:[%s1717_s12 + $0xf0] sm:$0xff] %v1444_v58  ;;  %v1007_v4 = vadd.f32 %v1396_v51, %v1006_v61  ;;  %v1062_v51 = vmul.f32 %v1444_v58, %v1444_v58 }
 0x12b   : > { %v1398_v0 = vpop.f32.mrf.mxu0  ;;  %v1446_v6 = vpop.f32.mrf.mxu1 }
 0x12c   : > { %v1399_v5 = vadd.f32 %v1398_v0, %v1397_v57  ;;  %v1447_v7 = vadd.f32 %v1446_v6, %v1445_v63  ;;  %v1077_v9 = vadd.f32 %v1076_v3, %v1046_v62 }
 0x12e   : > { %977 = vst [vmem:[%s1717_s12 + $0x78] sm:$0xff] %v1399_v5  ;;  %v1008_v10 = vadd.f32 %v1399_v5, %v1007_v4  ;;  %v1047_v12 = vmul.f32 %v1399_v5, %v1399_v5  ;;  %993 = vst [vmem:[%s1717_s12 + $0xf8] sm:$0xff] %v1447_v7  ;;  %v1063_v59 = vmul.f32 %v1447_v7, %v1447_v7 }
 0x130   : > { %v1009_v13 = vadd.f32 %v1721_v54, %v1008_v10  ;;  %v1078_v15 = vadd.f32 %v1077_v9, %v1047_v12  ;;  %v1052_v54 = vmul.f32 %v1742_v14, %v1742_v14 }
 0x132   : > { %v1010_v19 = vadd.f32 %v1727_v60, %v1009_v13  ;;  %v1079_v17 = vadd.f32 %v1078_v15, %v1048_v11  ;;  %v1053_v60 = vmul.f32 %v1747_v20, %v1747_v20 }
 0x134   : > { %v1011_v22 = vadd.f32 %v1732_v2, %v1010_v19  ;;  %v1080_v24 = vadd.f32 %v1079_v17, %v1049_v18  ;;  %v1054_v2 = vmul.f32 %v1752_v26, %v1752_v26 }
 0x136   : > { %v1012_v27 = vadd.f32 %v1737_v8, %v1011_v22  ;;  %v1081_v23 = vadd.f32 %v1080_v24, %v1050_v21  ;;  %v1055_v8 = vmul.f32 %v1757_v32, %v1757_v32 }
 0x138   : > { %v1082_v28 = vadd.f32 %v1081_v23, %v1051_v25  ;;  %v1013_v30 = vadd.f32 %v1742_v14, %v1012_v27  ;;  %v1056_v14 = vmul.f32 %v1762_v39, %v1762_v39 }
 0x13a   : > { %v1014_v33 = vadd.f32 %v1747_v20, %v1013_v30  ;;  %v1083_v34 = vadd.f32 %v1082_v28, %v1052_v54 }
 0x13c   : > { %v1015_v29 = vadd.f32 %v1752_v26, %v1014_v33  ;;  %v1084_v35 = vadd.f32 %v1083_v34, %v1053_v60 }
 0x13e   : > { %v1016_v37 = vadd.f32 %v1757_v32, %v1015_v29  ;;  %v1085_v38 = vadd.f32 %v1084_v35, %v1054_v2 }
 0x140   : > { %v1017_v40 = vadd.f32 %v1762_v39, %v1016_v37  ;;  %v1086_v41 = vadd.f32 %v1085_v38, %v1055_v8  ;;  %v1059_v39 = vmul.f32 %v1780_v16, %v1780_v16 }
 0x142   : > { %v1018_v20 = vadd.f32 %v1770_v52, %v1017_v40  ;;  %v1087_v42 = vadd.f32 %v1086_v41, %v1056_v14  ;;  %v1060_v52 = vmul.f32 %v1785_v31, %v1785_v31 }
 0x144   : > { %v1088_v26 = vadd.f32 %v1087_v42, %v1057_v36  ;;  %v1019_v43 = vadd.f32 %v1775_v1, %v1018_v20  ;;  %v1061_v1 = vmul.f32 %v1790_v44, %v1790_v44 }
 0x146   : > { %v1089_v32 = vadd.f32 %v1088_v26, %v1058_v45  ;;  %v1020_v46 = vadd.f32 %v1780_v16, %v1019_v43 }
 0x148   : > { %v1090_v47 = vadd.f32 %v1089_v32, %v1059_v39  ;;  %v1021_v48 = vadd.f32 %v1785_v31, %v1020_v46 }
 0x14a   : > { %v1091_v49 = vadd.f32 %v1090_v47, %v1060_v52  ;;  %v1022_v50 = vadd.f32 %v1790_v44, %v1021_v48 }
 0x14c   : > { %v1092_v53 = vadd.f32 %v1091_v49, %v1061_v1  ;;  %v1023_v55 = vadd.f32 %v1444_v58, %v1022_v50 }
 0x14e   : > { %v1093_v56 = vadd.f32 %v1092_v53, %v1062_v51  ;;  %v1024_v57 = vadd.f32 %v1447_v7, %v1023_v55 }
 0x150   : > { %v1025_v16 = vrot.slane %v1024_v57, 4  ;;  %v1094_v61 = vadd.f32 %v1093_v56, %v1063_v59 }
 0x152   : > { %v1026_v62 = vadd.f32 %v1025_v16, %v1024_v57  ;;  %v1095_v63 = vrot.slane %v1094_v61, 4 }
 0x154   : > { %v1027_v0 = vrot.slane %v1026_v62, 2  ;;  %v1096_v31 = vadd.f32 %v1095_v63, %v1094_v61 }
 0x156   : > { %v1028_v3 = vadd.f32 %v1027_v0, %v1026_v62  ;;  %v1097_v4 = vrot.slane %v1096_v31, 2 }
 0x158   : > { %v1029_v5 = vrot.slane %v1028_v3, 1  ;;  %v1098_v6 = vadd.f32 %v1097_v4, %v1096_v31 }
 0x15a   : > { %v1030_v44 = vadd.f32 %v1029_v5, %v1028_v3  ;;  %v1099_v58 = vrot.slane %v1098_v6, 1 }
 0x15c   : > { %1031 = vst [vmem:[%s306_s13] sm:$0x1] %v1030_v44  ;;  %v1100_v7 = vadd.f32 %v1099_v58, %v1098_v6 }
 0x15e   : > { %1101 = vst [vmem:[%s312_s20] sm:$0x1] %v1100_v7 }
 0x15f PF: > { %s15_s17 = sadd.s32 1, %s1574_s17   ;;  %s1863_s15 = smov %s1570_s16 }
 0x160   : > { %p12_p6 = scmp.ge.s32.totalorder %s15_s17, 4   ;;  %s1864_s16 = smov %s1866_s18 }
 0x162   :  { %14 = sbr.rel (!%p12_p6) target bundleno = 2 (0x2), region = 93 }

// kernel: rebuild_encoder_forward.19
= control target key start
LH: loop header
LB: loop body
LE: loop exit
PB: predicated region body
PF: predicated region fallthrough
CT: control target
= control target key end

     0   :  { %s517_s12 = smov 0   ;;  %s679_s0 = inlined_call_operand.vmem [shape: f32[512,128], index: 0, kind: input, shape index: {}]   ;;  %s680_s1 = inlined_call_operand.vmem [shape: f32[1,128], index: 1, kind: input, shape index: {}]   ;;  %s681_s2 = inlined_call_operand.vmem [shape: f32[1,128], index: 2, kind: input, shape index: {}]   ;;  %s682_s3 = inlined_call_operand.vmem [shape: f32[512,128], index: 3, kind: output, shape index: {}]  }
   0x1 LB: > { %s468_s13 = sadd.s32 4294967295, %s495_s12   ;;  %p472_p0 = scmp.ge.s32.totalorder %s495_s12, 1  ;;  %s495_s12 = sphi %s517_s12, %s13_s12  }
   0x2   : > { %p138_p1 = scmp.lt.s32.totalorder %s495_s12, 3 }
   0x4   : > { %p139_p2 = pnand %p472_p0, %p138_p1 }
   0x5   : > { %s473_s14 = sshll.u32 (!%p139_p2), %s468_s13, 5 }
   0x6   : > { %142 = sbr.rel (%p139_p2) target bundleno = 60 (0x3c), region = 32  ;;  %p163_p3 = scmp.lt.s32.totalorder (!%p139_p2), %s473_s14, 63 }
   0xb   : > { %s684_s14 = smov (!%p163_p3, %s473_s14), 63  ;;  %v531_v0 = vld [vmem:[%s680_s1] ss:$0 sm:$0xff] }
   0xc   : > { %s474_s15 = sshll.u32 %s684_s14, 3  ;;  %v541_v1 = vld [vmem:[%s681_s2] ss:$0 sm:$0xff] }
   0xd   : > { %s536_s20 = scalar_lea.vmem %s679_s0, %s474_s15  ;;  %s569_s25 = scalar_lea.vmem %s682_s3, %s474_s15 }
   0xe   : > { %v174_v2 = vld [vmem:[%s536_s20] sm:$0xff]  ;;  %v175_v3 = vld [vmem:[%s536_s20 + $0x8] sm:$0xff]  ;;  %v176_v4 = vld [vmem:[%s536_s20 + $0x10] sm:$0xff] }
   0xf   : > { %v213_v5 = vmul.f32 %v531_v0, %v174_v2  ;;  %v214_v6 = vmul.f32 %v531_v0, %v175_v3  ;;  %v215_v7 = vmul.f32 %v531_v0, %v176_v4  ;;  %v177_v8 = vld [vmem:[%s536_s20 + $0x18] sm:$0xff]  ;;  %v178_v9 = vld [vmem:[%s536_s20 + $0x20] sm:$0xff]  ;;  %v179_v10 = vld [vmem:[%s536_s20 + $0x28] sm:$0xff] }
  0x10   : > { %v216_v11 = vmul.f32 %v531_v0, %v177_v8  ;;  %v217_v12 = vmul.f32 %v531_v0, %v178_v9  ;;  %v218_v13 = vmul.f32 %v531_v0, %v179_v10  ;;  %v180_v14 = vld [vmem:[%s536_s20 + $0x30] sm:$0xff]  ;;  %v181_v15 = vld [vmem:[%s536_s20 + $0x38] sm:$0xff]  ;;  %v182_v24 = vld [vmem:[%s536_s20 + $0x40] sm:$0xff] }
  0x11   : > { %v252_v16 = vadd.f32 %v541_v1, %v213_v5  ;;  %v253_v17 = vadd.f32 %v541_v1, %v214_v6  ;;  %v254_v18 = vadd.f32 %v541_v1, %v215_v7  ;;  %v219_v19 = vmul.f32 %v531_v0, %v180_v14  ;;  %v183_v32 = vld [vmem:[%s536_s20 + $0x48] sm:$0xff]  ;;  %v184_v33 = vld [vmem:[%s536_s20 + $0x50] sm:$0xff]  ;;  %v185_v34 = vld [vmem:[%s536_s20 + $0x58] sm:$0xff] }
  0x12   : > { %v255_v20 = vadd.f32 %v541_v1, %v216_v11  ;;  %v256_v21 = vadd.f32 %v541_v1, %v217_v12  ;;  %v257_v22 = vadd.f32 %v541_v1, %v218_v13  ;;  %v220_v23 = vmul.f32 %v531_v0, %v181_v15  ;;  %v186_v46 = vld [vmem:[%s536_s20 + $0x60] sm:$0xff]  ;;  %v187_v47 = vld [vmem:[%s536_s20 + $0x68] sm:$0xff]  ;;  %v188_v58 = vld [vmem:[%s536_s20 + $0x70] sm:$0xff] }
  0x13   : > { %vm284_vm0 = vcmp.ge.f32.partialorder %v252_v16, 0.0  ;;  %v316_v25 = vmul.f32 0.01, %v252_v16  ;;  %vm285_vm1 = vcmp.ge.f32.partialorder %v253_v17, 0.0  ;;  %v317_v26 = vmul.f32 0.01, %v253_v17 }
  0x14   : > { %vm286_vm2 = vcmp.ge.f32.partialorder %v254_v18, 0.0  ;;  %v318_v27 = vmul.f32 0.01, %v254_v18  ;;  %vm287_vm3 = vcmp.ge.f32.partialorder %v255_v20, 0.0  ;;  %v319_v28 = vmul.f32 0.01, %v255_v20 }
  0x15   : > { %v348_v29 = vsel %vm284_vm0, %v252_v16, %v316_v25  ;;  %v349_v30 = vsel %vm285_vm1, %v253_v17, %v317_v26  ;;  %vm288_vm4 = vcmp.ge.f32.partialorder %v256_v21, 0.0  ;;  %v320_v31 = vmul.f32 0.01, %v256_v21  ;;  %v189_v59 = vld [vmem:[%s536_s20 + $0x78] sm:$0xff]  ;;  %v190_v6 = vld [vmem:[%s536_s20 + $0x80] sm:$0xff]  ;;  %v191_v7 = vld [vmem:[%s536_s20 + $0x88] sm:$0xff] }
  0x16   : > { %380 = vst [vmem:[%s569_s25] sm:$0xff] %v348_v29  ;;  %381 = vst [vmem:[%s569_s25 + $0x8] sm:$0xff] %v349_v30  ;;  %v350_v35 = vsel %vm286_vm2, %v254_v18, %v318_v27  ;;  %v351_v36 = vsel %vm287_vm3, %v255_v20, %v319_v28  ;;  %vm289_vm5 = vcmp.ge.f32.partialorder %v257_v22, 0.0  ;;  %v321_v37 = vmul.f32 0.01, %v257_v22  ;;  %v192_v12 = vld [vmem:[%s536_s20 + $0x90] sm:$0xff]  ;;  %v193_v13 = vld [vmem:[%s536_s20 + $0x98] sm:$0xff] }
  0x17   : > { %382 = vst [vmem:[%s569_s25 + $0x10] sm:$0xff] %v350_v35  ;;  %383 = vst [vmem:[%s569_s25 + $0x18] sm:$0xff] %v351_v36  ;;  %v352_v38 = vsel %vm288_vm4, %v256_v21, %v320_v31  ;;  %v258_v39 = vadd.f32 %v541_v1, %v219_v19  ;;  %v259_v40 = vadd.f32 %v541_v1, %v220_v23  ;;  %v195_v25 = vld [vmem:[%s536_s20 + $0xa8] sm:$0xff]  ;;  %v196_v36 = vld [vmem:[%s536_s20 + $0xb0] sm:$0xff] }
  0x18   : > { %v221_v41 = vmul.f32 %v531_v0, %v182_v24  ;;  %384 = vst [vmem:[%s569_s25 + $0x20] sm:$0xff] %v352_v38  ;;  %v353_v42 = vsel %vm289_vm5, %v257_v22, %v321_v37  ;;  %v222_v43 = vmul.f32 %v531_v0, %v183_v32  ;;  %v223_v44 = vmul.f32 %v531_v0, %v184_v33  ;;  %v194_v24 = vld [vmem:[%s536_s20 + $0xa0] sm:$0xff]  ;;  %v197_v37 = vld [vmem:[%s536_s20 + $0xb8] sm:$0xff] }
  0x19   : > { %v224_v45 = vmul.f32 %v531_v0, %v185_v34  ;;  %385 = vst [vmem:[%s569_s25 + $0x28] sm:$0xff] %v353_v42  ;;  %vm290_vm6 = vcmp.ge.f32.partialorder %v258_v39, 0.0  ;;  %v322_v48 = vmul.f32 0.01, %v258_v39  ;;  %vm291_vm7 = vcmp.ge.f32.partialorder %v259_v40, 0.0 }
  0x1a   : > { %v323_v49 = vmul.f32 0.01, %v259_v40  ;;  %v260_v50 = vadd.f32 %v541_v1, %v221_v41  ;;  %v261_v51 = vadd.f32 %v541_v1, %v222_v43  ;;  %v262_v52 = vadd.f32 %v541_v1, %v223_v44 }
  0x1b   : > { %v263_v53 = vadd.f32 %v541_v1, %v224_v45  ;;  %v354_v54 = vsel %vm290_vm6, %v258_v39, %v322_v48  ;;  %v225_v56 = vmul.f32 %v531_v0, %v186_v46  ;;  %v226_v57 = vmul.f32 %v531_v0, %v187_v47  ;;  %v198_v46 = vld [vmem:[%s536_s20 + $0xc0] sm:$0xff]  ;;  %v199_v47 = vld [vmem:[%s536_s20 + $0xc8] sm:$0xff] }
  0x1c   : > { %v355_v55 = vsel %vm291_vm7, %v259_v40, %v323_v49  ;;  %386 = vst [vmem:[%s569_s25 + $0x30] sm:$0xff] %v354_v54  ;;  %vm292_vm8 = vcmp.ge.f32.partialorder %v260_v50, 0.0  ;;  %v324_v60 = vmul.f32 0.01, %v260_v50  ;;  %vm293_vm9 = vcmp.ge.f32.partialorder %v261_v51, 0.0 }
  0x1d   : > { %387 = vst [vmem:[%s569_s25 + $0x38] sm:$0xff] %v355_v55  ;;  %v325_v61 = vmul.f32 0.01, %v261_v51  ;;  %vm294_vm10 = vcmp.ge.f32.partialorder %v262_v52, 0.0  ;;  %v326_v62 = vmul.f32 0.01, %v262_v52  ;;  %v264_v4 = vadd.f32 %v541_v1, %v225_v56 }
  0x1e   : > { %vm295_vm11 = vcmp.ge.f32.partialorder %v263_v53, 0.0  ;;  %v327_v63 = vmul.f32 0.01, %v263_v53  ;;  %v356_v2 = vsel %vm292_vm8, %v260_v50, %v324_v60  ;;  %v265_v5 = vadd.f32 %v541_v1, %v226_v57 }
  0x1f   : > { %v357_v3 = vsel %vm293_vm9, %v261_v51, %v325_v61  ;;  %388 = vst [vmem:[%s569_s25 + $0x40] sm:$0xff] %v356_v2  ;;  %v358_v8 = vsel %vm294_vm10, %v262_v52, %v326_v62  ;;  %v227_v10 = vmul.f32 %v531_v0, %v188_v58  ;;  %v228_v11 = vmul.f32 %v531_v0, %v189_v59  ;;  %v200_v52 = vld [vmem:[%s536_s20 + $0xd0] sm:$0xff]  ;;  %v202_v2 = vld [vmem:[%s536_s20 + $0xe0] sm:$0xff] }
  0x20   : > { %389 = vst [vmem:[%s569_s25 + $0x48] sm:$0xff] %v357_v3  ;;  %v359_v9 = vsel %vm295_vm11, %v263_v53, %v327_v63  ;;  %390 = vst [vmem:[%s569_s25 + $0x50] sm:$0xff] %v358_v8  ;;  %vm296_vm12 = vcmp.ge.f32.partialorder %v264_v4, 0.0  ;;  %v328_v14 = vmul.f32 0.01, %v264_v4  ;;  %vm297_vm13 = vcmp.ge.f32.partialorder %v265_v5, 0.0 }
  0x21   : > { %391 = vst [vmem:[%s569_s25 + $0x58] sm:$0xff] %v359_v9  ;;  %v329_v15 = vmul.f32 0.01, %v265_v5  ;;  %v266_v16 = vadd.f32 %v541_v1, %v227_v10  ;;  %v267_v17 = vadd.f32 %v541_v1, %v228_v11  ;;  %v229_v18 = vmul.f32 %v531_v0, %v190_v6  ;;  %v201_v53 = vld [vmem:[%s536_s20 + $0xd8] sm:$0xff]  ;;  %v203_v3 = vld [vmem:[%s536_s20 + $0xe8] sm:$0xff] }
  0x22   : > { %v230_v19 = vmul.f32 %v531_v0, %v191_v7  ;;  %v360_v20 = vsel %vm296_vm12, %v264_v4, %v328_v14  ;;  %v231_v22 = vmul.f32 %v531_v0, %v192_v12  ;;  %v232_v23 = vmul.f32 %v531_v0, %v193_v13  ;;  %v204_v14 = vld [vmem:[%s536_s20 + $0xf0] sm:$0xff] }
  0x23   : > { %v361_v21 = vsel %vm297_vm13, %v265_v5, %v329_v15  ;;  %392 = vst [vmem:[%s569_s25 + $0x60] sm:$0xff] %v360_v20  ;;  %vm298_vm14 = vcmp.ge.f32.partialorder %v266_v16, 0.0  ;;  %v330_v26 = vmul.f32 0.01, %v266_v16  ;;  %vm299_vm15 = vcmp.ge.f32.partialorder %v267_v17, 0.0  ;;  %v205_v15 = vld [vmem:[%s536_s20 + $0xf8] sm:$0xff] }
  0x24   : > { %393 = vst [vmem:[%s569_s25 + $0x68] sm:$0xff] %v361_v21  ;;  %v331_v27 = vmul.f32 0.01, %v267_v17  ;;  %v268_v28 = vadd.f32 %v541_v1, %v229_v18  ;;  %v269_v29 = vadd.f32 %v541_v1, %v230_v19  ;;  %v270_v30 = vadd.f32 %v541_v1, %v231_v22 }
  0x25   : > { %v271_v31 = vadd.f32 %v541_v1, %v232_v23  ;;  %v362_v32 = vsel %vm298_vm14, %v266_v16, %v330_v26  ;;  %v233_v34 = vmul.f32 %v531_v0, %v194_v24  ;;  %v234_v35 = vmul.f32 %v531_v0, %v195_v25 }
  0x26   : > { %v363_v33 = vsel %vm299_vm15, %v267_v17, %v331_v27  ;;  %394 = vst [vmem:[%s569_s25 + $0x70] sm:$0xff] %v362_v32  ;;  %vm300_vm0 = vcmp.ge.f32.partialorder %v268_v28, 0.0  ;;  %v332_v38 = vmul.f32 0.01, %v268_v28  ;;  %vm301_vm1 = vcmp.ge.f32.partialorder %v269_v29, 0.0 }
  0x27   : > { %395 = vst [vmem:[%s569_s25 + $0x78] sm:$0xff] %v363_v33  ;;  %v333_v39 = vmul.f32 0.01, %v269_v29  ;;  %vm302_vm2 = vcmp.ge.f32.partialorder %v270_v30, 0.0  ;;  %v334_v40 = vmul.f32 0.01, %v270_v30  ;;  %v272_v44 = vadd.f32 %v541_v1, %v233_v34 }
  0x28   : > { %vm303_vm3 = vcmp.ge.f32.partialorder %v271_v31, 0.0  ;;  %v335_v41 = vmul.f32 0.01, %v271_v31  ;;  %v364_v42 = vsel %vm300_vm0, %v268_v28, %v332_v38  ;;  %v273_v45 = vadd.f32 %v541_v1, %v234_v35 }
  0x29   : > { %v365_v43 = vsel %vm301_vm1, %v269_v29, %v333_v39  ;;  %396 = vst [vmem:[%s569_s25 + $0x80] sm:$0xff] %v364_v42  ;;  %v366_v48 = vsel %vm302_vm2, %v270_v30, %v334_v40  ;;  %v235_v50 = vmul.f32 %v531_v0, %v196_v36  ;;  %v236_v51 = vmul.f32 %v531_v0, %v197_v37 }
  0x2a   : > { %397 = vst [vmem:[%s569_s25 + $0x88] sm:$0xff] %v365_v43  ;;  %v367_v49 = vsel %vm303_vm3, %v271_v31, %v335_v41  ;;  %398 = vst [vmem:[%s569_s25 + $0x90] sm:$0xff] %v366_v48  ;;  %vm304_vm4 = vcmp.ge.f32.partialorder %v272_v44, 0.0  ;;  %v336_v54 = vmul.f32 0.01, %v272_v44  ;;  %vm305_vm5 = vcmp.ge.f32.partialorder %v273_v45, 0.0 }
  0x2b   : > { %399 = vst [vmem:[%s569_s25 + $0x98] sm:$0xff] %v367_v49  ;;  %v337_v55 = vmul.f32 0.01, %v273_v45  ;;  %v274_v56 = vadd.f32 %v541_v1, %v235_v50  ;;  %v275_v57 = vadd.f32 %v541_v1, %v236_v51  ;;  %v237_v58 = vmul.f32 %v531_v0, %v198_v46 }
  0x2c   : > { %v238_v59 = vmul.f32 %v531_v0, %v199_v47  ;;  %v368_v60 = vsel %vm304_vm4, %v272_v44, %v336_v54  ;;  %v239_v62 = vmul.f32 %v531_v0, %v200_v52  ;;  %v240_v63 = vmul.f32 %v531_v0, %v201_v53 }
  0x2d   : > { %v369_v61 = vsel %vm305_vm5, %v273_v45, %v337_v55  ;;  %400 = vst [vmem:[%s569_s25 + $0xa0] sm:$0xff] %v368_v60  ;;  %vm306_vm6 = vcmp.ge.f32.partialorder %v274_v56, 0.0  ;;  %v338_v4 = vmul.f32 0.01, %v274_v56  ;;  %vm307_vm7 = vcmp.ge.f32.partialorder %v275_v57, 0.0 }
  0x2e   : > { %401 = vst [vmem:[%s569_s25 + $0xa8] sm:$0xff] %v369_v61  ;;  %v339_v5 = vmul.f32 0.01, %v275_v57  ;;  %v276_v6 = vadd.f32 %v541_v1, %v237_v58  ;;  %v277_v7 = vadd.f32 %v541_v1, %v238_v59  ;;  %v278_v8 = vadd.f32 %v541_v1, %v239_v62 }
  0x2f   : > { %v279_v9 = vadd.f32 %v541_v1, %v240_v63  ;;  %v370_v10 = vsel %vm306_vm6, %v274_v56, %v338_v4  ;;  %v241_v12 = vmul.f32 %v531_v0, %v202_v2  ;;  %v242_v13 = vmul.f32 %v531_v0, %v203_v3 }
  0x30   : > { %v371_v11 = vsel %vm307_vm7, %v275_v57, %v339_v5  ;;  %402 = vst [vmem:[%s569_s25 + $0xb0] sm:$0xff] %v370_v10  ;;  %vm308_vm8 = vcmp.ge.f32.partialorder %v276_v6, 0.0  ;;  %v340_v16 = vmul.f32 0.01, %v276_v6  ;;  %vm309_vm9 = vcmp.ge.f32.partialorder %v277_v7, 0.0 }
  0x31   : > { %403 = vst [vmem:[%s569_s25 + $0xb8] sm:$0xff] %v371_v11  ;;  %v341_v17 = vmul.f32 0.01, %v277_v7  ;;  %vm310_vm10 = vcmp.ge.f32.partialorder %v278_v8, 0.0  ;;  %v342_v18 = vmul.f32 0.01, %v278_v8  ;;  %v280_v22 = vadd.f32 %v541_v1, %v241_v12 }
  0x32   : > { %vm311_vm11 = vcmp.ge.f32.partialorder %v279_v9, 0.0  ;;  %v343_v19 = vmul.f32 0.01, %v279_v9  ;;  %v372_v20 = vsel %vm308_vm8, %v276_v6, %v340_v16  ;;  %v281_v23 = vadd.f32 %v541_v1, %v242_v13 }
  0x33   : > { %v373_v21 = vsel %vm309_vm9, %v277_v7, %v341_v17  ;;  %404 = vst [vmem:[%s569_s25 + $0xc0] sm:$0xff] %v372_v20  ;;  %v374_v24 = vsel %vm310_vm10, %v278_v8, %v342_v18  ;;  %v243_v26 = vmul.f32 %v531_v0, %v204_v14  ;;  %v244_v27 = vmul.f32 %v531_v0, %v205_v15 }
  0x34   : > { %405 = vst [vmem:[%s569_s25 + $0xc8] sm:$0xff] %v373_v21  ;;  %v375_v25 = vsel %vm311_vm11, %v279_v9, %v343_v19  ;;  %406 = vst [vmem:[%s569_s25 + $0xd0] sm:$0xff] %v374_v24  ;;  %vm312_vm12 = vcmp.ge.f32.partialorder %v280_v22, 0.0  ;;  %v344_v28 = vmul.f32 0.01, %v280_v22  ;;  %vm313_vm13 = vcmp.ge.f32.partialorder %v281_v23, 0.0 }
  0x35   : > { %407 = vst [vmem:[%s569_s25 + $0xd8] sm:$0xff] %v375_v25  ;;  %v345_v29 = vmul.f32 0.01, %v281_v23  ;;  %v282_v30 = vadd.f32 %v541_v1, %v243_v26  ;;  %v283_v31 = vadd.f32 %v541_v1, %v244_v27 }
  0x36   : > { %v376_v32 = vsel %vm312_vm12, %v280_v22, %v344_v28 }
  0x37   : > { %v377_v33 = vsel %vm313_vm13, %v281_v23, %v345_v29  ;;  %408 = vst [vmem:[%s569_s25 + $0xe0] sm:$0xff] %v376_v32  ;;  %vm314_vm14 = vcmp.ge.f32.partialorder %v282_v30, 0.0  ;;  %v346_v34 = vmul.f32 0.01, %v282_v30  ;;  %vm315_vm15 = vcmp.ge.f32.partialorder %v283_v31, 0.0 }
  0x38   : > { %409 = vst [vmem:[%s569_s25 + $0xe8] sm:$0xff] %v377_v33  ;;  %v347_v0 = vmul.f32 0.01, %v283_v31 }
  0x39   : > { %v378_v35 = vsel %vm314_vm14, %v282_v30, %v346_v34 }
  0x3a   : > { %v379_v36 = vsel %vm315_vm15, %v283_v31, %v347_v0  ;;  %410 = vst [vmem:[%s569_s25 + $0xf0] sm:$0xff] %v378_v35 }
  0x3b   : > { %411 = vst [vmem:[%s569_s25 + $0xf8] sm:$0xff] %v379_v36 }
  0x3c PF: > { %s13_s12 = sadd.s32 1, %s495_s12  }
  0x3d   : > { %p10_p4 = scmp.ge.s32.totalorder %s13_s12, 4  }
  0x3f   :  { %12 = sbr.rel (!%p10_p4) target bundleno = 1 (0x1), region = 62 }

// kernel: rebuild_encoder_forward.23
= control target key start
LH: loop header
LB: loop body
LE: loop exit
PB: predicated region body
PF: predicated region fallthrough
CT: control target
= control target key end

     0   :  { %s305_s0 = inlined_call_operand.vmem [shape: f32[128,128], index: 0, kind: input, shape index: {}]   ;;  %s306_s1 = inlined_call_operand.vmem [shape: f32[1,128], index: 1, kind: input, shape index: {}]   ;;  %s307_s2 = inlined_call_operand.vmem [shape: f32[1,128], index: 2, kind: input, shape index: {}]   ;;  %s308_s3 = inlined_call_operand.vmem [shape: f32[128,128], index: 3, kind: output, shape index: {}]  }
   0x1   :  { %v14_v0 = vld [vmem:[%s305_s0] sm:$0xff]  ;;  %v15_v4 = vld [vmem:[%s305_s0 + $0x8] sm:$0xff]  ;;  %v16_v5 = vld [vmem:[%s305_s0 + $0x10] sm:$0xff] }
   0x2   :  { %v172_v1 = vld [vmem:[%s306_s1] ss:$0 sm:$0xff]  ;;  %v17_v6 = vld [vmem:[%s305_s0 + $0x18] sm:$0xff]  ;;  %v19_v11 = vld [vmem:[%s305_s0 + $0x28] sm:$0xff] }
   0x3   :  { %v177_v2 = vld [vmem:[%s307_s2] ss:$0 sm:$0xff]  ;;  %v37_v3 = vmul.f32 %v172_v1, %v14_v0  ;;  %v38_v7 = vmul.f32 %v172_v1, %v15_v4  ;;  %v39_v8 = vmul.f32 %v172_v1, %v16_v5  ;;  %v40_v9 = vmul.f32 %v172_v1, %v17_v6  ;;  %v20_v12 = vld [vmem:[%s305_s0 + $0x30] sm:$0xff]  ;;  %v21_v17 = vld [vmem:[%s305_s0 + $0x38] sm:$0xff] }
   0x4   :  { %v18_v10 = vld [vmem:[%s305_s0 + $0x20] sm:$0xff]  ;;  %v42_v15 = vmul.f32 %v172_v1, %v19_v11  ;;  %v43_v16 = vmul.f32 %v172_v1, %v20_v12  ;;  %v44_v21 = vmul.f32 %v172_v1, %v21_v17  ;;  %v23_v30 = vld [vmem:[%s305_s0 + $0x48] sm:$0xff]  ;;  %v24_v31 = vld [vmem:[%s305_s0 + $0x50] sm:$0xff] }
   0x5   :  { %v60_v13 = vadd.f32 %v177_v2, %v37_v3  ;;  %v41_v14 = vmul.f32 %v172_v1, %v18_v10  ;;  %v61_v18 = vadd.f32 %v177_v2, %v38_v7  ;;  %v62_v19 = vadd.f32 %v177_v2, %v39_v8  ;;  %v22_v25 = vld [vmem:[%s305_s0 + $0x40] sm:$0xff]  ;;  %v25_v43 = vld [vmem:[%s305_s0 + $0x58] sm:$0xff]  ;;  %v27_v45 = vld [vmem:[%s305_s0 + $0x68] sm:$0xff] }
   0x6   :  { %v63_v20 = vadd.f32 %v177_v2, %v40_v9  ;;  %v65_v24 = vadd.f32 %v177_v2, %v42_v15  ;;  %v66_v37 = vadd.f32 %v177_v2, %v43_v16  ;;  %v67_v38 = vadd.f32 %v177_v2, %v44_v21  ;;  %v26_v44 = vld [vmem:[%s305_s0 + $0x60] sm:$0xff]  ;;  %v28_v56 = vld [vmem:[%s305_s0 + $0x70] sm:$0xff]  ;;  %v29_v4 = vld [vmem:[%s305_s0 + $0x78] sm:$0xff] }
   0x7   :  { %vm76_vm0 = vcmp.ge.f32.partialorder %v60_v13, 0.0  ;;  %v92_v22 = vmul.f32 0.01, %v60_v13  ;;  %v64_v23 = vadd.f32 %v177_v2, %v41_v14  ;;  %vm77_vm1 = vcmp.ge.f32.partialorder %v61_v18, 0.0 }
   0x8   :  { %v93_v26 = vmul.f32 0.01, %v61_v18  ;;  %vm78_vm2 = vcmp.ge.f32.partialorder %v62_v19, 0.0  ;;  %v94_v27 = vmul.f32 0.01, %v62_v19  ;;  %vm79_vm3 = vcmp.ge.f32.partialorder %v63_v20, 0.0 }
   0x9   :  { %v108_v28 = vsel %vm76_vm0, %v60_v13, %v92_v22  ;;  %v95_v29 = vmul.f32 0.01, %v63_v20  ;;  %vm80_vm4 = vcmp.ge.f32.partialorder %v64_v23, 0.0  ;;  %v96_v34 = vmul.f32 0.01, %v64_v23 }
   0xa   :  { %124 = vst [vmem:[%s308_s3] sm:$0xff] %v108_v28  ;;  %v109_v32 = vsel %vm77_vm1, %v61_v18, %v93_v26  ;;  %v110_v33 = vsel %vm78_vm2, %v62_v19, %v94_v27  ;;  %vm81_vm5 = vcmp.ge.f32.partialorder %v65_v24, 0.0  ;;  %v97_v36 = vmul.f32 0.01, %v65_v24 }
   0xb   :  { %125 = vst [vmem:[%s308_s3 + $0x8] sm:$0xff] %v109_v32  ;;  %126 = vst [vmem:[%s308_s3 + $0x10] sm:$0xff] %v110_v33  ;;  %v111_v35 = vsel %vm79_vm3, %v63_v20, %v95_v29  ;;  %v112_v39 = vsel %vm80_vm4, %v64_v23, %v96_v34  ;;  %v45_v40 = vmul.f32 %v172_v1, %v22_v25  ;;  %vm82_vm6 = vcmp.ge.f32.partialorder %v66_v37, 0.0 }
   0xc   :  { %127 = vst [vmem:[%s308_s3 + $0x18] sm:$0xff] %v111_v35  ;;  %v46_v41 = vmul.f32 %v172_v1, %v23_v30  ;;  %v47_v42 = vmul.f32 %v172_v1, %v24_v31  ;;  %128 = vst [vmem:[%s308_s3 + $0x20] sm:$0xff] %v112_v39  ;;  %v113_v46 = vsel %vm81_vm5, %v65_v24, %v97_v36  ;;  %v98_v47 = vmul.f32 0.01, %v66_v37 }
   0xd   :  { %vm83_vm7 = vcmp.ge.f32.partialorder %v67_v38, 0.0  ;;  %129 = vst [vmem:[%s308_s3 + $0x28] sm:$0xff] %v113_v46  ;;  %v99_v48 = vmul.f32 0.01, %v67_v38  ;;  %v68_v49 = vadd.f32 %v177_v2, %v45_v40  ;;  %v48_v53 = vmul.f32 %v172_v1, %v25_v43 }
   0xe   :  { %v69_v50 = vadd.f32 %v177_v2, %v46_v41  ;;  %v70_v51 = vadd.f32 %v177_v2, %v47_v42  ;;  %v114_v52 = vsel %vm82_vm6, %v66_v37, %v98_v47  ;;  %v49_v54 = vmul.f32 %v172_v1, %v26_v44 }
   0xf   :  { %v50_v55 = vmul.f32 %v172_v1, %v27_v45  ;;  %130 = vst [vmem:[%s308_s3 + $0x30] sm:$0xff] %v114_v52  ;;  %v115_v57 = vsel %vm83_vm7, %v67_v38, %v99_v48  ;;  %vm84_vm8 = vcmp.ge.f32.partialorder %v68_v49, 0.0  ;;  %v100_v58 = vmul.f32 0.01, %v68_v49 }
  0x10   :  { %vm85_vm9 = vcmp.ge.f32.partialorder %v69_v50, 0.0  ;;  %131 = vst [vmem:[%s308_s3 + $0x38] sm:$0xff] %v115_v57  ;;  %v101_v59 = vmul.f32 0.01, %v69_v50  ;;  %vm86_vm10 = vcmp.ge.f32.partialorder %v70_v51, 0.0  ;;  %v71_v61 = vadd.f32 %v177_v2, %v48_v53 }
  0x11   :  { %v102_v60 = vmul.f32 0.01, %v70_v51  ;;  %v116_v62 = vsel %vm84_vm8, %v68_v49, %v100_v58  ;;  %v72_v63 = vadd.f32 %v177_v2, %v49_v54  ;;  %v73_v0 = vadd.f32 %v177_v2, %v50_v55 }
  0x12   :  { %v51_v3 = vmul.f32 %v172_v1, %v28_v56  ;;  %132 = vst [vmem:[%s308_s3 + $0x40] sm:$0xff] %v116_v62  ;;  %v117_v5 = vsel %vm85_vm9, %v69_v50, %v101_v59  ;;  %vm87_vm11 = vcmp.ge.f32.partialorder %v71_v61, 0.0  ;;  %v103_v7 = vmul.f32 0.01, %v71_v61 }
  0x13   :  { %v118_v6 = vsel %vm86_vm10, %v70_v51, %v102_v60  ;;  %133 = vst [vmem:[%s308_s3 + $0x48] sm:$0xff] %v117_v5  ;;  %vm88_vm12 = vcmp.ge.f32.partialorder %v72_v63, 0.0  ;;  %v104_v8 = vmul.f32 0.01, %v72_v63  ;;  %vm89_vm13 = vcmp.ge.f32.partialorder %v73_v0, 0.0 }
  0x14   :  { %134 = vst [vmem:[%s308_s3 + $0x50] sm:$0xff] %v118_v6  ;;  %v105_v9 = vmul.f32 0.01, %v73_v0  ;;  %v119_v10 = vsel %vm87_vm11, %v71_v61, %v103_v7  ;;  %v74_v11 = vadd.f32 %v177_v2, %v51_v3  ;;  %v52_v12 = vmul.f32 %v172_v1, %v29_v4 }
  0x15   :  { %135 = vst [vmem:[%s308_s3 + $0x58] sm:$0xff] %v119_v10  ;;  %v120_v13 = vsel %vm88_vm12, %v72_v63, %v104_v8 }
  0x16   :  { %v121_v14 = vsel %vm89_vm13, %v73_v0, %v105_v9  ;;  %136 = vst [vmem:[%s308_s3 + $0x60] sm:$0xff] %v120_v13  ;;  %vm90_vm14 = vcmp.ge.f32.partialorder %v74_v11, 0.0  ;;  %v106_v15 = vmul.f32 0.01, %v74_v11  ;;  %v75_v16 = vadd.f32 %v177_v2, %v52_v12 }
  0x17   :  { %137 = vst [vmem:[%s308_s3 + $0x68] sm:$0xff] %v121_v14 }
  0x18   :  { %v122_v17 = vsel %vm90_vm14, %v74_v11, %v106_v15  ;;  %vm91_vm15 = vcmp.ge.f32.partialorder %v75_v16, 0.0  ;;  %v107_v1 = vmul.f32 0.01, %v75_v16 }
  0x19   :  { %138 = vst [vmem:[%s308_s3 + $0x70] sm:$0xff] %v122_v17 }
  0x1a   :  { %v123_v18 = vsel %vm91_vm15, %v75_v16, %v107_v1 }
  0x1b   :  { %139 = vst [vmem:[%s308_s3 + $0x78] sm:$0xff] %v123_v18 }

// kernel: rebuild_encoder_forward.22
= control target key start
LH: loop header
LB: loop body
LE: loop exit
PB: predicated region body
PF: predicated region fallthrough
CT: control target
= control target key end

     0   :  { %s1834_s1 = inlined_call_operand.vmem [shape: bf16[640,128], index: 1, kind: input, shape index: {}]   ;;  %s1835_s0 = inlined_call_operand.vmem [shape: bf16[128,640], index: 0, kind: input, shape index: {}]   ;;  %s1836_s2 = inlined_call_operand.vmem [shape: f32[128,128], index: 2, kind: output, shape index: {0}]   ;;  %s1837_s3 = inlined_call_operand.vmem [shape: f32[1,1,128], index: 3, kind: output, shape index: {1}]   ;;  %s1838_s4 = inlined_call_operand.vmem [shape: f32[1,1,128], index: 4, kind: output, shape index: {2}]  }
   0x1   :  { %v1329_v0 = vld [vmem:[%s1834_s1 + $0x78] sm:$0xff]   ;;  %v1333_v4 = vld [vmem:[%s1834_s1 + $0x70] sm:$0xff]   ;;  %v1337_v8 = vld [vmem:[%s1834_s1 + $0x68] sm:$0xff]  }
   0x2   :  { %v1330_v1 = vld [vmem:[%s1834_s1 + $0xf8] sm:$0xff]   ;;  %1137 = vmatprep.subr.bf16.mxu0 %v1329_v0  ;;  %v1334_v5 = vld [vmem:[%s1834_s1 + $0xf0] sm:$0xff]   ;;  %v1338_v9 = vld [vmem:[%s1834_s1 + $0xe8] sm:$0xff]  }
   0x3   :  { %v1331_v2 = vld [vmem:[%s1834_s1 + $0x38] sm:$0xff]   ;;  %1201 = vmatprep.subr.bf16.mxu1 %v1330_v1  ;;  %v1335_v6 = vld [vmem:[%s1834_s1 + $0x30] sm:$0xff]   ;;  %v1339_v10 = vld [vmem:[%s1834_s1 + $0x28] sm:$0xff]  }
   0x4   :  { %v1332_v3 = vld [vmem:[%s1834_s1 + $0xb8] sm:$0xff]   ;;  %1138 = vmatpush3.bf16.msra.mxu0 %v1331_v2  ;;  %v1336_v7 = vld [vmem:[%s1834_s1 + $0xb0] sm:$0xff]   ;;  %v1340_v11 = vld [vmem:[%s1834_s1 + $0xa8] sm:$0xff]  }
   0x5   :  { %1202 = vmatpush3.bf16.msra.mxu1 %v1332_v3  ;;  %1139 = vmatprep.subr.bf16.mxu0 %v1333_v4  ;;  %v1341_v12 = vld [vmem:[%s1834_s1 + $0x60] sm:$0xff]   ;;  %v1345_v16 = vld [vmem:[%s1834_s1 + $0x58] sm:$0xff]   ;;  %v1349_v20 = vld [vmem:[%s1834_s1 + $0x50] sm:$0xff]  }
   0x6   :  { %1203 = vmatprep.subr.bf16.mxu1 %v1334_v5  ;;  %v1342_v13 = vld [vmem:[%s1834_s1 + $0xe0] sm:$0xff]   ;;  %v1346_v17 = vld [vmem:[%s1834_s1 + $0xd8] sm:$0xff]   ;;  %v1350_v21 = vld [vmem:[%s1834_s1 + $0xd0] sm:$0xff]  }
   0x7   :  { %v1343_v14 = vld [vmem:[%s1834_s1 + $0x20] sm:$0xff]   ;;  %v1347_v18 = vld [vmem:[%s1834_s1 + $0x18] sm:$0xff]   ;;  %v1351_v22 = vld [vmem:[%s1834_s1 + $0x10] sm:$0xff]  }
   0x8   :  { %1140 = vmatpush3.bf16.msra.mxu0 %v1335_v6  ;;  %v1344_v15 = vld [vmem:[%s1834_s1 + $0xa0] sm:$0xff]   ;;  %v1348_v19 = vld [vmem:[%s1834_s1 + $0x98] sm:$0xff]   ;;  %v1352_v23 = vld [vmem:[%s1834_s1 + $0x90] sm:$0xff]  }
   0x9   :  { %1204 = vmatpush3.bf16.msra.mxu1 %v1336_v7  ;;  %1141 = vmatprep.subr.bf16.mxu0 %v1337_v8  ;;  %v1353_v24 = vld [vmem:[%s1834_s1 + $0x48] sm:$0xff]   ;;  %v1357_v28 = vld [vmem:[%s1834_s1 + $0x40] sm:$0xff]   ;;  %v1367_v36 = vld [vmem:[%s1834_s1 + $0x138] sm:$0xff]  }
   0xa   :  { %1205 = vmatprep.subr.bf16.mxu1 %v1338_v9  ;;  %v1354_v25 = vld [vmem:[%s1834_s1 + $0xc8] sm:$0xff]   ;;  %v1358_v29 = vld [vmem:[%s1834_s1 + $0xc0] sm:$0xff]   ;;  %v1374_v39 = vld [vmem:[%s1834_s1 + $0x130] sm:$0xff]  }
   0xb   :  { %v1355_v26 = vld [vmem:[%s1834_s1 + $0x8] sm:$0xff]   ;;  %v1359_v30 = vld [vmem:[%s1834_s1] sm:$0xff]   ;;  %v1377_v43 = vld [vmem:[%s1835_s0 + $0x5c] ss:$20 sps:$4 sm:$0xff]  }
   0xc   :  { %1142 = vmatpush3.bf16.msra.mxu0 %v1339_v10  ;;  %v1356_v27 = vld [vmem:[%s1834_s1 + $0x88] sm:$0xff]   ;;  %v1360_v31 = vld [vmem:[%s1834_s1 + $0x80] sm:$0xff]   ;;  %v1382_v48 = vld [vmem:[%s1835_s0 + $0x7c] ss:$20 sps:$4 sm:$0xff]  }
   0xd   :  { %1206 = vmatpush3.bf16.msra.mxu1 %v1340_v11  ;;  %1143 = vmatprep.subr.bf16.mxu0 %v1341_v12  ;;  %v1361_v32 = vld [vmem:[%s1835_s0] ss:$20 sps:$4 sm:$0xff]   ;;  %v1363_v33 = vld [vmem:[%s1835_s0 + $0x4] ss:$20 sps:$4 sm:$0xff]   ;;  %v1364_v34 = vld [vmem:[%s1835_s0 + $0x8] ss:$20 sps:$4 sm:$0xff]  }
   0xe   :  { %1207 = vmatprep.subr.bf16.mxu1 %v1342_v13  ;;  %v1366_v35 = vld [vmem:[%s1835_s0 + $0xc] ss:$20 sps:$4 sm:$0xff]   ;;  %659 = vmatprep.mubr.bf16.mxu0 %v1363_v33  ;;  %v1370_v38 = vld [vmem:[%s1835_s0 + $0x34] ss:$20 sps:$4 sm:$0xff]   ;;  %v1373_v41 = vld [vmem:[%s1835_s0 + $0x30] ss:$20 sps:$4 sm:$0xff]  }
   0xf   :  { %756 = vmatprep.mubr.bf16.mxu1 %v1366_v35  ;;  %v1368_v37 = vld [vmem:[%s1835_s0 + $0x2c] ss:$20 sps:$4 sm:$0xff]   ;;  %v1372_v40 = vld [vmem:[%s1835_s0 + $0x28] ss:$20 sps:$4 sm:$0xff]   ;;  %v1379_v46 = vld [vmem:[%s1835_s0 + $0x50] ss:$20 sps:$4 sm:$0xff]  }
  0x10   :  { %1144 = vmatpush3.bf16.msra.mxu0 %v1343_v14  ;;  %v1375_v42 = vld [vmem:[%s1835_s0 + $0x54] ss:$20 sps:$4 sm:$0xff]   ;;  %v1388_v45 = vld [vmem:[%s1834_s1 + $0x120] sm:$0xff]   ;;  %v1380_v47 = vld [vmem:[%s1835_s0 + $0x58] ss:$20 sps:$4 sm:$0xff]  }
  0x11   :  { %1208 = vmatpush3.bf16.msra.mxu1 %v1344_v15  ;;  %1145 = vmatprep.subr.bf16.mxu0 %v1345_v16  ;;  %v1381_v44 = vld [vmem:[%s1834_s1 + $0x128] sm:$0xff]   ;;  %v1384_v49 = vld [vmem:[%s1835_s0 + $0x84] ss:$20 sps:$4 sm:$0xff]   ;;  %v1402_v51 = vld [vmem:[%s1834_s1 + $0x110] sm:$0xff]  }
  0x12   :  { %1209 = vmatprep.subr.bf16.mxu1 %v1346_v17  ;;  %v1395_v50 = vld [vmem:[%s1834_s1 + $0x118] sm:$0xff]   ;;  %v1387_v53 = vld [vmem:[%s1835_s0 + $0x80] ss:$20 sps:$4 sm:$0xff]   ;;  %v1409_v55 = vld [vmem:[%s1834_s1 + $0x108] sm:$0xff]  }
  0x13   :  { %v1386_v52 = vld [vmem:[%s1835_s0 + $0x78] ss:$20 sps:$4 sm:$0xff]   ;;  %v1416_v57 = vld [vmem:[%s1834_s1 + $0x100] sm:$0xff]   ;;  %v1394_v59 = vld [vmem:[%s1835_s0 + $0xa8] ss:$20 sps:$4 sm:$0xff]  }
  0x14   :  { %1146 = vmatpush3.bf16.msra.mxu0 %v1347_v18  ;;  %v1389_v54 = vld [vmem:[%s1835_s0 + $0xa4] ss:$20 sps:$4 sm:$0xff]   ;;  %v1391_v56 = vld [vmem:[%s1835_s0 + $0xac] ss:$20 sps:$4 sm:$0xff]   ;;  %v1398_v61 = vld [vmem:[%s1835_s0 + $0xd4] ss:$20 sps:$4 sm:$0xff]  }
  0x15   :  { %1210 = vmatpush3.bf16.msra.mxu1 %v1348_v19  ;;  %1147 = vmatprep.subr.bf16.mxu0 %v1349_v20  ;;  %v1393_v58 = vld [vmem:[%s1835_s0 + $0xa0] ss:$20 sps:$4 sm:$0xff]   ;;  %v1400_v62 = vld [vmem:[%s1835_s0 + $0xc8] ss:$20 sps:$4 sm:$0xff]   ;;  %v1401_v63 = vld [vmem:[%s1835_s0 + $0xd0] ss:$20 sps:$4 sm:$0xff]  }
  0x16   :  { %1211 = vmatprep.subr.bf16.mxu1 %v1350_v21  ;;  %v1396_v60 = vld [vmem:[%s1835_s0 + $0xcc] ss:$20 sps:$4 sm:$0xff]   ;;  %v1403_v0 = vld [vmem:[%s1835_s0 + $0xf4] ss:$20 sps:$4 sm:$0xff]   ;;  %v1405_v1 = vld [vmem:[%s1835_s0 + $0xfc] ss:$20 sps:$4 sm:$0xff]  }
  0x17   :  { %v1407_v2 = vld [vmem:[%s1835_s0 + $0xf0] ss:$20 sps:$4 sm:$0xff]   ;;  %v1408_v3 = vld [vmem:[%s1835_s0 + $0xf8] ss:$20 sps:$4 sm:$0xff]   ;;  %v1415_v7 = vld [vmem:[%s1835_s0 + $0x120] ss:$20 sps:$4 sm:$0xff]  }
  0x18   :  { %1148 = vmatpush3.bf16.msra.mxu0 %v1351_v22  ;;  %v1410_v4 = vld [vmem:[%s1835_s0 + $0x11c] ss:$20 sps:$4 sm:$0xff]   ;;  %v1412_v5 = vld [vmem:[%s1835_s0 + $0x124] ss:$20 sps:$4 sm:$0xff]   ;;  %v1421_v12 = vld [vmem:[%s1835_s0 + $0x60] ss:$20 sps:$4 sm:$0xff]  }
  0x19   :  { %1212 = vmatpush3.bf16.msra.mxu1 %v1352_v23  ;;  %1149 = vmatprep.subr.bf16.mxu0 %v1353_v24  ;;  %v1414_v6 = vld [vmem:[%s1835_s0 + $0x118] ss:$20 sps:$4 sm:$0xff]   ;;  %v1417_v8 = vld [vmem:[%s1835_s0 + $0x10] ss:$20 sps:$4 sm:$0xff]   ;;  %v1422_v13 = vld [vmem:[%s1835_s0 + $0x100] ss:$20 sps:$4 sm:$0xff]  }
  0x1a   :  { %1213 = vmatprep.subr.bf16.mxu1 %v1354_v25  ;;  %v1418_v9 = vld [vmem:[%s1835_s0 + $0xb0] ss:$20 sps:$4 sm:$0xff]   ;;  %v1419_v10 = vld [vmem:[%s1835_s0 + $0x38] ss:$20 sps:$4 sm:$0xff]   ;;  %v1423_v14 = vld [vmem:[%s1835_s0 + $0x88] ss:$20 sps:$4 sm:$0xff]  }
  0x1b   :  { %v1420_v11 = vld [vmem:[%s1835_s0 + $0xd8] ss:$20 sps:$4 sm:$0xff]   ;;  %v1424_v15 = vld [vmem:[%s1835_s0 + $0x128] ss:$20 sps:$4 sm:$0xff]  }
  0x1c   :  { %1150 = vmatpush3.bf16.msra.mxu0 %v1355_v26 }
  0x1d   :  { %1214 = vmatpush3.bf16.msra.mxu1 %v1356_v27  ;;  %1151 = vmatprep.subr.bf16.mxu0 %v1357_v28 }
  0x1e   :  { %1215 = vmatprep.subr.bf16.mxu1 %v1358_v29 }
  0x20   :  { %1152 = vmatpush3.bf16.msra.mxu0 %v1359_v30 }
  0x21   :  { %1216 = vmatpush3.bf16.msra.mxu1 %v1360_v31  ;;  %1281 = vmatprep.subr.bf16.mxu0 %v1367_v36 }
  0x22   :  { %1313 = vmatprep.subr.bf16.mxu1 %v1367_v36 }
  0x23   :  { %660 = vmatmul.mubr.bf16.vlgmr.msra.gmra.mxu0 %v1361_v32 }
  0x24   :  { %757 = vmatmul.mubr.bf16.vlgmr.msra.gmra.mxu1 %v1364_v34  ;;  %1282 = vmatpush3.bf16.msra.mxu0 %v1367_v36 }
  0x25   :  { %667 = vmatprep.mubr.bf16.mxu0 %v1368_v37  ;;  %764 = vmatprep.mubr.bf16.mxu1 %v1370_v38 }
  0x26   :  { %1321 = vmatpush3.bf16.msra.mxu1 %v1367_v36  ;;  %1283 = vmatprep.subr.bf16.mxu0 %v1374_v39 }
  0x27   :  { %1314 = vmatprep.subr.bf16.mxu1 %v1374_v39 }
  0x28   :  { %1284 = vmatpush3.bf16.msra.mxu0 %v1374_v39 }
  0x29   :  { %1285 = vmatprep.subr.bf16.mxu0 %v1381_v44 }
  0x2a   :  { %1322 = vmatpush3.bf16.msra.mxu1 %v1374_v39 }
  0x2b   :  { %668 = vmatmul.mubr.bf16.gmra.mxu0 %v1372_v40  ;;  %1315 = vmatprep.subr.bf16.mxu1 %v1381_v44 }
  0x2c   :  { %765 = vmatmul.mubr.bf16.gmra.mxu1 %v1373_v41  ;;  %675 = vmatprep.mubr.bf16.mxu0 %v1375_v42 }
  0x2d   :  { %772 = vmatprep.mubr.bf16.mxu1 %v1377_v43  ;;  %1286 = vmatpush3.bf16.msra.mxu0 %v1381_v44 }
  0x2e   :  { %1287 = vmatprep.subr.bf16.mxu0 %v1388_v45  ;;  %1323 = vmatpush3.bf16.msra.mxu1 %v1381_v44 }
  0x2f   :  { %1316 = vmatprep.subr.bf16.mxu1 %v1388_v45 }
  0x31   :  { %1288 = vmatpush3.bf16.msra.mxu0 %v1388_v45 }
  0x32   :  { %1289 = vmatprep.subr.bf16.mxu0 %v1395_v50  ;;  %1324 = vmatpush3.bf16.msra.mxu1 %v1388_v45 }
  0x33   :  { %676 = vmatmul.mubr.bf16.gmra.mxu0 %v1379_v46  ;;  %1317 = vmatprep.subr.bf16.mxu1 %v1395_v50 }
  0x34   :  { %773 = vmatmul.mubr.bf16.gmra.mxu1 %v1380_v47  ;;  %683 = vmatprep.mubr.bf16.mxu0 %v1382_v48 }
  0x35   :  { %780 = vmatprep.mubr.bf16.mxu1 %v1384_v49  ;;  %1290 = vmatpush3.bf16.msra.mxu0 %v1395_v50 }
  0x36   :  { %1291 = vmatprep.subr.bf16.mxu0 %v1402_v51  ;;  %1325 = vmatpush3.bf16.msra.mxu1 %v1395_v50 }
  0x37   :  { %1318 = vmatprep.subr.bf16.mxu1 %v1402_v51 }
  0x39   :  { %1292 = vmatpush3.bf16.msra.mxu0 %v1402_v51 }
  0x3a   :  { %1293 = vmatprep.subr.bf16.mxu0 %v1409_v55  ;;  %1326 = vmatpush3.bf16.msra.mxu1 %v1402_v51 }
  0x3b   :  { %684 = vmatmul.mubr.bf16.gmra.mxu0 %v1386_v52  ;;  %1319 = vmatprep.subr.bf16.mxu1 %v1409_v55 }
  0x3c   :  { %781 = vmatmul.mubr.bf16.gmra.mxu1 %v1387_v53  ;;  %691 = vmatprep.mubr.bf16.mxu0 %v1389_v54 }
  0x3d   :  { %788 = vmatprep.mubr.bf16.mxu1 %v1391_v56  ;;  %1294 = vmatpush3.bf16.msra.mxu0 %v1409_v55 }
  0x3e   :  { %1295 = vmatprep.subr.bf16.mxu0 %v1416_v57  ;;  %1327 = vmatpush3.bf16.msra.mxu1 %v1409_v55 }
  0x3f   :  { %1320 = vmatprep.subr.bf16.mxu1 %v1416_v57 }
  0x41   :  { %1296 = vmatpush3.bf16.msra.mxu0 %v1416_v57 }
  0x42   :  { %1328 = vmatpush3.bf16.msra.mxu1 %v1416_v57 }
  0x43   :  { %692 = vmatmul.mubr.bf16.gmra.mxu0 %v1393_v58 }
  0x44   :  { %789 = vmatmul.mubr.bf16.gmra.mxu1 %v1394_v59  ;;  %699 = vmatprep.mubr.bf16.mxu0 %v1396_v60 }
  0x45   :  { %796 = vmatprep.mubr.bf16.mxu1 %v1398_v61 }
  0x4b   :  { %700 = vmatmul.mubr.bf16.gmra.mxu0 %v1400_v62 }
  0x4c   :  { %797 = vmatmul.mubr.bf16.gmra.mxu1 %v1401_v63  ;;  %707 = vmatprep.mubr.bf16.mxu0 %v1403_v0 }
  0x4d   :  { %804 = vmatprep.mubr.bf16.mxu1 %v1405_v1 }
  0x53   :  { %708 = vmatmul.mubr.bf16.gmra.mxu0 %v1407_v2 }
  0x54   :  { %805 = vmatmul.mubr.bf16.gmra.mxu1 %v1408_v3  ;;  %715 = vmatprep.mubr.bf16.mxu0 %v1410_v4 }
  0x55   :  { %812 = vmatprep.mubr.bf16.mxu1 %v1412_v5 }
  0x5b   :  { %716 = vmatmul.mubr.bf16.gmra.mxu0 %v1414_v6 }
  0x5c   :  { %813 = vmatmul.mubr.bf16.gmra.mxu1 %v1415_v7  ;;  %1297 = vmatprep.mubr.bf16.mxu0 %v1417_v8 }
  0x5d   :  { %1305 = vmatprep.mubr.bf16.mxu1 %v1418_v9 }
  0x63   :  { %1298 = vmatmul.mubr.bf16.vlgmr.msra.gmra.mxu0 %v1419_v10 }
  0x64   :  { %1306 = vmatmul.mubr.bf16.vlgmr.msra.gmra.mxu1 %v1420_v11  ;;  %1301 = vmatprep.mubr.bf16.mxu0 %v1421_v12 }
  0x65   :  { %1309 = vmatprep.mubr.bf16.mxu1 %v1422_v13 }
  0x6b   :  { %1302 = vmatmul.mubr.bf16.gmra.mxu0 %v1423_v14 }
  0x6c   :  { %1310 = vmatmul.mubr.bf16.gmra.mxu1 %v1424_v15 }
  0xe3   :  { %v1153_v16 = vpop.f32.mrf.mxu0 }
  0xe4   :  { %v1217_v17 = vpop.f32.mrf.mxu1 }
  0xe5   :  { %v1154_v18 = vpop.f32.mrf.mxu0 }
  0xe6   :  { %v1218_v19 = vpop.f32.mrf.mxu1  ;;  %v1155_v11 = vadd.f32 %v1154_v18, %v1153_v16 }
  0xe7   :  { %v1690_v20 = vpop.f32.mrf.mxu0  ;;  %v1219_v12 = vadd.f32 %v1218_v19, %v1217_v17 }
  0xe8   :  { %v1692_v21 = vpop.f32.mrf.mxu1 }
  0xe9   :  { %v1694_v22 = vpop.f32.mrf.mxu0  ;;  %v759_v18 = vadd.f32 %v1219_v12, %v1155_v11 }
  0xea   :  { %v1696_v23 = vpop.f32.mrf.mxu1 }
  0xeb   :  { %v1159_v24 = vpop.f32.mrf.mxu0 }
  0xec   :  { %v1223_v25 = vpop.f32.mrf.mxu1 }
  0xed   :  { %v1160_v26 = vpop.f32.mrf.mxu0 }
  0xee   :  { %v1224_v27 = vpop.f32.mrf.mxu1  ;;  %v1161_v13 = vadd.f32 %v1160_v26, %v1159_v24 }
  0xef   :  { %v1162_v28 = vpop.f32.mrf.mxu0  ;;  %v1225_v14 = vadd.f32 %v1224_v27, %v1223_v25 }
  0xf0   :  { %v1226_v29 = vpop.f32.mrf.mxu1 }
  0xf1   :  { %v1163_v30 = vpop.f32.mrf.mxu0  ;;  %v767_v17 = vadd.f32 %v1225_v14, %v1161_v13 }
  0xf2   :  { %v1227_v31 = vpop.f32.mrf.mxu1 }
  0xf3   :  { %v1698_v32 = vpop.f32.mrf.mxu0 }
  0xf4   :  { %v1700_v33 = vpop.f32.mrf.mxu1 }
  0xf5   :  { %v1702_v34 = vpop.f32.mrf.mxu0 }
  0xf6   :  { %v1704_v35 = vpop.f32.mrf.mxu1 }
  0xf7   :  { %v1706_v36 = vpop.f32.mrf.mxu0 }
  0xf8   :  { %1839 = vst [vmem:[#allocation3_spill] sm:$0xff] %v1706_v36  ;;  %v1708_v37 = vpop.f32.mrf.mxu1 }
  0xf9   :  { %1840 = vst [vmem:[#allocation4_spill] sm:$0xff] %v1708_v37  ;;  %v1710_v38 = vpop.f32.mrf.mxu0  ;;  %v1228_v37 = vadd.f32 %v1227_v31, %v1226_v29  ;;  %v1231_v29 = vadd.f32 %v1704_v35, %v1700_v33 }
  0xfa   :  { %1841 = vst [vmem:[#allocation5_spill] sm:$0xff] %v1710_v38  ;;  %v1712_v39 = vpop.f32.mrf.mxu1 }
  0xfb   :  { %1842 = vst [vmem:[#allocation6_spill] sm:$0xff] %v1712_v39  ;;  %v1171_v40 = vpop.f32.mrf.mxu0  ;;  %v1164_v39 = vadd.f32 %v1163_v30, %v1162_v28  ;;  %v1167_v28 = vadd.f32 %v1702_v34, %v1698_v32 }
  0xfc   :  { %v1714_v41 = vpop.f32.mrf.mxu1 }
  0xfd   :  { %v1172_v42 = vpop.f32.mrf.mxu0  ;;  %v770_v27 = vadd.f32 %v1228_v37, %v1164_v39 }
  0xfe   :  { %v1716_v43 = vpop.f32.mrf.mxu1  ;;  %v1173_v30 = vadd.f32 %v1172_v42, %v1171_v40 }
  0xff   :  { %v1718_v44 = vpop.f32.mrf.mxu0 }
 0x100   :  { %v1720_v45 = vpop.f32.mrf.mxu1 }
 0x101   :  { %v1722_v46 = vpop.f32.mrf.mxu0 }
 0x102   :  { %v1724_v47 = vpop.f32.mrf.mxu1  ;;  %v1176_v37 = vadd.f32 %v1722_v46, %v1718_v44  ;;  %v1852_v44 = vld [vmem:[#allocation5_spill] sm:$0xff] }
 0x103   :  { %1843 = vst [vmem:[#allocation7_spill] sm:$0xff] %v1724_v47  ;;  %v1177_v48 = vpop.f32.mrf.mxu0 }
 0x104   :  { %v1241_v49 = vpop.f32.mrf.mxu1 }
 0x105   :  { %v1178_v50 = vpop.f32.mrf.mxu0 }
 0x106   :  { %v1242_v51 = vpop.f32.mrf.mxu1  ;;  %v1179_v36 = vadd.f32 %v1178_v50, %v1177_v48  ;;  %v1237_v50 = vadd.f32 %v1716_v43, %v1714_v41  ;;  %v1851_v43 = vld [vmem:[#allocation3_spill] sm:$0xff] }
 0x107   :  { %v1180_v52 = vpop.f32.mrf.mxu0 }
 0x108   :  { %v1244_v53 = vpop.f32.mrf.mxu1 }
 0x109   :  { %v1181_v54 = vpop.f32.mrf.mxu0 }
 0x10a   :  { %v1245_v55 = vpop.f32.mrf.mxu1  ;;  %v1850_v32 = vld [vmem:[#allocation7_spill] sm:$0xff] }
 0x10b   :  { %v1183_v56 = vpop.f32.mrf.mxu0  ;;  %v1246_v48 = vadd.f32 %v1245_v55, %v1244_v53  ;;  %v1240_v34 = vadd.f32 %v1850_v32, %v1720_v45  ;;  %v1170_v45 = vadd.f32 %v1852_v44, %v1851_v43  ;;  %v775_v53 = vadd.f32 %v1231_v29, %v1167_v28 }
 0x10c   :  { %v1247_v57 = vpop.f32.mrf.mxu1 }
 0x10d   :  { %v1184_v58 = vpop.f32.mrf.mxu0 }
 0x10e   :  { %v1248_v59 = vpop.f32.mrf.mxu1 }
 0x10f   :  { %v1186_v60 = vpop.f32.mrf.mxu0 }
 0x110   :  { %v1250_v61 = vpop.f32.mrf.mxu1 }
 0x111   :  { %v1187_v62 = vpop.f32.mrf.mxu0 }
 0x112   :  { %v1251_v63 = vpop.f32.mrf.mxu1  ;;  %v1188_v19 = vadd.f32 %v1187_v62, %v1186_v60  ;;  %v1856_v62 = vld [vmem:[#allocation6_spill] sm:$0xff] }
 0x113   :  { %v1726_v0 = vpop.f32.mrf.mxu0  ;;  %v1252_v24 = vadd.f32 %v1251_v63, %v1250_v61  ;;  %v1855_v61 = vld [vmem:[#allocation4_spill] sm:$0xff] }
 0x114   :  { %1844 = vst [vmem:[#allocation8_spill] sm:$0xff] %v1726_v0  ;;  %v1728_v1 = vpop.f32.mrf.mxu1  ;;  %v1249_v0 = vadd.f32 %v1248_v59, %v1247_v57  ;;  %v1234_v63 = vadd.f32 %v1856_v62, %v1855_v61 }
 0x115   :  { %1845 = vst [vmem:[#allocation9_spill] sm:$0xff] %v1728_v1  ;;  %v1190_v2 = vpop.f32.mrf.mxu0  ;;  %v1185_v1 = vadd.f32 %v1184_v58, %v1183_v56  ;;  %v802_v42 = vadd.f32 %v1252_v24, %v1188_v19 }
 0x116   :  { %v1254_v3 = vpop.f32.mrf.mxu1 }
 0x117   :  { %v1730_v4 = vpop.f32.mrf.mxu0  ;;  %v799_v26 = vadd.f32 %v1249_v0, %v1185_v1 }
 0x118   :  { %1846 = vst [vmem:[#allocation10_spill] sm:$0xff] %v1730_v4  ;;  %v1732_v5 = vpop.f32.mrf.mxu1 }
 0x119   :  { %1847 = vst [vmem:[#allocation11_spill] sm:$0xff] %v1732_v5  ;;  %v1734_v6 = vpop.f32.mrf.mxu0  ;;  %v1243_v5 = vadd.f32 %v1242_v51, %v1241_v49 }
 0x11a   :  { %1848 = vst [vmem:[#allocation12_spill] sm:$0xff] %v1734_v6  ;;  %v1736_v7 = vpop.f32.mrf.mxu1  ;;  %v1222_v6 = vadd.f32 %v1696_v23, %v1692_v21 }
 0x11b   :  { %1849 = vst [vmem:[#allocation13_spill] sm:$0xff] %v1736_v7  ;;  %v1195_v8 = vpop.f32.mrf.mxu0  ;;  %v1158_v7 = vadd.f32 %v1694_v22, %v1690_v20  ;;  %v1182_v22 = vadd.f32 %v1181_v54, %v1180_v52  ;;  %v791_v49 = vadd.f32 %v1243_v5, %v1179_v36  ;;  %v1853_v54 = vld [vmem:[#allocation8_spill] sm:$0xff] }
 0x11c   :  { %v1259_v9 = vpop.f32.mrf.mxu1  ;;  %v1191_v55 = vadd.f32 %v1190_v2, %v1853_v54  ;;  %v1854_v56 = vld [vmem:[#allocation9_spill] sm:$0xff]  ;;  %v783_v2 = vadd.f32 %v1237_v50, %v1173_v30 }
 0x11d   :  { %v1196_v10 = vpop.f32.mrf.mxu0  ;;  %v762_v52 = vadd.f32 %v1222_v6, %v1158_v7  ;;  %v1255_v57 = vadd.f32 %v1254_v3, %v1854_v56  ;;  %v794_v60 = vadd.f32 %v1246_v48, %v1182_v22  ;;  %v786_v3 = vadd.f32 %v1240_v34, %v1176_v37 }
 0x11e   :  { %v1260_v15 = vpop.f32.mrf.mxu1  ;;  %v1197_v39 = vadd.f32 %v1196_v10, %v1195_v8  ;;  %v778_v48 = vadd.f32 %v1234_v63, %v1170_v45 }
 0x11f   :  { %v1198_v38 = vpop.f32.mrf.mxu0  ;;  %v1261_v40 = vadd.f32 %v1260_v15, %v1259_v9  ;;  %v1857_v15 = vld [vmem:[#allocation10_spill] sm:$0xff]  ;;  %v807_v24 = vadd.f32 %v1255_v57, %v1191_v55 }
 0x120   :  { %v1262_v4 = vpop.f32.mrf.mxu1 }
 0x121   :  { %v1199_v47 = vpop.f32.mrf.mxu0  ;;  %v815_v9 = vadd.f32 %v1261_v40, %v1197_v39 }
 0x122   :  { %v1263_v16 = vpop.f32.mrf.mxu1  ;;  %v1200_v5 = vadd.f32 %v1199_v47, %v1198_v38  ;;  %v1858_v38 = vld [vmem:[#allocation12_spill] sm:$0xff] }
 0x123   :  { %v1299_v25 = vpop.f32.mrf.mxu0  ;;  %v1264_v6 = vadd.f32 %v1263_v16, %v1262_v4  ;;  %v1194_v47 = vadd.f32 %v1858_v38, %v1857_v15  ;;  %v1859_v4 = vld [vmem:[#allocation11_spill] sm:$0xff]  ;;  %v1860_v16 = vld [vmem:[#allocation13_spill] sm:$0xff] }
 0x124   :  { %v864_v31 = vadd.f32 %v1299_v25, %v767_v17  ;;  %v1307_v20 = vpop.f32.mrf.mxu1  ;;  %v1258_v17 = vadd.f32 %v1860_v16, %v1859_v4 }
 0x125   :  { %v1746_v21 = vadd.f32 %v1307_v20, %v799_v26  ;;  %v855_v23 = vpop.f32.mrf.mxu0  ;;  %v818_v22 = vadd.f32 %v1264_v6, %v1200_v5 }
 0x126   :  { %971 = vst [vmem:[%s1836_s2 + $0x10] sm:$0xff] %v864_v31  ;;  %v856_v33 = vadd.f32 %v855_v23, %v759_v18  ;;  %v887_v35 = vpop.f32.mrf.mxu1  ;;  %v1009_v25 = vmul.f32 %v864_v31, %v864_v31 }
 0x127   :  { %979 = vst [vmem:[%s1836_s2 + $0x50] sm:$0xff] %v1746_v21  ;;  %v1761_v36 = vadd.f32 %v887_v35, %v791_v49  ;;  %v1300_v41 = vpop.f32.mrf.mxu0 }
 0x128   :  { %969 = vst [vmem:[%s1836_s2] sm:$0xff] %v856_v33  ;;  %v867_v46 = vadd.f32 %v1300_v41, %v770_v27  ;;  %v1308_v51 = vpop.f32.mrf.mxu1  ;;  %v1007_v10 = vmul.f32 %v856_v33, %v856_v33 }
 0x129   :  { %977 = vst [vmem:[%s1836_s2 + $0x40] sm:$0xff] %v1761_v36  ;;  %v1774_v58 = vadd.f32 %v1308_v51, %v802_v42  ;;  %v858_v59 = vpop.f32.mrf.mxu0  ;;  %v1015_v57 = vmul.f32 %v1761_v36, %v1761_v36 }
 0x12a   :  { %972 = vst [vmem:[%s1836_s2 + $0x18] sm:$0xff] %v867_v46  ;;  %v859_v0 = vadd.f32 %v858_v59, %v762_v52  ;;  %v890_v1 = vpop.f32.mrf.mxu1  ;;  %v1010_v23 = vmul.f32 %v867_v46, %v867_v46 }
 0x12b   :  { %980 = vst [vmem:[%s1836_s2 + $0x58] sm:$0xff] %v1774_v58  ;;  %v891_v7 = vadd.f32 %v890_v1, %v794_v60  ;;  %v1303_v8 = vpop.f32.mrf.mxu0 }
 0x12c   :  { %970 = vst [vmem:[%s1836_s2 + $0x8] sm:$0xff] %v859_v0  ;;  %v985_v11 = vadd.f32 %v859_v0, %v856_v33  ;;  %v1008_v12 = vmul.f32 %v859_v0, %v859_v0  ;;  %v880_v13 = vadd.f32 %v1303_v8, %v783_v2  ;;  %v1311_v14 = vpop.f32.mrf.mxu1  ;;  %v810_v33 = vadd.f32 %v1258_v17, %v1194_v47 }
 0x12d   :  { %978 = vst [vmem:[%s1836_s2 + $0x48] sm:$0xff] %v891_v7  ;;  %v912_v18 = vadd.f32 %v1311_v14, %v815_v9  ;;  %v871_v19 = vpop.f32.mrf.mxu0  ;;  %v1016_v61 = vmul.f32 %v891_v7, %v891_v7  ;;  %v1017_v0 = vmul.f32 %v1746_v21, %v1746_v21 }
 0x12e   :  { %v986_v26 = vadd.f32 %v985_v11, %v864_v31  ;;  %v1023_v27 = vadd.f32 %v1008_v12, %v1007_v10  ;;  %975 = vst [vmem:[%s1836_s2 + $0x30] sm:$0xff] %v880_v13  ;;  %v872_v28 = vadd.f32 %v871_v19, %v775_v53  ;;  %v903_v29 = vpop.f32.mrf.mxu1  ;;  %v1013_v51 = vmul.f32 %v880_v13, %v880_v13 }
 0x12f   :  { %983 = vst [vmem:[%s1836_s2 + $0x70] sm:$0xff] %v912_v18  ;;  %v904_v30 = vadd.f32 %v903_v29, %v807_v24  ;;  %v1304_v20 = vpop.f32.mrf.mxu0 }
 0x130   :  { %v1024_v49 = vadd.f32 %v1023_v27, %v1009_v25  ;;  %973 = vst [vmem:[%s1836_s2 + $0x20] sm:$0xff] %v872_v28  ;;  %v987_v31 = vadd.f32 %v986_v26, %v867_v46  ;;  %v883_v50 = vadd.f32 %v1304_v20, %v786_v3  ;;  %v1312_v37 = vpop.f32.mrf.mxu1  ;;  %v1011_v39 = vmul.f32 %v872_v28, %v872_v28 }
 0x131   :  { %981 = vst [vmem:[%s1836_s2 + $0x60] sm:$0xff] %v904_v30  ;;  %v915_v32 = vadd.f32 %v1312_v37, %v818_v22  ;;  %v874_v34 = vpop.f32.mrf.mxu0  ;;  %v1018_v3 = vmul.f32 %v1774_v58, %v1774_v58  ;;  %v1019_v8 = vmul.f32 %v904_v30, %v904_v30 }
 0x132   :  { %v988_v35 = vadd.f32 %v987_v31, %v872_v28  ;;  %v1025_v40 = vadd.f32 %v1024_v49, %v1010_v23  ;;  %976 = vst [vmem:[%s1836_s2 + $0x38] sm:$0xff] %v883_v50  ;;  %v875_v41 = vadd.f32 %v874_v34, %v778_v48  ;;  %v906_v42 = vpop.f32.mrf.mxu1  ;;  %v1014_v54 = vmul.f32 %v883_v50, %v883_v50 }
 0x133   :  { %984 = vst [vmem:[%s1836_s2 + $0x78] sm:$0xff] %v915_v32  ;;  %v907_v43 = vadd.f32 %v906_v42, %v810_v33  ;;  %v1022_v15 = vmul.f32 %v915_v32, %v915_v32 }
 0x134   :  { %v1026_v44 = vadd.f32 %v1025_v40, %v1011_v39  ;;  %974 = vst [vmem:[%s1836_s2 + $0x28] sm:$0xff] %v875_v41  ;;  %v989_v45 = vadd.f32 %v988_v35, %v875_v41  ;;  %v1012_v46 = vmul.f32 %v875_v41, %v875_v41 }
 0x135   :  { %982 = vst [vmem:[%s1836_s2 + $0x68] sm:$0xff] %v907_v43  ;;  %v1020_v11 = vmul.f32 %v907_v43, %v907_v43 }
 0x136   :  { %v990_v52 = vadd.f32 %v989_v45, %v880_v13  ;;  %v1027_v53 = vadd.f32 %v1026_v44, %v1012_v46  ;;  %v1021_v13 = vmul.f32 %v912_v18, %v912_v18 }
 0x138   :  { %v991_v55 = vadd.f32 %v990_v52, %v883_v50  ;;  %v1028_v56 = vadd.f32 %v1027_v53, %v1013_v51 }
 0x13a   :  { %v992_v59 = vadd.f32 %v991_v55, %v1761_v36  ;;  %v1029_v60 = vadd.f32 %v1028_v56, %v1014_v54 }
 0x13c   :  { %v1030_v62 = vadd.f32 %v1029_v60, %v1015_v57  ;;  %v993_v63 = vadd.f32 %v992_v59, %v891_v7 }
 0x13e   :  { %v994_v1 = vadd.f32 %v993_v63, %v1746_v21  ;;  %v1031_v2 = vadd.f32 %v1030_v62, %v1016_v61 }
 0x140   :  { %v995_v5 = vadd.f32 %v994_v1, %v1774_v58  ;;  %v1032_v6 = vadd.f32 %v1031_v2, %v1017_v0 }
 0x142   :  { %v996_v9 = vadd.f32 %v995_v5, %v904_v30  ;;  %v1033_v10 = vadd.f32 %v1032_v6, %v1018_v3 }
 0x144   :  { %v997_v36 = vadd.f32 %v996_v9, %v907_v43  ;;  %v1034_v12 = vadd.f32 %v1033_v10, %v1019_v8 }
 0x146   :  { %v998_v7 = vadd.f32 %v997_v36, %v912_v18  ;;  %v1035_v14 = vadd.f32 %v1034_v12, %v1020_v11 }
 0x148   :  { %v999_v38 = vadd.f32 %v998_v7, %v915_v32  ;;  %v1036_v47 = vadd.f32 %v1035_v14, %v1021_v13 }
 0x14a   :  { %v1000_v21 = vrot.slane %v999_v38, 4  ;;  %v1037_v4 = vadd.f32 %v1036_v47, %v1022_v15 }
 0x14c   :  { %v1001_v16 = vadd.f32 %v1000_v21, %v999_v38  ;;  %v1038_v17 = vrot.slane %v1037_v4, 4 }
 0x14e   :  { %v1002_v19 = vrot.slane %v1001_v16, 2  ;;  %v1039_v24 = vadd.f32 %v1038_v17, %v1037_v4 }
 0x150   :  { %v1003_v58 = vadd.f32 %v1002_v19, %v1001_v16  ;;  %v1040_v25 = vrot.slane %v1039_v24, 2 }
 0x152   :  { %v1004_v26 = vrot.slane %v1003_v58, 1  ;;  %v1041_v27 = vadd.f32 %v1040_v25, %v1039_v24 }
 0x154   :  { %v1005_v28 = vadd.f32 %v1004_v26, %v1003_v58  ;;  %v1042_v29 = vrot.slane %v1041_v27, 1 }
 0x156   :  { %1006 = vst [vmem:[%s1837_s3] sm:$0x1] %v1005_v28  ;;  %v1043_v18 = vadd.f32 %v1042_v29, %v1041_v27 }
 0x158   :  { %1044 = vst [vmem:[%s1838_s4] sm:$0x1] %v1043_v18 }

// kernel: rebuild_encoder_forward.27
= control target key start
LH: loop header
LB: loop body
LE: loop exit
PB: predicated region body
PF: predicated region fallthrough
CT: control target
= control target key end

     0   :  { %v24_v0 = vlaneseq  ;;  %s172_s1 = inlined_call_operand.vmem [shape: f32[1,256], index: 1, kind: input, shape index: {}]   ;;  %s173_s2 = inlined_call_operand.vmem [shape: f32[1,256], index: 2, kind: input, shape index: {}]   ;;  %s174_s0 = inlined_call_operand.vmem [shape: f32[32,256], index: 0, kind: input, shape index: {}]   ;;  %s175_s3 = inlined_call_operand.vmem [shape: f32[32,256], index: 3, kind: output, shape index: {}]  }
   0x1   :  { %v22_v2 = vld [vmem:[%s172_s1] sm:$0x3]  ;;  %v15_v6 = vld [vmem:[%s174_s0 + $0x8] sm:$0xff]  ;;  %v16_v8 = vld [vmem:[%s174_s0 + $0x10] sm:$0xff] }
   0x2   :  { %v25_v1 = vshrl.u32 %v24_v0, 7  ;;  %v42_v3 = vld [vmem:[%s173_s2] sm:$0x3]  ;;  %v17_v9 = vld [vmem:[%s174_s0 + $0x18] sm:$0xff]  ;;  %v19_v15 = vld [vmem:[%s174_s0 + $0x28] sm:$0xff] }
   0x3   :  { %v14_v4 = vld [vmem:[%s174_s0] sm:$0xff]  ;;  %v20_v16 = vld [vmem:[%s174_s0 + $0x30] sm:$0xff]  ;;  %v21_v17 = vld [vmem:[%s174_s0 + $0x38] sm:$0xff] }
   0x4   :  { %v26_v5 = vsub.s32 0, %v25_v1  ;;  %v30_v7 = vsub.s32 1, %v25_v1  ;;  %v18_v10 = vld [vmem:[%s174_s0 + $0x20] sm:$0xff] }
   0x6   :  { %v27_v11 = vrot.slane %v22_v2, %v26_v5  ;;  %v47_v12 = vrot.slane %v42_v3, %v26_v5  ;;  %v31_v13 = vrot.slane %v22_v2, %v30_v7  ;;  %v51_v14 = vrot.slane %v42_v3, %v30_v7 }
   0x8   :  { %v34_v18 = vmul.f32 %v27_v11, %v14_v4  ;;  %v35_v19 = vmul.f32 %v31_v13, %v15_v6  ;;  %v36_v20 = vmul.f32 %v27_v11, %v16_v8  ;;  %v37_v21 = vmul.f32 %v31_v13, %v17_v9 }
   0x9   :  { %v38_v22 = vmul.f32 %v27_v11, %v18_v10  ;;  %v39_v23 = vmul.f32 %v31_v13, %v19_v15  ;;  %v40_v24 = vmul.f32 %v27_v11, %v20_v16  ;;  %v41_v25 = vmul.f32 %v31_v13, %v21_v17 }
   0xa   :  { %v54_v26 = vadd.f32 %v47_v12, %v34_v18  ;;  %v55_v27 = vadd.f32 %v51_v14, %v35_v19  ;;  %v56_v28 = vadd.f32 %v47_v12, %v36_v20  ;;  %v57_v29 = vadd.f32 %v51_v14, %v37_v21 }
   0xb   :  { %v58_v30 = vadd.f32 %v47_v12, %v38_v22  ;;  %v59_v31 = vadd.f32 %v51_v14, %v39_v23  ;;  %v60_v32 = vadd.f32 %v47_v12, %v40_v24  ;;  %v61_v33 = vadd.f32 %v51_v14, %v41_v25 }
   0xc   :  { %vm62_vm0 = vcmp.ge.f32.partialorder %v54_v26, 0.0  ;;  %v70_v34 = vmul.f32 0.01, %v54_v26  ;;  %vm63_vm1 = vcmp.ge.f32.partialorder %v55_v27, 0.0  ;;  %v71_v35 = vmul.f32 0.01, %v55_v27 }
   0xd   :  { %vm64_vm2 = vcmp.ge.f32.partialorder %v56_v28, 0.0  ;;  %v72_v36 = vmul.f32 0.01, %v56_v28  ;;  %vm65_vm3 = vcmp.ge.f32.partialorder %v57_v29, 0.0  ;;  %v73_v37 = vmul.f32 0.01, %v57_v29 }
   0xe   :  { %v78_v38 = vsel %vm62_vm0, %v54_v26, %v70_v34  ;;  %v79_v39 = vsel %vm63_vm1, %v55_v27, %v71_v35  ;;  %vm66_vm4 = vcmp.ge.f32.partialorder %v58_v30, 0.0  ;;  %v74_v40 = vmul.f32 0.01, %v58_v30 }
   0xf   :  { %86 = vst [vmem:[%s175_s3] sm:$0xff] %v78_v38  ;;  %87 = vst [vmem:[%s175_s3 + $0x8] sm:$0xff] %v79_v39  ;;  %v80_v41 = vsel %vm64_vm2, %v56_v28, %v72_v36  ;;  %v81_v42 = vsel %vm65_vm3, %v57_v29, %v73_v37  ;;  %vm67_vm5 = vcmp.ge.f32.partialorder %v59_v31, 0.0  ;;  %v75_v43 = vmul.f32 0.01, %v59_v31 }
  0x10   :  { %88 = vst [vmem:[%s175_s3 + $0x10] sm:$0xff] %v80_v41  ;;  %89 = vst [vmem:[%s175_s3 + $0x18] sm:$0xff] %v81_v42  ;;  %v82_v44 = vsel %vm66_vm4, %v58_v30, %v74_v40  ;;  %vm68_vm6 = vcmp.ge.f32.partialorder %v60_v32, 0.0  ;;  %v76_v45 = vmul.f32 0.01, %v60_v32  ;;  %vm69_vm7 = vcmp.ge.f32.partialorder %v61_v33, 0.0 }
  0x11   :  { %90 = vst [vmem:[%s175_s3 + $0x20] sm:$0xff] %v82_v44  ;;  %v83_v46 = vsel %vm67_vm5, %v59_v31, %v75_v43  ;;  %v77_v47 = vmul.f32 0.01, %v61_v33 }
  0x12   :  { %91 = vst [vmem:[%s175_s3 + $0x28] sm:$0xff] %v83_v46  ;;  %v84_v48 = vsel %vm68_vm6, %v60_v32, %v76_v45 }
  0x13   :  { %92 = vst [vmem:[%s175_s3 + $0x30] sm:$0xff] %v84_v48  ;;  %v85_v49 = vsel %vm69_vm7, %v61_v33, %v77_v47 }
  0x14   :  { %93 = vst [vmem:[%s175_s3 + $0x38] sm:$0xff] %v85_v49 }

// kernel: rebuild_encoder_forward.26
= control target key start
LH: loop header
LB: loop body
LE: loop exit
PB: predicated region body
PF: predicated region fallthrough
CT: control target
= control target key end

     0   :  { %s2546_s0 = inlined_call_operand.vmem [shape: bf16[32,2304], index: 0, kind: input, shape index: {}]   ;;  %s2547_s1 = inlined_call_operand.vmem [shape: bf16[2304,256], index: 1, kind: input, shape index: {}]   ;;  %s2548_s2 = inlined_call_operand.vmem [shape: f32[32,256], index: 2, kind: output, shape index: {0}]   ;;  %s2549_s3 = inlined_call_operand.vmem [shape: f32[1,1,256], index: 3, kind: output, shape index: {1}]   ;;  %s2550_s4 = inlined_call_operand.vmem [shape: f32[1,1,256], index: 4, kind: output, shape index: {2}]  }
   0x1   :  { %2554 = sst [smem:[#allocation9_spill]] %s2546_s0 }
   0x2   :  { %2555 = sst [smem:[#allocation10_spill]] %s2547_s1 }
   0x3   :  { %s2094_s15 = smov 0   ;;  %s2096_s16 = smov 0  }
   0x4   :  { %s2098_s17 = smov 0   ;;  %s2100_s18 = smov 0  }
   0x5   :  { %s2102_s19 = smov 0   ;;  %s2104_s20 = smov 0  }
   0x6   :  { %s2106_s21 = smov 0   ;;  %s2108_s22 = smov 0  }
   0x7   :  { %s2110_s23 = smov 0   ;;  %s2112_s24 = smov 0  }
   0x8   :  { %s2114_s25 = smov 0  }
   0x9 LB: > { %2556 = sst [smem:[#allocation6_spill]] %s2062_s24  ;;  %s1644_s26 = sadd.s32 4294967295, %s2066_s25   ;;  %s2066_s25 = sphi %s2114_s25, %s15_s25   ;;  %s2062_s24 = sphi %s2112_s24, %s2566_s24   ;;  %s2058_s23 = sphi %s2110_s23, %s2574_s23   ;;  %s2054_s22 = sphi %s2108_s22, %s2564_s22   ;;  %s2050_s21 = sphi %s2106_s21, %s2573_s21   ;;  %s2046_s20 = sphi %s2104_s20, %s2572_s20   ;;  %s2042_s19 = sphi %s2102_s19, %s2571_s19   ;;  %s2038_s18 = sphi %s2100_s18, %s2570_s18   ;;  %s2034_s17 = sphi %s2098_s17, %s2569_s17   ;;  %s2030_s16 = sphi %s2096_s16, %s2568_s16   ;;  %s2026_s15 = sphi %s2094_s15, %s2567_s15  }
   0xa   : > { %s27_s27 = sadd.s32 1, %s2058_s23  ;;  %s30_s28 = sadd.s32 1, %s2062_s24 }
   0xb   : > { %p28_p0 = scmp.ge.s32.totalorder %s27_s27, 3  ;;  %s43_s29 = sadd.s32 1, %s2046_s20 }
   0xc   : > { %p50_p1 = scmp.ne.s32.totalorder %s2046_s20, %s2042_s19  ;;  %p51_p2 = scmp.eq.s32.totalorder %s2066_s25, 0 }
   0xd   : > { %s2576_s27 = smov (%p28_p0, %s27_s27), 0  ;;  %s2578_s28 = smov (!%p28_p0, %s30_s28), %s2062_s24 }
   0xe   : > { %2557 = sst [smem:[#allocation7_spill]] %s2576_s27  ;;  %s39_s30 = ssub.s32 %s2058_s23, %s2576_s27 }
   0xf   : > { %p32_p3 = scmp.ge.s32.totalorder %s2578_s28, 2  ;;  %p41_p4 = scmp.eq.s32.totalorder %s39_s30, 0 }
  0x10   : > { %p2161_p5 = por %p51_p2, %p50_p1  ;;  %s71_s6 = sadd.s32 1, %s2038_s18 }
  0x11   : > { %s2580_s28 = smov (%p32_p3, %s2578_s28), 0  ;;  %p78_p6 = scmp.ne.s32.totalorder %s2038_s18, %s2034_s17 }
  0x12   : > { %2559 = sst [smem:[#allocation8_spill]] %s2580_s28  ;;  %s67_s8 = ssub.s32 %s2062_s24, %s2580_s28 }
  0x13   : > { %s2169_s7 = scalar_select %p41_p4, %s2046_s20, %s43_s29  }
  0x14   : > { %s68_s9 = sor.u32 %s67_s8, %s39_s30  ;;  %p97_p7 = scmp.eq.s32.totalorder %s67_s8, 0 }
  0x15   : > { %p69_p8 = scmp.eq.s32.totalorder %s68_s9, 0  ;;  %p2175_p9 = por %p78_p6, %p51_p2 }
  0x16   : > { %s99_s11 = sadd.s32 1, %s2030_s16  ;;  %p109_p10 = scmp.ne.s32.totalorder %s2030_s16, %s2026_s15 }
  0x17   : > { %s2183_s12 = scalar_select %p69_p8, %s2038_s18, %s71_s6  }
  0x18   : > { %s2186_s13 = scalar_select %p97_p7, %s2030_s16, %s99_s11  }
  0x19   : > { %p110_p11 = scmp.eq.s32.totalorder %s1644_s26, 5  ;;  %p1647_p13 = scmp.ge.s32.totalorder %s2066_s25, 6 }
  0x1b   : > { %p2188_p12 = por %p110_p11, %p109_p10  ;;  %188 = sbr.rel (%p1647_p13) target bundleno = 120 (0x78), region = 16 }
  0x20   : > { %191 = sbr.rel (!%p2161_p5) target bundleno = 47 (0x2f), region = 20  ;;  %s193_s29 = sand.u32 (%p2161_p5), 1, %s2046_s20  }
  0x21   : > { %s1719_s30 = smul.u32 (%p2161_p5), 24, %s2058_s23  ;;  %s2562_s0 = sld [smem:[#allocation9_spill]] (%p2161_p5) }
  0x22   : > { %s1821_s8 = smul.u32 (%p2161_p5), 96, %s193_s29 }
  0x24   : > { %s195_s26 = scalar_lea.vmem (%p2161_p5), [#allocation3], %s1821_s8 }
  0x27   : > { %s201_s11 = scalar_lea.vmem %s2562_s0, %s1719_s30 }
  0x28   : > { %v214_v0 = vld [vmem:[%s201_s11] sm:$0xff]  ;;  %v216_v1 = vld [vmem:[%s201_s11 + $0x8] sm:$0xff]  ;;  %v218_v2 = vld [vmem:[%s201_s11 + $0x10] sm:$0xff] }
  0x29   : > { %215 = vst [vmem:[%s195_s26] sm:$0xff] %v214_v0  ;;  %217 = vst [vmem:[%s195_s26 + $0x8] sm:$0xff] %v216_v1  ;;  %v220_v3 = vld [vmem:[%s201_s11 + $0x48] sm:$0xff]  ;;  %v222_v4 = vld [vmem:[%s201_s11 + $0x50] sm:$0xff] }
  0x2a   : > { %219 = vst [vmem:[%s195_s26 + $0x10] sm:$0xff] %v218_v2  ;;  %v224_v5 = vld [vmem:[%s201_s11 + $0x58] sm:$0xff]  ;;  %221 = vst [vmem:[%s195_s26 + $0x18] sm:$0xff] %v220_v3  ;;  %v226_v6 = vld [vmem:[%s201_s11 + $0x90] sm:$0xff] }
  0x2b   : > { %223 = vst [vmem:[%s195_s26 + $0x20] sm:$0xff] %v222_v4  ;;  %225 = vst [vmem:[%s195_s26 + $0x28] sm:$0xff] %v224_v5  ;;  %v228_v7 = vld [vmem:[%s201_s11 + $0x98] sm:$0xff]  ;;  %v230_v8 = vld [vmem:[%s201_s11 + $0xa0] sm:$0xff] }
  0x2c   : > { %227 = vst [vmem:[%s195_s26 + $0x30] sm:$0xff] %v226_v6  ;;  %229 = vst [vmem:[%s195_s26 + $0x38] sm:$0xff] %v228_v7  ;;  %v232_v9 = vld [vmem:[%s201_s11 + $0xd8] sm:$0xff]  ;;  %v234_v10 = vld [vmem:[%s201_s11 + $0xe0] sm:$0xff] }
  0x2d   : > { %231 = vst [vmem:[%s195_s26 + $0x40] sm:$0xff] %v230_v8  ;;  %v236_v11 = vld [vmem:[%s201_s11 + $0xe8] sm:$0xff]  ;;  %233 = vst [vmem:[%s195_s26 + $0x48] sm:$0xff] %v232_v9 }
  0x2e   : > { %235 = vst [vmem:[%s195_s26 + $0x50] sm:$0xff] %v234_v10  ;;  %237 = vst [vmem:[%s195_s26 + $0x58] sm:$0xff] %v236_v11 }
  0x2f PF: > { %243 = sbr.rel (!%p2175_p9) target bundleno = 120 (0x78), region = 43  ;;  %s245_s5 = sand.u32 (%p2175_p9), 1, %s2038_s18  }
  0x30   : > { %s1720_s29 = smul.u32 (%p2175_p9), 192, %s2058_s23  ;;  %s2563_s1 = sld [smem:[#allocation10_spill]] (%p2175_p9) }
  0x31   : > { %s1822_s30 = smul.u32 (%p2175_p9), 384, %s245_s5 }
  0x32   : > { %s250_s8 = sadd.s32 (%p2175_p9), %s2062_s24, %s1720_s29 }
  0x33   : > { %s1650_s6 = sshll.u32 (%p2175_p9), %s250_s8, 2  ;;  %s2213_s10 = scalar_lea.vmem (%p2175_p9), [#allocation4], %s1822_s30 }
  0x36   : > { %s2208_s28 = scalar_lea.vmem %s2563_s1, %s1650_s6 }
  0x37   : > { %v269_v12 = vld [vmem:[%s2208_s28] sm:$0xf]  ;;  %v271_v13 = vld [vmem:[%s2208_s28 + $0x8] sm:$0xf]  ;;  %v273_v14 = vld [vmem:[%s2208_s28 + $0x10] sm:$0xf] }
  0x38   : > { %270 = vst [vmem:[%s2213_s10] sm:$0xf] %v269_v12  ;;  %272 = vst [vmem:[%s2213_s10 + $0x4] sm:$0xf] %v271_v13  ;;  %v275_v15 = vld [vmem:[%s2208_s28 + $0x18] sm:$0xf] }
  0x39   : > { %274 = vst [vmem:[%s2213_s10 + $0x8] sm:$0xf] %v273_v14  ;;  %v277_v16 = vld [vmem:[%s2208_s28 + $0x20] sm:$0xf]  ;;  %v279_v17 = vld [vmem:[%s2208_s28 + $0x28] sm:$0xf] }
  0x3a   : > { %276 = vst [vmem:[%s2213_s10 + $0xc] sm:$0xf] %v275_v15  ;;  %278 = vst [vmem:[%s2213_s10 + $0x10] sm:$0xf] %v277_v16  ;;  %v281_v18 = vld [vmem:[%s2208_s28 + $0x30] sm:$0xf] }
  0x3b   : > { %280 = vst [vmem:[%s2213_s10 + $0x14] sm:$0xf] %v279_v17  ;;  %v283_v19 = vld [vmem:[%s2208_s28 + $0x38] sm:$0xf]  ;;  %v285_v20 = vld [vmem:[%s2208_s28 + $0x40] sm:$0xf] }
  0x3c   : > { %282 = vst [vmem:[%s2213_s10 + $0x18] sm:$0xf] %v281_v18  ;;  %284 = vst [vmem:[%s2213_s10 + $0x1c] sm:$0xf] %v283_v19  ;;  %v287_v21 = vld [vmem:[%s2208_s28 + $0x48] sm:$0xf] }
  0x3d   : > { %286 = vst [vmem:[%s2213_s10 + $0x20] sm:$0xf] %v285_v20  ;;  %v289_v22 = vld [vmem:[%s2208_s28 + $0x50] sm:$0xf]  ;;  %v291_v23 = vld [vmem:[%s2208_s28 + $0x58] sm:$0xf] }
  0x3e   : > { %288 = vst [vmem:[%s2213_s10 + $0x24] sm:$0xf] %v287_v21  ;;  %290 = vst [vmem:[%s2213_s10 + $0x28] sm:$0xf] %v289_v22  ;;  %v293_v24 = vld [vmem:[%s2208_s28 + $0x60] sm:$0xf] }
  0x3f   : > { %292 = vst [vmem:[%s2213_s10 + $0x2c] sm:$0xf] %v291_v23  ;;  %v295_v25 = vld [vmem:[%s2208_s28 + $0x68] sm:$0xf]  ;;  %v297_v26 = vld [vmem:[%s2208_s28 + $0x70] sm:$0xf] }
  0x40   : > { %294 = vst [vmem:[%s2213_s10 + $0x30] sm:$0xf] %v293_v24  ;;  %296 = vst [vmem:[%s2213_s10 + $0x34] sm:$0xf] %v295_v25  ;;  %v299_v27 = vld [vmem:[%s2208_s28 + $0x78] sm:$0xf] }
  0x41   : > { %298 = vst [vmem:[%s2213_s10 + $0x38] sm:$0xf] %v297_v26  ;;  %v301_v28 = vld [vmem:[%s2208_s28 + $0x80] sm:$0xf]  ;;  %v303_v29 = vld [vmem:[%s2208_s28 + $0x88] sm:$0xf] }
  0x42   : > { %300 = vst [vmem:[%s2213_s10 + $0x3c] sm:$0xf] %v299_v27  ;;  %302 = vst [vmem:[%s2213_s10 + $0x40] sm:$0xf] %v301_v28  ;;  %v305_v30 = vld [vmem:[%s2208_s28 + $0x90] sm:$0xf] }
  0x43   : > { %304 = vst [vmem:[%s2213_s10 + $0x44] sm:$0xf] %v303_v29  ;;  %v307_v31 = vld [vmem:[%s2208_s28 + $0x98] sm:$0xf]  ;;  %v309_v32 = vld [vmem:[%s2208_s28 + $0xa0] sm:$0xf] }
  0x44   : > { %306 = vst [vmem:[%s2213_s10 + $0x48] sm:$0xf] %v305_v30  ;;  %308 = vst [vmem:[%s2213_s10 + $0x4c] sm:$0xf] %v307_v31  ;;  %v311_v33 = vld [vmem:[%s2208_s28 + $0xa8] sm:$0xf] }
  0x45   : > { %310 = vst [vmem:[%s2213_s10 + $0x50] sm:$0xf] %v309_v32  ;;  %v313_v34 = vld [vmem:[%s2208_s28 + $0xb0] sm:$0xf]  ;;  %v315_v35 = vld [vmem:[%s2208_s28 + $0xb8] sm:$0xf] }
  0x46   : > { %312 = vst [vmem:[%s2213_s10 + $0x54] sm:$0xf] %v311_v33  ;;  %314 = vst [vmem:[%s2213_s10 + $0x58] sm:$0xf] %v313_v34  ;;  %v317_v36 = vld [vmem:[%s2208_s28 + $0xc0] sm:$0xf] }
  0x47   : > { %316 = vst [vmem:[%s2213_s10 + $0x5c] sm:$0xf] %v315_v35  ;;  %v319_v37 = vld [vmem:[%s2208_s28 + $0xc8] sm:$0xf]  ;;  %v321_v38 = vld [vmem:[%s2208_s28 + $0xd0] sm:$0xf] }
  0x48   : > { %318 = vst [vmem:[%s2213_s10 + $0x60] sm:$0xf] %v317_v36  ;;  %320 = vst [vmem:[%s2213_s10 + $0x64] sm:$0xf] %v319_v37  ;;  %v323_v39 = vld [vmem:[%s2208_s28 + $0xd8] sm:$0xf] }
  0x49   : > { %322 = vst [vmem:[%s2213_s10 + $0x68] sm:$0xf] %v321_v38  ;;  %v325_v40 = vld [vmem:[%s2208_s28 + $0xe0] sm:$0xf]  ;;  %v327_v41 = vld [vmem:[%s2208_s28 + $0xe8] sm:$0xf] }
  0x4a   : > { %324 = vst [vmem:[%s2213_s10 + $0x6c] sm:$0xf] %v323_v39  ;;  %326 = vst [vmem:[%s2213_s10 + $0x70] sm:$0xf] %v325_v40  ;;  %v329_v42 = vld [vmem:[%s2208_s28 + $0xf0] sm:$0xf] }
  0x4b   : > { %328 = vst [vmem:[%s2213_s10 + $0x74] sm:$0xf] %v327_v41  ;;  %v331_v43 = vld [vmem:[%s2208_s28 + $0xf8] sm:$0xf]  ;;  %v333_v44 = vld [vmem:[%s2208_s28 + $0x100] sm:$0xf] }
  0x4c   : > { %330 = vst [vmem:[%s2213_s10 + $0x78] sm:$0xf] %v329_v42  ;;  %332 = vst [vmem:[%s2213_s10 + $0x7c] sm:$0xf] %v331_v43  ;;  %v335_v45 = vld [vmem:[%s2208_s28 + $0x108] sm:$0xf] }
  0x4d   : > { %334 = vst [vmem:[%s2213_s10 + $0x80] sm:$0xf] %v333_v44  ;;  %v337_v46 = vld [vmem:[%s2208_s28 + $0x110] sm:$0xf]  ;;  %v339_v47 = vld [vmem:[%s2208_s28 + $0x118] sm:$0xf] }
  0x4e   : > { %336 = vst [vmem:[%s2213_s10 + $0x84] sm:$0xf] %v335_v45  ;;  %338 = vst [vmem:[%s2213_s10 + $0x88] sm:$0xf] %v337_v46  ;;  %v341_v48 = vld [vmem:[%s2208_s28 + $0x120] sm:$0xf] }
  0x4f   : > { %340 = vst [vmem:[%s2213_s10 + $0x8c] sm:$0xf] %v339_v47  ;;  %v343_v49 = vld [vmem:[%s2208_s28 + $0x128] sm:$0xf]  ;;  %v345_v50 = vld [vmem:[%s2208_s28 + $0x130] sm:$0xf] }
  0x50   : > { %342 = vst [vmem:[%s2213_s10 + $0x90] sm:$0xf] %v341_v48  ;;  %344 = vst [vmem:[%s2213_s10 + $0x94] sm:$0xf] %v343_v49  ;;  %v347_v51 = vld [vmem:[%s2208_s28 + $0x138] sm:$0xf] }
  0x51   : > { %346 = vst [vmem:[%s2213_s10 + $0x98] sm:$0xf] %v345_v50  ;;  %v349_v52 = vld [vmem:[%s2208_s28 + $0x140] sm:$0xf]  ;;  %v351_v53 = vld [vmem:[%s2208_s28 + $0x148] sm:$0xf] }
  0x52   : > { %348 = vst [vmem:[%s2213_s10 + $0x9c] sm:$0xf] %v347_v51  ;;  %350 = vst [vmem:[%s2213_s10 + $0xa0] sm:$0xf] %v349_v52  ;;  %v353_v54 = vld [vmem:[%s2208_s28 + $0x150] sm:$0xf] }
  0x53   : > { %352 = vst [vmem:[%s2213_s10 + $0xa4] sm:$0xf] %v351_v53  ;;  %v355_v55 = vld [vmem:[%s2208_s28 + $0x158] sm:$0xf]  ;;  %v357_v56 = vld [vmem:[%s2208_s28 + $0x160] sm:$0xf] }
  0x54   : > { %354 = vst [vmem:[%s2213_s10 + $0xa8] sm:$0xf] %v353_v54  ;;  %356 = vst [vmem:[%s2213_s10 + $0xac] sm:$0xf] %v355_v55  ;;  %v359_v57 = vld [vmem:[%s2208_s28 + $0x168] sm:$0xf] }
  0x55   : > { %358 = vst [vmem:[%s2213_s10 + $0xb0] sm:$0xf] %v357_v56  ;;  %v361_v58 = vld [vmem:[%s2208_s28 + $0x170] sm:$0xf]  ;;  %v363_v59 = vld [vmem:[%s2208_s28 + $0x178] sm:$0xf] }
  0x56   : > { %360 = vst [vmem:[%s2213_s10 + $0xb4] sm:$0xf] %v359_v57  ;;  %362 = vst [vmem:[%s2213_s10 + $0xb8] sm:$0xf] %v361_v58  ;;  %v365_v60 = vld [vmem:[%s2208_s28 + $0x180] sm:$0xf] }
  0x57   : > { %364 = vst [vmem:[%s2213_s10 + $0xbc] sm:$0xf] %v363_v59  ;;  %v367_v61 = vld [vmem:[%s2208_s28 + $0x188] sm:$0xf]  ;;  %v369_v62 = vld [vmem:[%s2208_s28 + $0x190] sm:$0xf] }
  0x58   : > { %366 = vst [vmem:[%s2213_s10 + $0xc0] sm:$0xf] %v365_v60  ;;  %368 = vst [vmem:[%s2213_s10 + $0xc4] sm:$0xf] %v367_v61  ;;  %v371_v63 = vld [vmem:[%s2208_s28 + $0x198] sm:$0xf] }
  0x59   : > { %370 = vst [vmem:[%s2213_s10 + $0xc8] sm:$0xf] %v369_v62  ;;  %v373_v0 = vld [vmem:[%s2208_s28 + $0x1a0] sm:$0xf]  ;;  %v375_v1 = vld [vmem:[%s2208_s28 + $0x1a8] sm:$0xf] }
  0x5a   : > { %372 = vst [vmem:[%s2213_s10 + $0xcc] sm:$0xf] %v371_v63  ;;  %374 = vst [vmem:[%s2213_s10 + $0xd0] sm:$0xf] %v373_v0  ;;  %v377_v2 = vld [vmem:[%s2208_s28 + $0x1b0] sm:$0xf] }
  0x5b   : > { %376 = vst [vmem:[%s2213_s10 + $0xd4] sm:$0xf] %v375_v1  ;;  %v379_v3 = vld [vmem:[%s2208_s28 + $0x1b8] sm:$0xf]  ;;  %v381_v4 = vld [vmem:[%s2208_s28 + $0x1c0] sm:$0xf] }
  0x5c   : > { %378 = vst [vmem:[%s2213_s10 + $0xd8] sm:$0xf] %v377_v2  ;;  %380 = vst [vmem:[%s2213_s10 + $0xdc] sm:$0xf] %v379_v3  ;;  %v383_v5 = vld [vmem:[%s2208_s28 + $0x1c8] sm:$0xf] }
  0x5d   : > { %382 = vst [vmem:[%s2213_s10 + $0xe0] sm:$0xf] %v381_v4  ;;  %v385_v6 = vld [vmem:[%s2208_s28 + $0x1d0] sm:$0xf]  ;;  %v387_v7 = vld [vmem:[%s2208_s28 + $0x1d8] sm:$0xf] }
  0x5e   : > { %384 = vst [vmem:[%s2213_s10 + $0xe4] sm:$0xf] %v383_v5  ;;  %386 = vst [vmem:[%s2213_s10 + $0xe8] sm:$0xf] %v385_v6  ;;  %v389_v8 = vld [vmem:[%s2208_s28 + $0x1e0] sm:$0xf] }
  0x5f   : > { %388 = vst [vmem:[%s2213_s10 + $0xec] sm:$0xf] %v387_v7  ;;  %v391_v9 = vld [vmem:[%s2208_s28 + $0x1e8] sm:$0xf]  ;;  %v393_v10 = vld [vmem:[%s2208_s28 + $0x1f0] sm:$0xf] }
  0x60   : > { %390 = vst [vmem:[%s2213_s10 + $0xf0] sm:$0xf] %v389_v8  ;;  %392 = vst [vmem:[%s2213_s10 + $0xf4] sm:$0xf] %v391_v9  ;;  %v395_v11 = vld [vmem:[%s2208_s28 + $0x1f8] sm:$0xf] }
  0x61   : > { %394 = vst [vmem:[%s2213_s10 + $0xf8] sm:$0xf] %v393_v10  ;;  %v397_v12 = vld [vmem:[%s2208_s28 + $0x200] sm:$0xf]  ;;  %v399_v13 = vld [vmem:[%s2208_s28 + $0x208] sm:$0xf] }
  0x62   : > { %396 = vst [vmem:[%s2213_s10 + $0xfc] sm:$0xf] %v395_v11  ;;  %398 = vst [vmem:[%s2213_s10 + $0x100] sm:$0xf] %v397_v12  ;;  %v401_v14 = vld [vmem:[%s2208_s28 + $0x210] sm:$0xf] }
  0x63   : > { %400 = vst [vmem:[%s2213_s10 + $0x104] sm:$0xf] %v399_v13  ;;  %v403_v15 = vld [vmem:[%s2208_s28 + $0x218] sm:$0xf]  ;;  %v405_v16 = vld [vmem:[%s2208_s28 + $0x220] sm:$0xf] }
  0x64   : > { %402 = vst [vmem:[%s2213_s10 + $0x108] sm:$0xf] %v401_v14  ;;  %404 = vst [vmem:[%s2213_s10 + $0x10c] sm:$0xf] %v403_v15  ;;  %v407_v17 = vld [vmem:[%s2208_s28 + $0x228] sm:$0xf] }
  0x65   : > { %406 = vst [vmem:[%s2213_s10 + $0x110] sm:$0xf] %v405_v16  ;;  %v409_v18 = vld [vmem:[%s2208_s28 + $0x230] sm:$0xf]  ;;  %v411_v19 = vld [vmem:[%s2208_s28 + $0x238] sm:$0xf] }
  0x66   : > { %408 = vst [vmem:[%s2213_s10 + $0x114] sm:$0xf] %v407_v17  ;;  %410 = vst [vmem:[%s2213_s10 + $0x118] sm:$0xf] %v409_v18  ;;  %v413_v20 = vld [vmem:[%s2208_s28 + $0x240] sm:$0xf] }
  0x67   : > { %412 = vst [vmem:[%s2213_s10 + $0x11c] sm:$0xf] %v411_v19  ;;  %v415_v21 = vld [vmem:[%s2208_s28 + $0x248] sm:$0xf]  ;;  %v417_v22 = vld [vmem:[%s2208_s28 + $0x250] sm:$0xf] }
  0x68   : > { %414 = vst [vmem:[%s2213_s10 + $0x120] sm:$0xf] %v413_v20  ;;  %416 = vst [vmem:[%s2213_s10 + $0x124] sm:$0xf] %v415_v21  ;;  %v419_v23 = vld [vmem:[%s2208_s28 + $0x258] sm:$0xf] }
  0x69   : > { %418 = vst [vmem:[%s2213_s10 + $0x128] sm:$0xf] %v417_v22  ;;  %v421_v24 = vld [vmem:[%s2208_s28 + $0x260] sm:$0xf]  ;;  %v423_v25 = vld [vmem:[%s2208_s28 + $0x268] sm:$0xf] }
  0x6a   : > { %420 = vst [vmem:[%s2213_s10 + $0x12c] sm:$0xf] %v419_v23  ;;  %422 = vst [vmem:[%s2213_s10 + $0x130] sm:$0xf] %v421_v24  ;;  %v425_v26 = vld [vmem:[%s2208_s28 + $0x270] sm:$0xf] }
  0x6b   : > { %424 = vst [vmem:[%s2213_s10 + $0x134] sm:$0xf] %v423_v25  ;;  %v427_v27 = vld [vmem:[%s2208_s28 + $0x278] sm:$0xf]  ;;  %v429_v28 = vld [vmem:[%s2208_s28 + $0x280] sm:$0xf] }
  0x6c   : > { %426 = vst [vmem:[%s2213_s10 + $0x138] sm:$0xf] %v425_v26  ;;  %428 = vst [vmem:[%s2213_s10 + $0x13c] sm:$0xf] %v427_v27  ;;  %v431_v29 = vld [vmem:[%s2208_s28 + $0x288] sm:$0xf] }
  0x6d   : > { %430 = vst [vmem:[%s2213_s10 + $0x140] sm:$0xf] %v429_v28  ;;  %v433_v30 = vld [vmem:[%s2208_s28 + $0x290] sm:$0xf]  ;;  %v435_v31 = vld [vmem:[%s2208_s28 + $0x298] sm:$0xf] }
  0x6e   : > { %432 = vst [vmem:[%s2213_s10 + $0x144] sm:$0xf] %v431_v29  ;;  %434 = vst [vmem:[%s2213_s10 + $0x148] sm:$0xf] %v433_v30  ;;  %v437_v32 = vld [vmem:[%s2208_s28 + $0x2a0] sm:$0xf] }
  0x6f   : > { %436 = vst [vmem:[%s2213_s10 + $0x14c] sm:$0xf] %v435_v31  ;;  %v439_v33 = vld [vmem:[%s2208_s28 + $0x2a8] sm:$0xf]  ;;  %v441_v34 = vld [vmem:[%s2208_s28 + $0x2b0] sm:$0xf] }
  0x70   : > { %438 = vst [vmem:[%s2213_s10 + $0x150] sm:$0xf] %v437_v32  ;;  %440 = vst [vmem:[%s2213_s10 + $0x154] sm:$0xf] %v439_v33  ;;  %v443_v35 = vld [vmem:[%s2208_s28 + $0x2b8] sm:$0xf] }
  0x71   : > { %442 = vst [vmem:[%s2213_s10 + $0x158] sm:$0xf] %v441_v34  ;;  %v445_v36 = vld [vmem:[%s2208_s28 + $0x2c0] sm:$0xf]  ;;  %v447_v37 = vld [vmem:[%s2208_s28 + $0x2c8] sm:$0xf] }
  0x72   : > { %444 = vst [vmem:[%s2213_s10 + $0x15c] sm:$0xf] %v443_v35  ;;  %446 = vst [vmem:[%s2213_s10 + $0x160] sm:$0xf] %v445_v36  ;;  %v449_v38 = vld [vmem:[%s2208_s28 + $0x2d0] sm:$0xf] }
  0x73   : > { %448 = vst [vmem:[%s2213_s10 + $0x164] sm:$0xf] %v447_v37  ;;  %v451_v39 = vld [vmem:[%s2208_s28 + $0x2d8] sm:$0xf]  ;;  %v453_v40 = vld [vmem:[%s2208_s28 + $0x2e0] sm:$0xf] }
  0x74   : > { %450 = vst [vmem:[%s2213_s10 + $0x168] sm:$0xf] %v449_v38  ;;  %452 = vst [vmem:[%s2213_s10 + $0x16c] sm:$0xf] %v451_v39  ;;  %v455_v41 = vld [vmem:[%s2208_s28 + $0x2e8] sm:$0xf] }
  0x75   : > { %454 = vst [vmem:[%s2213_s10 + $0x170] sm:$0xf] %v453_v40  ;;  %v457_v42 = vld [vmem:[%s2208_s28 + $0x2f0] sm:$0xf]  ;;  %v459_v43 = vld [vmem:[%s2208_s28 + $0x2f8] sm:$0xf] }
  0x76   : > { %456 = vst [vmem:[%s2213_s10 + $0x174] sm:$0xf] %v455_v41  ;;  %458 = vst [vmem:[%s2213_s10 + $0x178] sm:$0xf] %v457_v42 }
  0x77   : > { %460 = vst [vmem:[%s2213_s10 + $0x17c] sm:$0xf] %v459_v43 }
  0x78 PF: > { %p1651_p0 = scmp.ge.s32.totalorder %s2066_s25, 1  ;;  %p675_p1 = scmp.lt.s32.totalorder %s2066_s25, 7 }
  0x7a   : > { %p676_p2 = pnand %p1651_p0, %p675_p1 }
  0x7b   : > { %s682_s0 = sand.u32 (!%p676_p2), 1, %s2042_s19   ;;  %s689_s11 = sand.u32 (!%p676_p2), 1, %s2034_s17  }
  0x7c   : > { %679 = sbr.rel (%p676_p2) target bundleno = 443 (0x1bb), region = 84  ;;  %s710_s28 = sand.u32 (!%p676_p2), 1, %s2026_s15  }
  0x7d   : > { %s1823_s26 = smul.u32 (!%p676_p2), 96, %s682_s0  ;;  %s1652_s29 = sshll.u32 (!%p676_p2), %s710_s28, 5 }
  0x7e   : > { %s1824_s5 = smul.u32 (!%p676_p2), 384, %s689_s11  ;;  %p737_p3 = scmp.lt.s32.totalorder (!%p676_p2), %s2054_s22, 1 }
  0x7f   : > { %s2421_s24 = scalar_lea.vmem (!%p676_p2), [#allocation3], %s1823_s26  ;;  %s2425_s15 = scalar_lea.vmem (!%p676_p2), [#allocation5], %s1652_s29 }
  0x80   : > { %s2423_s17 = scalar_lea.vmem (!%p676_p2), [#allocation4], %s1824_s5  ;;  %p1653_p4 = scmp.ne.s32.totalorder (!%p676_p2), %s2050_s21, 0 }
  0x81   : > { %s2411_s30 = scalar_select %p737_p3, %s2054_s22, 1 }
  0x82   : > { %753 = sbr.rel (%p1653_p4) target bundleno = 138 (0x8a), region = 96 }
  0x83   : > { %s741_s9 = scalar_lea.vmem %s2549_s3, %s2411_s30  ;;  %s748_s27 = scalar_lea.vmem %s2550_s4, %s2411_s30 }
  0x87   : > { %v2068_v44 = vmov 0.0  }
  0x88   : > { %754 = vst [vmem:[#allocation2 + $0x10] sm:$0xff] %v2068_v44  ;;  %755 = vst [vmem:[#allocation2] sm:$0xff] %v2068_v44 }
  0x89   : > { %756 = vst [vmem:[#allocation2 + $0x18] sm:$0xff] %v2068_v44  ;;  %757 = vst [vmem:[#allocation2 + $0x8] sm:$0xff] %v2068_v44 }
  0x8a PF: > { %v1914_v45 = vld [vmem:[%s2423_s17 + $0x78] sm:$0xff]   ;;  %v1918_v49 = vld [vmem:[%s2423_s17 + $0x70] sm:$0xff]   ;;  %v1922_v53 = vld [vmem:[%s2423_s17 + $0x68] sm:$0xff]   ;;  %p1714_p5 = scmp.ne.s32.totalorder %s2050_s21, 2 }
  0x8b   : > { %v1915_v46 = vld [vmem:[%s2423_s17 + $0xf8] sm:$0xff]   ;;  %1721 = vmatprep.subr.bf16.mxu0 %v1914_v45  ;;  %v1919_v50 = vld [vmem:[%s2423_s17 + $0xf0] sm:$0xff]   ;;  %v1923_v54 = vld [vmem:[%s2423_s17 + $0xe8] sm:$0xff]  }
  0x8c   : > { %v1916_v47 = vld [vmem:[%s2423_s17 + $0x38] sm:$0xff]   ;;  %1749 = vmatprep.subr.bf16.mxu1 %v1915_v46  ;;  %v1920_v51 = vld [vmem:[%s2423_s17 + $0x30] sm:$0xff]   ;;  %v1924_v55 = vld [vmem:[%s2423_s17 + $0x28] sm:$0xff]  }
  0x8d   : > { %v1917_v48 = vld [vmem:[%s2423_s17 + $0xb8] sm:$0xff]   ;;  %1722 = vmatpush3.bf16.msra.mxu0 %v1916_v47  ;;  %v1921_v52 = vld [vmem:[%s2423_s17 + $0xb0] sm:$0xff]   ;;  %v1925_v56 = vld [vmem:[%s2423_s17 + $0xa8] sm:$0xff]  }
  0x8e   : > { %1750 = vmatpush3.bf16.msra.mxu1 %v1917_v48  ;;  %1723 = vmatprep.subr.bf16.mxu0 %v1918_v49  ;;  %v1926_v57 = vld [vmem:[%s2423_s17 + $0x60] sm:$0xff]   ;;  %v1930_v61 = vld [vmem:[%s2423_s17 + $0x58] sm:$0xff]   ;;  %v1934_v1 = vld [vmem:[%s2423_s17 + $0x50] sm:$0xff]  }
  0x8f   : > { %1751 = vmatprep.subr.bf16.mxu1 %v1919_v50  ;;  %v1927_v58 = vld [vmem:[%s2423_s17 + $0xe0] sm:$0xff]   ;;  %v1931_v62 = vld [vmem:[%s2423_s17 + $0xd8] sm:$0xff]   ;;  %v1935_v2 = vld [vmem:[%s2423_s17 + $0xd0] sm:$0xff]  }
  0x90   : > { %v1928_v59 = vld [vmem:[%s2423_s17 + $0x20] sm:$0xff]   ;;  %v1932_v63 = vld [vmem:[%s2423_s17 + $0x18] sm:$0xff]   ;;  %v1936_v3 = vld [vmem:[%s2423_s17 + $0x10] sm:$0xff]  }
  0x91   : > { %1724 = vmatpush3.bf16.msra.mxu0 %v1920_v51  ;;  %v1929_v60 = vld [vmem:[%s2423_s17 + $0xa0] sm:$0xff]   ;;  %v1933_v0 = vld [vmem:[%s2423_s17 + $0x98] sm:$0xff]   ;;  %v1937_v4 = vld [vmem:[%s2423_s17 + $0x90] sm:$0xff]  }
  0x92   : > { %1752 = vmatpush3.bf16.msra.mxu1 %v1921_v52  ;;  %1725 = vmatprep.subr.bf16.mxu0 %v1922_v53  ;;  %v1938_v5 = vld [vmem:[%s2423_s17 + $0x48] sm:$0xff]   ;;  %v1942_v9 = vld [vmem:[%s2423_s17 + $0x40] sm:$0xff]   ;;  %v1952_v17 = vld [vmem:[%s2423_s17 + $0x178] sm:$0xff]  }
  0x93   : > { %1753 = vmatprep.subr.bf16.mxu1 %v1923_v54  ;;  %v1939_v6 = vld [vmem:[%s2423_s17 + $0xc8] sm:$0xff]   ;;  %v1943_v10 = vld [vmem:[%s2423_s17 + $0xc0] sm:$0xff]   ;;  %v1953_v18 = vld [vmem:[%s2423_s17 + $0x138] sm:$0xff]  }
  0x94   : > { %v1940_v7 = vld [vmem:[%s2423_s17 + $0x8] sm:$0xff]   ;;  %v1944_v11 = vld [vmem:[%s2423_s17] sm:$0xff]   ;;  %v1954_v19 = vld [vmem:[%s2423_s17 + $0x170] sm:$0xff]  }
  0x95   : > { %1726 = vmatpush3.bf16.msra.mxu0 %v1924_v55  ;;  %v1941_v8 = vld [vmem:[%s2423_s17 + $0x88] sm:$0xff]   ;;  %v1945_v12 = vld [vmem:[%s2423_s17 + $0x80] sm:$0xff]   ;;  %v1955_v20 = vld [vmem:[%s2423_s17 + $0x130] sm:$0xff]  }
  0x96   : > { %1754 = vmatpush3.bf16.msra.mxu1 %v1925_v56  ;;  %1727 = vmatprep.subr.bf16.mxu0 %v1926_v57  ;;  %v1946_v13 = vld [vmem:[%s2421_s24] ss:$24 sps:$4 sm:$0xff]   ;;  %v1948_v14 = vld [vmem:[%s2421_s24 + $0x4] ss:$24 sps:$4 sm:$0xff]   ;;  %v1956_v21 = vld [vmem:[%s2423_s17 + $0x168] sm:$0xff]  }
  0x97   : > { %1755 = vmatprep.subr.bf16.mxu1 %v1927_v58  ;;  %v1949_v15 = vld [vmem:[%s2421_s24 + $0x8] ss:$24 sps:$4 sm:$0xff]   ;;  %v1951_v16 = vld [vmem:[%s2421_s24 + $0xc] ss:$24 sps:$4 sm:$0xff]   ;;  %1250 = vmatprep.mubr.bf16.mxu0 %v1948_v14  ;;  %v1963_v26 = vld [vmem:[%s2421_s24 + $0x3c] ss:$24 sps:$4 sm:$0xff]  }
  0x98   : > { %1299 = vmatprep.mubr.bf16.mxu1 %v1951_v16  ;;  %v1957_v22 = vld [vmem:[%s2423_s17 + $0x128] sm:$0xff]   ;;  %v1958_v23 = vld [vmem:[%s2423_s17 + $0x160] sm:$0xff]   ;;  %v1960_v27 = vld [vmem:[%s2423_s17 + $0x158] sm:$0xff]  }
  0x99   : > { %1728 = vmatpush3.bf16.msra.mxu0 %v1928_v59  ;;  %v1959_v24 = vld [vmem:[%s2423_s17 + $0x120] sm:$0xff]   ;;  %v1961_v25 = vld [vmem:[%s2421_s24 + $0x34] ss:$24 sps:$4 sm:$0xff]   ;;  %v1966_v28 = vld [vmem:[%s2421_s24 + $0x30] ss:$24 sps:$4 sm:$0xff]  }
  0x9a   : > { %1756 = vmatpush3.bf16.msra.mxu1 %v1929_v60  ;;  %1729 = vmatprep.subr.bf16.mxu0 %v1930_v61  ;;  %v1967_v29 = vld [vmem:[%s2421_s24 + $0x38] ss:$24 sps:$4 sm:$0xff]   ;;  %v1976_v33 = vld [vmem:[%s2421_s24 + $0x14] ss:$24 sps:$4 sm:$0xff]   ;;  %v1979_v35 = vld [vmem:[%s2421_s24 + $0x44] ss:$24 sps:$4 sm:$0xff]  }
  0x9b   : > { %1757 = vmatprep.subr.bf16.mxu1 %v1931_v62  ;;  %v1965_v30 = vld [vmem:[%s2423_s17 + $0x118] sm:$0xff]   ;;  %v1968_v31 = vld [vmem:[%s2423_s17 + $0x150] sm:$0xff]   ;;  %v1970_v34 = vld [vmem:[%s2423_s17 + $0x148] sm:$0xff]  }
  0x9c   : > { %v1969_v32 = vld [vmem:[%s2423_s17 + $0x110] sm:$0xff]   ;;  %v1971_v36 = vld [vmem:[%s2423_s17 + $0x108] sm:$0xff]   ;;  %v1972_v37 = vld [vmem:[%s2423_s17 + $0x140] sm:$0xff]  }
  0x9d   : > { %1730 = vmatpush3.bf16.msra.mxu0 %v1932_v63  ;;  %v1973_v38 = vld [vmem:[%s2423_s17 + $0x100] sm:$0xff]   ;;  %v1974_v39 = vld [vmem:[%s2421_s24 + $0x10] ss:$24 sps:$4 sm:$0xff]  }
  0x9e   : > { %1758 = vmatpush3.bf16.msra.mxu1 %v1933_v0  ;;  %1731 = vmatprep.subr.bf16.mxu0 %v1934_v1  ;;  %v1977_v40 = vld [vmem:[%s2421_s24 + $0x40] ss:$24 sps:$4 sm:$0xff]  }
  0x9f   : > { %1759 = vmatprep.subr.bf16.mxu1 %v1935_v2 }
  0xa1   : > { %1732 = vmatpush3.bf16.msra.mxu0 %v1936_v3 }
  0xa2   : > { %1760 = vmatpush3.bf16.msra.mxu1 %v1937_v4  ;;  %1733 = vmatprep.subr.bf16.mxu0 %v1938_v5 }
  0xa3   : > { %1761 = vmatprep.subr.bf16.mxu1 %v1939_v6 }
  0xa5   : > { %1734 = vmatpush3.bf16.msra.mxu0 %v1940_v7 }
  0xa6   : > { %1762 = vmatpush3.bf16.msra.mxu1 %v1941_v8  ;;  %1735 = vmatprep.subr.bf16.mxu0 %v1942_v9  ;;  %v758_v8 = vld [vmem:[#allocation2 + $0x10] sm:$0xff] }
  0xa7   : > { %1763 = vmatprep.subr.bf16.mxu1 %v1943_v10 }
  0xa9   : > { %1736 = vmatpush3.bf16.msra.mxu0 %v1944_v11 }
  0xaa   : > { %1764 = vmatpush3.bf16.msra.mxu1 %v1945_v12  ;;  %1777 = vmatprep.subr.bf16.mxu0 %v1952_v17  ;;  %v760_v12 = vld [vmem:[#allocation2 + $0x18] sm:$0xff] }
  0xab   : > { %1805 = vmatprep.subr.bf16.mxu1 %v1952_v17 }
  0xac   : > { %1251 = vmatmul.mubr.bf16.vlgmr.msra.gmra.mxu0 %v1946_v13 }
  0xad   : > { %1300 = vmatmul.mubr.bf16.vlgmr.msra.gmra.mxu1 %v1949_v15  ;;  %1778 = vmatpush3.bf16.msra.mxu0 %v1953_v18 }
  0xae   : > { %1813 = vmatpush3.bf16.msra.mxu1 %v1953_v18  ;;  %1779 = vmatprep.subr.bf16.mxu0 %v1954_v19 }
  0xaf   : > { %1806 = vmatprep.subr.bf16.mxu1 %v1954_v19  ;;  %1258 = vmatprep.mubr.bf16.mxu0 %v1961_v25  ;;  %v761_v25 = vld [vmem:[#allocation2 + $0x8] sm:$0xff] }
  0xb0   : > { %1307 = vmatprep.mubr.bf16.mxu1 %v1963_v26 }
  0xb1   : > { %1780 = vmatpush3.bf16.msra.mxu0 %v1955_v20 }
  0xb2   : > { %1814 = vmatpush3.bf16.msra.mxu1 %v1955_v20  ;;  %1781 = vmatprep.subr.bf16.mxu0 %v1956_v21 }
  0xb3   : > { %1807 = vmatprep.subr.bf16.mxu1 %v1956_v21 }
  0xb4   : > { %1259 = vmatmul.mubr.bf16.gmra.mxu0 %v1966_v28 }
  0xb5   : > { %1782 = vmatpush3.bf16.msra.mxu0 %v1957_v22  ;;  %1308 = vmatmul.mubr.bf16.gmra.mxu1 %v1967_v29 }
  0xb6   : > { %1815 = vmatpush3.bf16.msra.mxu1 %v1957_v22  ;;  %1783 = vmatprep.subr.bf16.mxu0 %v1958_v23  ;;  %v759_v22 = vld [vmem:[#allocation2] sm:$0xff] }
  0xb7   : > { %1808 = vmatprep.subr.bf16.mxu1 %v1958_v23  ;;  %1348 = vmatprep.mubr.bf16.mxu0 %v1976_v33 }
  0xb8   : > { %1356 = vmatprep.mubr.bf16.mxu1 %v1979_v35 }
  0xb9   : > { %1784 = vmatpush3.bf16.msra.mxu0 %v1959_v24 }
  0xba   : > { %1816 = vmatpush3.bf16.msra.mxu1 %v1959_v24  ;;  %1785 = vmatprep.subr.bf16.mxu0 %v1960_v27 }
  0xbb   : > { %1809 = vmatprep.subr.bf16.mxu1 %v1960_v27 }
  0xbd   : > { %1786 = vmatpush3.bf16.msra.mxu0 %v1965_v30 }
  0xbe   : > { %1817 = vmatpush3.bf16.msra.mxu1 %v1965_v30  ;;  %1787 = vmatprep.subr.bf16.mxu0 %v1968_v31 }
  0xbf   : > { %1810 = vmatprep.subr.bf16.mxu1 %v1968_v31 }
  0xc1   : > { %1788 = vmatpush3.bf16.msra.mxu0 %v1969_v32 }
  0xc2   : > { %1818 = vmatpush3.bf16.msra.mxu1 %v1969_v32  ;;  %1789 = vmatprep.subr.bf16.mxu0 %v1970_v34 }
  0xc3   : > { %1811 = vmatprep.subr.bf16.mxu1 %v1970_v34 }
  0xc5   : > { %1790 = vmatpush3.bf16.msra.mxu0 %v1971_v36 }
  0xc6   : > { %1819 = vmatpush3.bf16.msra.mxu1 %v1971_v36  ;;  %1791 = vmatprep.subr.bf16.mxu0 %v1972_v37 }
  0xc7   : > { %1812 = vmatprep.subr.bf16.mxu1 %v1972_v37 }
  0xc9   : > { %1792 = vmatpush3.bf16.msra.mxu0 %v1973_v38 }
  0xca   : > { %1820 = vmatpush3.bf16.msra.mxu1 %v1973_v38 }
  0xcc   : > { %1349 = vmatmul.mubr.bf16.vlgmr.msra.gmra.mxu0 %v1974_v39 }
  0xcd   : > { %1357 = vmatmul.mubr.bf16.vlgmr.msra.gmra.mxu1 %v1977_v40 }
 0x16c   : > { %v1737_v41 = vpop.f32.mrf.mxu0 }
 0x16d   : > { %v1765_v42 = vpop.f32.mrf.mxu1 }
 0x16e   : > { %v1738_v43 = vpop.f32.mrf.mxu0 }
 0x16f   : > { %v1766_v44 = vpop.f32.mrf.mxu1  ;;  %v1739_v56 = vadd.f32 %v1738_v43, %v1737_v41 }
 0x170   : > { %v1740_v45 = vpop.f32.mrf.mxu0  ;;  %v1767_v57 = vadd.f32 %v1766_v44, %v1765_v42 }
 0x171   : > { %v1768_v46 = vpop.f32.mrf.mxu1 }
 0x172   : > { %v1741_v47 = vpop.f32.mrf.mxu0  ;;  %v1302_v0 = vadd.f32 %v1767_v57, %v1739_v56 }
 0x173   : > { %v1769_v48 = vpop.f32.mrf.mxu1  ;;  %v1742_v1 = vadd.f32 %v1741_v47, %v1740_v45 }
 0x174   : > { %v1743_v49 = vpop.f32.mrf.mxu0  ;;  %v1770_v2 = vadd.f32 %v1769_v48, %v1768_v46 }
 0x175   : > { %v1771_v50 = vpop.f32.mrf.mxu1 }
 0x176   : > { %v1744_v51 = vpop.f32.mrf.mxu0  ;;  %v1305_v16 = vadd.f32 %v1770_v2, %v1742_v1 }
 0x177   : > { %v1772_v52 = vpop.f32.mrf.mxu1  ;;  %v1745_v59 = vadd.f32 %v1744_v51, %v1743_v49 }
 0x178   : > { %v1746_v53 = vpop.f32.mrf.mxu0  ;;  %v1773_v60 = vadd.f32 %v1772_v52, %v1771_v50 }
 0x179   : > { %v1774_v54 = vpop.f32.mrf.mxu1 }
 0x17a   : > { %v1747_v55 = vpop.f32.mrf.mxu0  ;;  %v1310_v5 = vadd.f32 %v1773_v60, %v1745_v59 }
 0x17b   : > { %v1775_v58 = vpop.f32.mrf.mxu1  ;;  %v1748_v6 = vadd.f32 %v1747_v55, %v1746_v53 }
 0x17c   : > { %v1776_v7 = vadd.f32 %v1775_v58, %v1774_v54 }
 0x17e   : > { %v1313_v20 = vadd.f32 %v1776_v7, %v1748_v6 }
 0x18c   : > { %v1793_v61 = vpop.f32.mrf.mxu0 }
 0x18d   : > { %v1799_v62 = vpop.f32.mrf.mxu1 }
 0x18e   : > { %v1794_v63 = vpop.f32.mrf.mxu0 }
 0x18f   : > { %v1795_v3 = vadd.f32 %v1794_v63, %v1793_v61  ;;  %v1800_v4 = vpop.f32.mrf.mxu1 }
 0x190   : > { %v1801_v9 = vadd.f32 %v1800_v4, %v1799_v62  ;;  %v1796_v10 = vpop.f32.mrf.mxu0 }
 0x191   : > { %v1351_v11 = vadd.f32 %v1795_v3, %v1302_v0  ;;  %v1802_v13 = vpop.f32.mrf.mxu1 }
 0x192   : > { %v1359_v14 = vadd.f32 %v1801_v9, %v1310_v5  ;;  %v1797_v15 = vpop.f32.mrf.mxu0 }
 0x193   : > { %v1365_v17 = vadd.f32 %v1351_v11, %v758_v8  ;;  %v1798_v18 = vadd.f32 %v1797_v15, %v1796_v10  ;;  %v1803_v19 = vpop.f32.mrf.mxu1 }
 0x194   : > { %v1367_v21 = vadd.f32 %v1359_v14, %v760_v12  ;;  %v1804_v23 = vadd.f32 %v1803_v19, %v1802_v13 }
 0x195   : > { %1369 = vst [vmem:[#allocation2 + $0x10] sm:$0xff] %v1365_v17  ;;  %v1354_v24 = vadd.f32 %v1798_v18, %v1305_v16 }
 0x196   : > { %1371 = vst [vmem:[#allocation2 + $0x18] sm:$0xff] %v1367_v21  ;;  %v1362_v26 = vadd.f32 %v1804_v23, %v1313_v20  ;;  %1376 = sbr.rel (%p1714_p5) target bundleno = 438 (0x1b6), region = 100 }
 0x197   : > { %v1366_v27 = vadd.f32 %v1354_v24, %v759_v22 }
 0x198   : > { %v1368_v28 = vadd.f32 %v1362_v26, %v761_v25 }
 0x199   : > { %1370 = vst [vmem:[#allocation2] sm:$0xff] %v1366_v27 }
 0x19a   : > { %1372 = vst [vmem:[#allocation2 + $0x8] sm:$0xff] %v1368_v28 }
 0x19c   : > { %v1377_v29 = vld [vmem:[#allocation2 + $0x10] sm:$0xff] }
 0x19d   : > { %v1379_v31 = vld [vmem:[#allocation2 + $0x18] sm:$0xff]  ;;  %1381 = vst [vmem:[%s2425_s15] sm:$0xff] %v1377_v29  ;;  %v1395_v32 = vmul.f32 %v1377_v29, %v1377_v29 }
 0x19e   : > { %1383 = vst [vmem:[%s2425_s15 + $0x10] sm:$0xff] %v1379_v31  ;;  %v1397_v35 = vmul.f32 %v1379_v31, %v1379_v31 }
 0x1a0   : > { %v1378_v30 = vld [vmem:[#allocation2] sm:$0xff] }
 0x1a1   : > { %1382 = vst [vmem:[%s2425_s15 + $0x8] sm:$0xff] %v1378_v30  ;;  %v1385_v33 = vadd.f32 %v1378_v30, %v1377_v29  ;;  %v1396_v34 = vmul.f32 %v1378_v30, %v1378_v30  ;;  %v1380_v36 = vld [vmem:[#allocation2 + $0x8] sm:$0xff] }
 0x1a2   : > { %1384 = vst [vmem:[%s2425_s15 + $0x18] sm:$0xff] %v1380_v36  ;;  %v1398_v39 = vmul.f32 %v1380_v36, %v1380_v36 }
 0x1a3   : > { %v1399_v37 = vadd.f32 %v1396_v34, %v1395_v32  ;;  %v1386_v38 = vadd.f32 %v1385_v33, %v1379_v31 }
 0x1a5   : > { %v1400_v40 = vadd.f32 %v1399_v37, %v1397_v35  ;;  %v1387_v41 = vadd.f32 %v1386_v38, %v1380_v36 }
 0x1a7   : > { %v1388_v42 = vrot.slane %v1387_v41, 4  ;;  %v1401_v43 = vadd.f32 %v1400_v40, %v1398_v39 }
 0x1a9   : > { %v1389_v44 = vadd.f32 %v1388_v42, %v1387_v41  ;;  %v1402_v45 = vrot.slane %v1401_v43, 4 }
 0x1ab   : > { %v1390_v46 = vrot.slane %v1389_v44, 2  ;;  %v1403_v47 = vadd.f32 %v1402_v45, %v1401_v43 }
 0x1ad   : > { %v1391_v48 = vadd.f32 %v1390_v46, %v1389_v44  ;;  %v1404_v49 = vrot.slane %v1403_v47, 2 }
 0x1af   : > { %v1392_v50 = vrot.slane %v1391_v48, 1  ;;  %v1405_v51 = vadd.f32 %v1404_v49, %v1403_v47 }
 0x1b1   : > { %v1393_v52 = vadd.f32 %v1392_v50, %v1391_v48  ;;  %v1406_v53 = vrot.slane %v1405_v51, 1 }
 0x1b3   : > { %1394 = vst [vmem:[%s741_s9] sm:$0x1] %v1393_v52  ;;  %v1407_v54 = vadd.f32 %v1406_v53, %v1405_v51 }
 0x1b5   : > { %1408 = vst [vmem:[%s748_s27] sm:$0x1] %v1407_v54 }
 0x1b6 PF: > { %1429 = sbr.rel (!%p2188_p12) target bundleno = 443 (0x1bb), region = 104  ;;  %s1716_s0 = sshll.u32 (%p2188_p12), %s2054_s22, 3  ;;  %v1469_v55 = vld [vmem:[%s2425_s15] sm:$0xff] (%p2188_p12)  ;;  %v1471_v56 = vld [vmem:[%s2425_s15 + $0x8] sm:$0xff] (%p2188_p12)  ;;  %v1473_v57 = vld [vmem:[%s2425_s15 + $0x10] sm:$0xff] (%p2188_p12) }
 0x1b7   : > { %s1434_s28 = scalar_lea.vmem (%p2188_p12), %s2548_s2, %s1716_s0  ;;  %v1475_v58 = vld [vmem:[%s2425_s15 + $0x18] sm:$0xff] (%p2188_p12) }
 0x1b8   : > { %1470 = vst [vmem:[%s1434_s28] sm:$0xff] (%p2188_p12), %v1469_v55  ;;  %1472 = vst [vmem:[%s1434_s28 + $0x10] sm:$0xff] (%p2188_p12), %v1471_v56 }
 0x1b9   : > { %1474 = vst [vmem:[%s1434_s28 + $0x20] sm:$0xff] (%p2188_p12), %v1473_v57  ;;  %1476 = vst [vmem:[%s1434_s28 + $0x30] sm:$0xff] (%p2188_p12), %v1475_v58 }
 0x1bb PF: > { %s15_s25 = sadd.s32 1, %s2066_s25   ;;  %s2564_s22 = sld [smem:[#allocation6_spill]] }
 0x1bc   : > { %p12_p6 = scmp.ge.s32.totalorder %s15_s25, 8   ;;  %s2565_s27 = sld [smem:[#allocation7_spill]] }
 0x1bd   : > { %s2566_s24 = sld [smem:[#allocation8_spill]]  ;;  %s2567_s15 = smov %s2030_s16 }
 0x1be   : > { %s2568_s16 = smov %s2186_s13  ;;  %s2569_s17 = smov %s2038_s18 }
 0x1bf   : > { %s2570_s18 = smov %s2183_s12  ;;  %s2571_s19 = smov %s2046_s20 }
 0x1c0   : > { %s2572_s20 = smov %s2169_s7  ;;  %s2573_s21 = smov %s2058_s23 }
 0x1c1   :  { %14 = sbr.rel (!%p12_p6) target bundleno = 9 (0x9), region = 205 }
 0x1c2   : > { %s2574_s23 = smov %s2565_s27 }

// kernel: rebuild_encoder_forward.30
= control target key start
LH: loop header
LB: loop body
LE: loop exit
PB: predicated region body
PF: predicated region fallthrough
CT: control target
= control target key end

     0   :  { %s2169_s15 = smov 0   ;;  %s2171_s16 = smov 0   ;;  %s2620_s0 = inlined_call_operand.vmem [shape: bf16[8,9216], index: 0, kind: input, shape index: {}]   ;;  %s2621_s1 = inlined_call_operand.vmem [shape: bf16[9216,512], index: 1, kind: input, shape index: {}]   ;;  %s2622_s2 = inlined_call_operand.vmem [shape: f32[8,512], index: 2, kind: output, shape index: {0}]   ;;  %s2623_s3 = inlined_call_operand.vmem [shape: f32[1,1,512], index: 3, kind: output, shape index: {1}]   ;;  %s2624_s4 = inlined_call_operand.vmem [shape: f32[1,1,512], index: 4, kind: output, shape index: {2}]  }
   0x1   :  { %s2173_s17 = smov 0   ;;  %s2175_s18 = smov 0  }
   0x2   :  { %s2177_s19 = smov 0   ;;  %s2179_s20 = smov 0  }
   0x3   :  { %s2181_s21 = smov 0  }
   0x4 LB: > { %s27_s22 = sadd.s32 1, %s2133_s19  ;;  %s30_s23 = sadd.s32 1, %s2137_s20  ;;  %s2141_s21 = sphi %s2181_s21, %s15_s21   ;;  %s2137_s20 = sphi %s2179_s20, %s2630_s20   ;;  %s2133_s19 = sphi %s2177_s19, %s2629_s19   ;;  %s2129_s18 = sphi %s2175_s18, %s2628_s18   ;;  %s2125_s17 = sphi %s2173_s17, %s2627_s17   ;;  %s2121_s16 = sphi %s2171_s16, %s2626_s16   ;;  %s2117_s15 = sphi %s2169_s15, %s2625_s15  }
   0x5   : > { %p28_p0 = scmp.ge.s32.totalorder %s27_s22, 9  ;;  %p78_p1 = scmp.ne.s32.totalorder %s2121_s16, %s2117_s15 }
   0x6   : > { %p79_p2 = scmp.eq.s32.totalorder %s2141_s21, 0  ;;  %s71_s27 = sadd.s32 1, %s2121_s16 }
   0x7   : > { %s2632_s22 = smov (%p28_p0, %s27_s22), 0  ;;  %s2634_s23 = smov (!%p28_p0, %s30_s23), %s2137_s20 }
   0x8   : > { %p80_p3 = por %p79_p2, %p78_p1  ;;  %p32_p4 = scmp.ge.s32.totalorder %s2634_s23, 4 }
   0x9   : > { %s66_s24 = ssub.s32 %s2133_s19, %s2632_s22  ;;  %p1783_p6 = scmp.ge.s32.totalorder %s2141_s21, 36 }
   0xa   : > { %s2636_s23 = smov (%p32_p4, %s2634_s23), 0 }
   0xb   : > { %s67_s25 = ssub.s32 %s2137_s20, %s2636_s23  ;;  %188 = sbr.rel (%p1783_p6) target bundleno = 107 (0x6b), region = 16 }
   0xc   : > { %s68_s26 = sor.u32 %s67_s25, %s66_s24 }
   0xd   : > { %p69_p5 = scmp.eq.s32.totalorder %s68_s26, 0 }
   0xf   : > { %s2220_s28 = scalar_select %p69_p5, %s2121_s16, %s71_s27  }
  0x10   : > { %204 = sbr.rel (!%p80_p3) target bundleno = 107 (0x6b), region = 24  ;;  %s206_s29 = sand.u32 (%p80_p3), 1, %s2121_s16  }
  0x11   : > { %s1869_s30 = sshll.u32 (%p80_p3), %s2133_s19, 9  ;;  %s1784_s5 = sshll.u32 (%p80_p3), %s206_s29, 9 }
  0x12   : > { %s211_s6 = sadd.s32 (%p80_p3), %s2137_s20, %s1869_s30  ;;  %s2234_s11 = scalar_lea.vmem (%p80_p3), [#allocation3], %s1784_s5 }
  0x13   : > { %s1787_s7 = sshll.u32 (%p80_p3), %s211_s6, 2 }
  0x14   : > { %s2229_s10 = scalar_lea.vmem (%p80_p3), %s2621_s1, %s1787_s7 }
  0x15   : > { %v230_v0 = vld [vmem:[%s2229_s10] sm:$0xf]  ;;  %v232_v1 = vld [vmem:[%s2229_s10 + $0x10] sm:$0xf] }
  0x16   : > { %v234_v2 = vld [vmem:[%s2229_s10 + $0x20] sm:$0xf]  ;;  %231 = vst [vmem:[%s2234_s11] sm:$0xf] %v230_v0  ;;  %233 = vst [vmem:[%s2234_s11 + $0x4] sm:$0xf] %v232_v1 }
  0x17   : > { %235 = vst [vmem:[%s2234_s11 + $0x8] sm:$0xf] %v234_v2  ;;  %v236_v3 = vld [vmem:[%s2229_s10 + $0x30] sm:$0xf]  ;;  %v238_v4 = vld [vmem:[%s2229_s10 + $0x40] sm:$0xf] }
  0x18   : > { %v240_v5 = vld [vmem:[%s2229_s10 + $0x50] sm:$0xf]  ;;  %237 = vst [vmem:[%s2234_s11 + $0xc] sm:$0xf] %v236_v3  ;;  %239 = vst [vmem:[%s2234_s11 + $0x10] sm:$0xf] %v238_v4 }
  0x19   : > { %241 = vst [vmem:[%s2234_s11 + $0x14] sm:$0xf] %v240_v5  ;;  %v242_v6 = vld [vmem:[%s2229_s10 + $0x60] sm:$0xf]  ;;  %v244_v7 = vld [vmem:[%s2229_s10 + $0x70] sm:$0xf] }
  0x1a   : > { %v246_v8 = vld [vmem:[%s2229_s10 + $0x80] sm:$0xf]  ;;  %243 = vst [vmem:[%s2234_s11 + $0x18] sm:$0xf] %v242_v6  ;;  %245 = vst [vmem:[%s2234_s11 + $0x1c] sm:$0xf] %v244_v7 }
  0x1b   : > { %247 = vst [vmem:[%s2234_s11 + $0x20] sm:$0xf] %v246_v8  ;;  %v248_v9 = vld [vmem:[%s2229_s10 + $0x90] sm:$0xf]  ;;  %v250_v10 = vld [vmem:[%s2229_s10 + $0xa0] sm:$0xf] }
  0x1c   : > { %v252_v11 = vld [vmem:[%s2229_s10 + $0xb0] sm:$0xf]  ;;  %249 = vst [vmem:[%s2234_s11 + $0x24] sm:$0xf] %v248_v9  ;;  %251 = vst [vmem:[%s2234_s11 + $0x28] sm:$0xf] %v250_v10 }
  0x1d   : > { %253 = vst [vmem:[%s2234_s11 + $0x2c] sm:$0xf] %v252_v11  ;;  %v254_v12 = vld [vmem:[%s2229_s10 + $0xc0] sm:$0xf]  ;;  %v256_v13 = vld [vmem:[%s2229_s10 + $0xd0] sm:$0xf] }
  0x1e   : > { %v258_v14 = vld [vmem:[%s2229_s10 + $0xe0] sm:$0xf]  ;;  %255 = vst [vmem:[%s2234_s11 + $0x30] sm:$0xf] %v254_v12  ;;  %257 = vst [vmem:[%s2234_s11 + $0x34] sm:$0xf] %v256_v13 }
  0x1f   : > { %259 = vst [vmem:[%s2234_s11 + $0x38] sm:$0xf] %v258_v14  ;;  %v260_v15 = vld [vmem:[%s2229_s10 + $0xf0] sm:$0xf]  ;;  %v262_v16 = vld [vmem:[%s2229_s10 + $0x100] sm:$0xf] }
  0x20   : > { %v264_v17 = vld [vmem:[%s2229_s10 + $0x110] sm:$0xf]  ;;  %261 = vst [vmem:[%s2234_s11 + $0x3c] sm:$0xf] %v260_v15  ;;  %263 = vst [vmem:[%s2234_s11 + $0x40] sm:$0xf] %v262_v16 }
  0x21   : > { %265 = vst [vmem:[%s2234_s11 + $0x44] sm:$0xf] %v264_v17  ;;  %v266_v18 = vld [vmem:[%s2229_s10 + $0x120] sm:$0xf]  ;;  %v268_v19 = vld [vmem:[%s2229_s10 + $0x130] sm:$0xf] }
  0x22   : > { %v270_v20 = vld [vmem:[%s2229_s10 + $0x140] sm:$0xf]  ;;  %267 = vst [vmem:[%s2234_s11 + $0x48] sm:$0xf] %v266_v18  ;;  %269 = vst [vmem:[%s2234_s11 + $0x4c] sm:$0xf] %v268_v19 }
  0x23   : > { %271 = vst [vmem:[%s2234_s11 + $0x50] sm:$0xf] %v270_v20  ;;  %v272_v21 = vld [vmem:[%s2229_s10 + $0x150] sm:$0xf]  ;;  %v274_v22 = vld [vmem:[%s2229_s10 + $0x160] sm:$0xf] }
  0x24   : > { %v276_v23 = vld [vmem:[%s2229_s10 + $0x170] sm:$0xf]  ;;  %273 = vst [vmem:[%s2234_s11 + $0x54] sm:$0xf] %v272_v21  ;;  %275 = vst [vmem:[%s2234_s11 + $0x58] sm:$0xf] %v274_v22 }
  0x25   : > { %277 = vst [vmem:[%s2234_s11 + $0x5c] sm:$0xf] %v276_v23  ;;  %v278_v24 = vld [vmem:[%s2229_s10 + $0x180] sm:$0xf]  ;;  %v280_v25 = vld [vmem:[%s2229_s10 + $0x190] sm:$0xf] }
  0x26   : > { %v282_v26 = vld [vmem:[%s2229_s10 + $0x1a0] sm:$0xf]  ;;  %279 = vst [vmem:[%s2234_s11 + $0x60] sm:$0xf] %v278_v24  ;;  %281 = vst [vmem:[%s2234_s11 + $0x64] sm:$0xf] %v280_v25 }
  0x27   : > { %283 = vst [vmem:[%s2234_s11 + $0x68] sm:$0xf] %v282_v26  ;;  %v284_v27 = vld [vmem:[%s2229_s10 + $0x1b0] sm:$0xf]  ;;  %v286_v28 = vld [vmem:[%s2229_s10 + $0x1c0] sm:$0xf] }
  0x28   : > { %v288_v29 = vld [vmem:[%s2229_s10 + $0x1d0] sm:$0xf]  ;;  %285 = vst [vmem:[%s2234_s11 + $0x6c] sm:$0xf] %v284_v27  ;;  %287 = vst [vmem:[%s2234_s11 + $0x70] sm:$0xf] %v286_v28 }
  0x29   : > { %289 = vst [vmem:[%s2234_s11 + $0x74] sm:$0xf] %v288_v29  ;;  %v290_v30 = vld [vmem:[%s2229_s10 + $0x1e0] sm:$0xf]  ;;  %v292_v31 = vld [vmem:[%s2229_s10 + $0x1f0] sm:$0xf] }
  0x2a   : > { %v294_v32 = vld [vmem:[%s2229_s10 + $0x200] sm:$0xf]  ;;  %291 = vst [vmem:[%s2234_s11 + $0x78] sm:$0xf] %v290_v30  ;;  %293 = vst [vmem:[%s2234_s11 + $0x7c] sm:$0xf] %v292_v31 }
  0x2b   : > { %295 = vst [vmem:[%s2234_s11 + $0x80] sm:$0xf] %v294_v32  ;;  %v296_v33 = vld [vmem:[%s2229_s10 + $0x210] sm:$0xf]  ;;  %v298_v34 = vld [vmem:[%s2229_s10 + $0x220] sm:$0xf] }
  0x2c   : > { %v300_v35 = vld [vmem:[%s2229_s10 + $0x230] sm:$0xf]  ;;  %297 = vst [vmem:[%s2234_s11 + $0x84] sm:$0xf] %v296_v33  ;;  %299 = vst [vmem:[%s2234_s11 + $0x88] sm:$0xf] %v298_v34 }
  0x2d   : > { %301 = vst [vmem:[%s2234_s11 + $0x8c] sm:$0xf] %v300_v35  ;;  %v302_v36 = vld [vmem:[%s2229_s10 + $0x240] sm:$0xf]  ;;  %v304_v37 = vld [vmem:[%s2229_s10 + $0x250] sm:$0xf] }
  0x2e   : > { %v306_v38 = vld [vmem:[%s2229_s10 + $0x260] sm:$0xf]  ;;  %303 = vst [vmem:[%s2234_s11 + $0x90] sm:$0xf] %v302_v36  ;;  %305 = vst [vmem:[%s2234_s11 + $0x94] sm:$0xf] %v304_v37 }
  0x2f   : > { %307 = vst [vmem:[%s2234_s11 + $0x98] sm:$0xf] %v306_v38  ;;  %v308_v39 = vld [vmem:[%s2229_s10 + $0x270] sm:$0xf]  ;;  %v310_v40 = vld [vmem:[%s2229_s10 + $0x280] sm:$0xf] }
  0x30   : > { %v312_v41 = vld [vmem:[%s2229_s10 + $0x290] sm:$0xf]  ;;  %309 = vst [vmem:[%s2234_s11 + $0x9c] sm:$0xf] %v308_v39  ;;  %311 = vst [vmem:[%s2234_s11 + $0xa0] sm:$0xf] %v310_v40 }
  0x31   : > { %313 = vst [vmem:[%s2234_s11 + $0xa4] sm:$0xf] %v312_v41  ;;  %v314_v42 = vld [vmem:[%s2229_s10 + $0x2a0] sm:$0xf]  ;;  %v316_v43 = vld [vmem:[%s2229_s10 + $0x2b0] sm:$0xf] }
  0x32   : > { %v318_v44 = vld [vmem:[%s2229_s10 + $0x2c0] sm:$0xf]  ;;  %315 = vst [vmem:[%s2234_s11 + $0xa8] sm:$0xf] %v314_v42  ;;  %317 = vst [vmem:[%s2234_s11 + $0xac] sm:$0xf] %v316_v43 }
  0x33   : > { %319 = vst [vmem:[%s2234_s11 + $0xb0] sm:$0xf] %v318_v44  ;;  %v320_v45 = vld [vmem:[%s2229_s10 + $0x2d0] sm:$0xf]  ;;  %v322_v46 = vld [vmem:[%s2229_s10 + $0x2e0] sm:$0xf] }
  0x34   : > { %v324_v47 = vld [vmem:[%s2229_s10 + $0x2f0] sm:$0xf]  ;;  %321 = vst [vmem:[%s2234_s11 + $0xb4] sm:$0xf] %v320_v45  ;;  %323 = vst [vmem:[%s2234_s11 + $0xb8] sm:$0xf] %v322_v46 }
  0x35   : > { %325 = vst [vmem:[%s2234_s11 + $0xbc] sm:$0xf] %v324_v47  ;;  %v326_v48 = vld [vmem:[%s2229_s10 + $0x300] sm:$0xf]  ;;  %v328_v49 = vld [vmem:[%s2229_s10 + $0x310] sm:$0xf] }
  0x36   : > { %v330_v50 = vld [vmem:[%s2229_s10 + $0x320] sm:$0xf]  ;;  %327 = vst [vmem:[%s2234_s11 + $0xc0] sm:$0xf] %v326_v48  ;;  %329 = vst [vmem:[%s2234_s11 + $0xc4] sm:$0xf] %v328_v49 }
  0x37   : > { %331 = vst [vmem:[%s2234_s11 + $0xc8] sm:$0xf] %v330_v50  ;;  %v332_v51 = vld [vmem:[%s2229_s10 + $0x330] sm:$0xf]  ;;  %v334_v52 = vld [vmem:[%s2229_s10 + $0x340] sm:$0xf] }
  0x38   : > { %v336_v53 = vld [vmem:[%s2229_s10 + $0x350] sm:$0xf]  ;;  %333 = vst [vmem:[%s2234_s11 + $0xcc] sm:$0xf] %v332_v51  ;;  %335 = vst [vmem:[%s2234_s11 + $0xd0] sm:$0xf] %v334_v52 }
  0x39   : > { %337 = vst [vmem:[%s2234_s11 + $0xd4] sm:$0xf] %v336_v53  ;;  %v338_v54 = vld [vmem:[%s2229_s10 + $0x360] sm:$0xf]  ;;  %v340_v55 = vld [vmem:[%s2229_s10 + $0x370] sm:$0xf] }
  0x3a   : > { %v342_v56 = vld [vmem:[%s2229_s10 + $0x380] sm:$0xf]  ;;  %339 = vst [vmem:[%s2234_s11 + $0xd8] sm:$0xf] %v338_v54  ;;  %341 = vst [vmem:[%s2234_s11 + $0xdc] sm:$0xf] %v340_v55 }
  0x3b   : > { %343 = vst [vmem:[%s2234_s11 + $0xe0] sm:$0xf] %v342_v56  ;;  %v344_v57 = vld [vmem:[%s2229_s10 + $0x390] sm:$0xf]  ;;  %v346_v58 = vld [vmem:[%s2229_s10 + $0x3a0] sm:$0xf] }
  0x3c   : > { %v348_v59 = vld [vmem:[%s2229_s10 + $0x3b0] sm:$0xf]  ;;  %345 = vst [vmem:[%s2234_s11 + $0xe4] sm:$0xf] %v344_v57  ;;  %347 = vst [vmem:[%s2234_s11 + $0xe8] sm:$0xf] %v346_v58 }
  0x3d   : > { %349 = vst [vmem:[%s2234_s11 + $0xec] sm:$0xf] %v348_v59  ;;  %v350_v60 = vld [vmem:[%s2229_s10 + $0x3c0] sm:$0xf]  ;;  %v352_v61 = vld [vmem:[%s2229_s10 + $0x3d0] sm:$0xf] }
  0x3e   : > { %v354_v62 = vld [vmem:[%s2229_s10 + $0x3e0] sm:$0xf]  ;;  %351 = vst [vmem:[%s2234_s11 + $0xf0] sm:$0xf] %v350_v60  ;;  %353 = vst [vmem:[%s2234_s11 + $0xf4] sm:$0xf] %v352_v61 }
  0x3f   : > { %355 = vst [vmem:[%s2234_s11 + $0xf8] sm:$0xf] %v354_v62  ;;  %v356_v63 = vld [vmem:[%s2229_s10 + $0x3f0] sm:$0xf]  ;;  %v358_v0 = vld [vmem:[%s2229_s10 + $0x400] sm:$0xf] }
  0x40   : > { %v360_v1 = vld [vmem:[%s2229_s10 + $0x410] sm:$0xf]  ;;  %357 = vst [vmem:[%s2234_s11 + $0xfc] sm:$0xf] %v356_v63  ;;  %359 = vst [vmem:[%s2234_s11 + $0x100] sm:$0xf] %v358_v0 }
  0x41   : > { %361 = vst [vmem:[%s2234_s11 + $0x104] sm:$0xf] %v360_v1  ;;  %v362_v2 = vld [vmem:[%s2229_s10 + $0x420] sm:$0xf]  ;;  %v364_v3 = vld [vmem:[%s2229_s10 + $0x430] sm:$0xf] }
  0x42   : > { %v366_v4 = vld [vmem:[%s2229_s10 + $0x440] sm:$0xf]  ;;  %363 = vst [vmem:[%s2234_s11 + $0x108] sm:$0xf] %v362_v2  ;;  %365 = vst [vmem:[%s2234_s11 + $0x10c] sm:$0xf] %v364_v3 }
  0x43   : > { %367 = vst [vmem:[%s2234_s11 + $0x110] sm:$0xf] %v366_v4  ;;  %v368_v5 = vld [vmem:[%s2229_s10 + $0x450] sm:$0xf]  ;;  %v370_v6 = vld [vmem:[%s2229_s10 + $0x460] sm:$0xf] }
  0x44   : > { %v372_v7 = vld [vmem:[%s2229_s10 + $0x470] sm:$0xf]  ;;  %369 = vst [vmem:[%s2234_s11 + $0x114] sm:$0xf] %v368_v5  ;;  %371 = vst [vmem:[%s2234_s11 + $0x118] sm:$0xf] %v370_v6 }
  0x45   : > { %373 = vst [vmem:[%s2234_s11 + $0x11c] sm:$0xf] %v372_v7  ;;  %v374_v8 = vld [vmem:[%s2229_s10 + $0x480] sm:$0xf]  ;;  %v376_v9 = vld [vmem:[%s2229_s10 + $0x490] sm:$0xf] }
  0x46   : > { %v378_v10 = vld [vmem:[%s2229_s10 + $0x4a0] sm:$0xf]  ;;  %375 = vst [vmem:[%s2234_s11 + $0x120] sm:$0xf] %v374_v8  ;;  %377 = vst [vmem:[%s2234_s11 + $0x124] sm:$0xf] %v376_v9 }
  0x47   : > { %379 = vst [vmem:[%s2234_s11 + $0x128] sm:$0xf] %v378_v10  ;;  %v380_v11 = vld [vmem:[%s2229_s10 + $0x4b0] sm:$0xf]  ;;  %v382_v12 = vld [vmem:[%s2229_s10 + $0x4c0] sm:$0xf] }
  0x48   : > { %v384_v13 = vld [vmem:[%s2229_s10 + $0x4d0] sm:$0xf]  ;;  %381 = vst [vmem:[%s2234_s11 + $0x12c] sm:$0xf] %v380_v11  ;;  %383 = vst [vmem:[%s2234_s11 + $0x130] sm:$0xf] %v382_v12 }
  0x49   : > { %385 = vst [vmem:[%s2234_s11 + $0x134] sm:$0xf] %v384_v13  ;;  %v386_v14 = vld [vmem:[%s2229_s10 + $0x4e0] sm:$0xf]  ;;  %v388_v15 = vld [vmem:[%s2229_s10 + $0x4f0] sm:$0xf] }
  0x4a   : > { %v390_v16 = vld [vmem:[%s2229_s10 + $0x500] sm:$0xf]  ;;  %387 = vst [vmem:[%s2234_s11 + $0x138] sm:$0xf] %v386_v14  ;;  %389 = vst [vmem:[%s2234_s11 + $0x13c] sm:$0xf] %v388_v15 }
  0x4b   : > { %391 = vst [vmem:[%s2234_s11 + $0x140] sm:$0xf] %v390_v16  ;;  %v392_v17 = vld [vmem:[%s2229_s10 + $0x510] sm:$0xf]  ;;  %v394_v18 = vld [vmem:[%s2229_s10 + $0x520] sm:$0xf] }
  0x4c   : > { %v396_v19 = vld [vmem:[%s2229_s10 + $0x530] sm:$0xf]  ;;  %393 = vst [vmem:[%s2234_s11 + $0x144] sm:$0xf] %v392_v17  ;;  %395 = vst [vmem:[%s2234_s11 + $0x148] sm:$0xf] %v394_v18 }
  0x4d   : > { %397 = vst [vmem:[%s2234_s11 + $0x14c] sm:$0xf] %v396_v19  ;;  %v398_v20 = vld [vmem:[%s2229_s10 + $0x540] sm:$0xf]  ;;  %v400_v21 = vld [vmem:[%s2229_s10 + $0x550] sm:$0xf] }
  0x4e   : > { %v402_v22 = vld [vmem:[%s2229_s10 + $0x560] sm:$0xf]  ;;  %399 = vst [vmem:[%s2234_s11 + $0x150] sm:$0xf] %v398_v20  ;;  %401 = vst [vmem:[%s2234_s11 + $0x154] sm:$0xf] %v400_v21 }
  0x4f   : > { %403 = vst [vmem:[%s2234_s11 + $0x158] sm:$0xf] %v402_v22  ;;  %v404_v23 = vld [vmem:[%s2229_s10 + $0x570] sm:$0xf]  ;;  %v406_v24 = vld [vmem:[%s2229_s10 + $0x580] sm:$0xf] }
  0x50   : > { %v408_v25 = vld [vmem:[%s2229_s10 + $0x590] sm:$0xf]  ;;  %405 = vst [vmem:[%s2234_s11 + $0x15c] sm:$0xf] %v404_v23  ;;  %407 = vst [vmem:[%s2234_s11 + $0x160] sm:$0xf] %v406_v24 }
  0x51   : > { %409 = vst [vmem:[%s2234_s11 + $0x164] sm:$0xf] %v408_v25  ;;  %v410_v26 = vld [vmem:[%s2229_s10 + $0x5a0] sm:$0xf]  ;;  %v412_v27 = vld [vmem:[%s2229_s10 + $0x5b0] sm:$0xf] }
  0x52   : > { %v414_v28 = vld [vmem:[%s2229_s10 + $0x5c0] sm:$0xf]  ;;  %411 = vst [vmem:[%s2234_s11 + $0x168] sm:$0xf] %v410_v26  ;;  %413 = vst [vmem:[%s2234_s11 + $0x16c] sm:$0xf] %v412_v27 }
  0x53   : > { %415 = vst [vmem:[%s2234_s11 + $0x170] sm:$0xf] %v414_v28  ;;  %v416_v29 = vld [vmem:[%s2229_s10 + $0x5d0] sm:$0xf]  ;;  %v418_v30 = vld [vmem:[%s2229_s10 + $0x5e0] sm:$0xf] }
  0x54   : > { %v420_v31 = vld [vmem:[%s2229_s10 + $0x5f0] sm:$0xf]  ;;  %417 = vst [vmem:[%s2234_s11 + $0x174] sm:$0xf] %v416_v29  ;;  %419 = vst [vmem:[%s2234_s11 + $0x178] sm:$0xf] %v418_v30 }
  0x55   : > { %421 = vst [vmem:[%s2234_s11 + $0x17c] sm:$0xf] %v420_v31  ;;  %v422_v32 = vld [vmem:[%s2229_s10 + $0x600] sm:$0xf]  ;;  %v424_v33 = vld [vmem:[%s2229_s10 + $0x610] sm:$0xf] }
  0x56   : > { %v426_v34 = vld [vmem:[%s2229_s10 + $0x620] sm:$0xf]  ;;  %423 = vst [vmem:[%s2234_s11 + $0x180] sm:$0xf] %v422_v32  ;;  %425 = vst [vmem:[%s2234_s11 + $0x184] sm:$0xf] %v424_v33 }
  0x57   : > { %427 = vst [vmem:[%s2234_s11 + $0x188] sm:$0xf] %v426_v34  ;;  %v428_v35 = vld [vmem:[%s2229_s10 + $0x630] sm:$0xf]  ;;  %v430_v36 = vld [vmem:[%s2229_s10 + $0x640] sm:$0xf] }
  0x58   : > { %v432_v37 = vld [vmem:[%s2229_s10 + $0x650] sm:$0xf]  ;;  %429 = vst [vmem:[%s2234_s11 + $0x18c] sm:$0xf] %v428_v35  ;;  %431 = vst [vmem:[%s2234_s11 + $0x190] sm:$0xf] %v430_v36 }
  0x59   : > { %433 = vst [vmem:[%s2234_s11 + $0x194] sm:$0xf] %v432_v37  ;;  %v434_v38 = vld [vmem:[%s2229_s10 + $0x660] sm:$0xf]  ;;  %v436_v39 = vld [vmem:[%s2229_s10 + $0x670] sm:$0xf] }
  0x5a   : > { %v438_v40 = vld [vmem:[%s2229_s10 + $0x680] sm:$0xf]  ;;  %435 = vst [vmem:[%s2234_s11 + $0x198] sm:$0xf] %v434_v38  ;;  %437 = vst [vmem:[%s2234_s11 + $0x19c] sm:$0xf] %v436_v39 }
  0x5b   : > { %439 = vst [vmem:[%s2234_s11 + $0x1a0] sm:$0xf] %v438_v40  ;;  %v440_v41 = vld [vmem:[%s2229_s10 + $0x690] sm:$0xf]  ;;  %v442_v42 = vld [vmem:[%s2229_s10 + $0x6a0] sm:$0xf] }
  0x5c   : > { %v444_v43 = vld [vmem:[%s2229_s10 + $0x6b0] sm:$0xf]  ;;  %441 = vst [vmem:[%s2234_s11 + $0x1a4] sm:$0xf] %v440_v41  ;;  %443 = vst [vmem:[%s2234_s11 + $0x1a8] sm:$0xf] %v442_v42 }
  0x5d   : > { %445 = vst [vmem:[%s2234_s11 + $0x1ac] sm:$0xf] %v444_v43  ;;  %v446_v44 = vld [vmem:[%s2229_s10 + $0x6c0] sm:$0xf]  ;;  %v448_v45 = vld [vmem:[%s2229_s10 + $0x6d0] sm:$0xf] }
  0x5e   : > { %v450_v46 = vld [vmem:[%s2229_s10 + $0x6e0] sm:$0xf]  ;;  %447 = vst [vmem:[%s2234_s11 + $0x1b0] sm:$0xf] %v446_v44  ;;  %449 = vst [vmem:[%s2234_s11 + $0x1b4] sm:$0xf] %v448_v45 }
  0x5f   : > { %451 = vst [vmem:[%s2234_s11 + $0x1b8] sm:$0xf] %v450_v46  ;;  %v452_v47 = vld [vmem:[%s2229_s10 + $0x6f0] sm:$0xf]  ;;  %v454_v48 = vld [vmem:[%s2229_s10 + $0x700] sm:$0xf] }
  0x60   : > { %v456_v49 = vld [vmem:[%s2229_s10 + $0x710] sm:$0xf]  ;;  %453 = vst [vmem:[%s2234_s11 + $0x1bc] sm:$0xf] %v452_v47  ;;  %455 = vst [vmem:[%s2234_s11 + $0x1c0] sm:$0xf] %v454_v48 }
  0x61   : > { %457 = vst [vmem:[%s2234_s11 + $0x1c4] sm:$0xf] %v456_v49  ;;  %v458_v50 = vld [vmem:[%s2229_s10 + $0x720] sm:$0xf]  ;;  %v460_v51 = vld [vmem:[%s2229_s10 + $0x730] sm:$0xf] }
  0x62   : > { %v462_v52 = vld [vmem:[%s2229_s10 + $0x740] sm:$0xf]  ;;  %459 = vst [vmem:[%s2234_s11 + $0x1c8] sm:$0xf] %v458_v50  ;;  %461 = vst [vmem:[%s2234_s11 + $0x1cc] sm:$0xf] %v460_v51 }
  0x63   : > { %463 = vst [vmem:[%s2234_s11 + $0x1d0] sm:$0xf] %v462_v52  ;;  %v464_v53 = vld [vmem:[%s2229_s10 + $0x750] sm:$0xf]  ;;  %v466_v54 = vld [vmem:[%s2229_s10 + $0x760] sm:$0xf] }
  0x64   : > { %v468_v55 = vld [vmem:[%s2229_s10 + $0x770] sm:$0xf]  ;;  %465 = vst [vmem:[%s2234_s11 + $0x1d4] sm:$0xf] %v464_v53  ;;  %467 = vst [vmem:[%s2234_s11 + $0x1d8] sm:$0xf] %v466_v54 }
  0x65   : > { %469 = vst [vmem:[%s2234_s11 + $0x1dc] sm:$0xf] %v468_v55  ;;  %v470_v56 = vld [vmem:[%s2229_s10 + $0x780] sm:$0xf]  ;;  %v472_v57 = vld [vmem:[%s2229_s10 + $0x790] sm:$0xf] }
  0x66   : > { %v474_v58 = vld [vmem:[%s2229_s10 + $0x7a0] sm:$0xf]  ;;  %471 = vst [vmem:[%s2234_s11 + $0x1e0] sm:$0xf] %v470_v56  ;;  %473 = vst [vmem:[%s2234_s11 + $0x1e4] sm:$0xf] %v472_v57 }
  0x67   : > { %475 = vst [vmem:[%s2234_s11 + $0x1e8] sm:$0xf] %v474_v58  ;;  %v476_v59 = vld [vmem:[%s2229_s10 + $0x7b0] sm:$0xf]  ;;  %v478_v60 = vld [vmem:[%s2229_s10 + $0x7c0] sm:$0xf] }
  0x68   : > { %v480_v61 = vld [vmem:[%s2229_s10 + $0x7d0] sm:$0xf]  ;;  %477 = vst [vmem:[%s2234_s11 + $0x1ec] sm:$0xf] %v476_v59  ;;  %479 = vst [vmem:[%s2234_s11 + $0x1f0] sm:$0xf] %v478_v60 }
  0x69   : > { %481 = vst [vmem:[%s2234_s11 + $0x1f4] sm:$0xf] %v480_v61  ;;  %v482_v62 = vld [vmem:[%s2229_s10 + $0x7e0] sm:$0xf]  ;;  %v484_v63 = vld [vmem:[%s2229_s10 + $0x7f0] sm:$0xf] }
  0x6a   : > { %483 = vst [vmem:[%s2234_s11 + $0x1f8] sm:$0xf] %v482_v62  ;;  %485 = vst [vmem:[%s2234_s11 + $0x1fc] sm:$0xf] %v484_v63 }
  0x6b PF: > { %p1788_p7 = scmp.ge.s32.totalorder %s2141_s21, 1  ;;  %p764_p8 = scmp.lt.s32.totalorder %s2141_s21, 37 }
  0x6d   : > { %p765_p9 = pnand %p1788_p7, %p764_p8 }
  0x6e   : > { %s771_s12 = sand.u32 (!%p765_p9), 1, %s2117_s15   ;;  %s1790_s13 = sshll.u32 (!%p765_p9), %s2125_s17, 3 }
  0x6f   : > { %768 = sbr.rel (%p765_p9) target bundleno = 419 (0x1a3), region = 65  ;;  %s1789_s14 = sshll.u32 (!%p765_p9), %s771_s12, 9 }
  0x70   : > { %p825_p10 = scmp.lt.s32.totalorder (!%p765_p9), %s1790_s13, 71  ;;  %p835_p11 = scmp.lt.s32.totalorder (!%p765_p9), %s2129_s18, 3 }
  0x71   : > { %s2516_s12 = scalar_lea.vmem (!%p765_p9), [#allocation3], %s1789_s14  ;;  %p1793_p12 = scmp.ne.s32.totalorder (!%p765_p9), %s2125_s17, 0 }
  0x74   : > { %s2638_s13 = smov (!%p825_p10, %s1790_s13), 71  ;;  %s2640_s18 = smov (!%p835_p11, %s2129_s18), 3 }
  0x75   : > { %s1791_s24 = sshll.u32 %s2638_s13, 2  ;;  %s1792_s29 = sshll.u32 %s2640_s18, 3 }
  0x76   : > { %s2500_s27 = scalar_lea.vmem %s2620_s0, %s1791_s24  ;;  %s2506_s15 = scalar_lea.vmem %s2622_s2, %s1792_s29 }
  0x77   : > { %s847_s8 = scalar_lea.vmem %s2623_s3, %s2640_s18  ;;  %s854_s11 = scalar_lea.vmem %s2624_s4, %s2640_s18 }
  0x78   : > { %859 = sbr.rel (%p1793_p12) target bundleno = 127 (0x7f), region = 73 }
  0x7d   : > { %v2143_v0 = vmov 0.0  }
  0x7e   : > { %860 = vst [vmem:[#allocation2] sm:$0xff] %v2143_v0 }
  0x7f PF: > { %v2015_v1 = vld [vmem:[%s2516_s12 + $0x78] sm:$0xff]   ;;  %v2019_v5 = vld [vmem:[%s2516_s12 + $0x70] sm:$0xff]   ;;  %v2023_v9 = vld [vmem:[%s2516_s12 + $0x68] sm:$0xff]   ;;  %p1866_p13 = scmp.ne.s32.totalorder %s2125_s17, 8 }
  0x80   : > { %v2016_v2 = vld [vmem:[%s2516_s12 + $0xf8] sm:$0xff]   ;;  %1870 = vmatprep.subr.bf16.mxu0 %v2015_v1  ;;  %v2020_v6 = vld [vmem:[%s2516_s12 + $0xf0] sm:$0xff]   ;;  %v2024_v10 = vld [vmem:[%s2516_s12 + $0xe8] sm:$0xff]  }
  0x81   : > { %v2017_v3 = vld [vmem:[%s2516_s12 + $0x38] sm:$0xff]   ;;  %1892 = vmatprep.subr.bf16.mxu1 %v2016_v2  ;;  %v2021_v7 = vld [vmem:[%s2516_s12 + $0x30] sm:$0xff]   ;;  %v2025_v11 = vld [vmem:[%s2516_s12 + $0x28] sm:$0xff]  }
  0x82   : > { %v2018_v4 = vld [vmem:[%s2516_s12 + $0xb8] sm:$0xff]   ;;  %1871 = vmatpush3.bf16.msra.mxu0 %v2017_v3  ;;  %v2022_v8 = vld [vmem:[%s2516_s12 + $0xb0] sm:$0xff]   ;;  %v2026_v12 = vld [vmem:[%s2516_s12 + $0xa8] sm:$0xff]  }
  0x83   : > { %1893 = vmatpush3.bf16.msra.mxu1 %v2018_v4  ;;  %1872 = vmatprep.subr.bf16.mxu0 %v2019_v5  ;;  %v2027_v13 = vld [vmem:[%s2516_s12 + $0x60] sm:$0xff]   ;;  %v2031_v17 = vld [vmem:[%s2516_s12 + $0x58] sm:$0xff]   ;;  %v2035_v21 = vld [vmem:[%s2516_s12 + $0x50] sm:$0xff]  }
  0x84   : > { %1894 = vmatprep.subr.bf16.mxu1 %v2020_v6  ;;  %v2028_v14 = vld [vmem:[%s2516_s12 + $0xe0] sm:$0xff]   ;;  %v2032_v18 = vld [vmem:[%s2516_s12 + $0xd8] sm:$0xff]   ;;  %v2036_v22 = vld [vmem:[%s2516_s12 + $0xd0] sm:$0xff]  }
  0x85   : > { %v2029_v15 = vld [vmem:[%s2516_s12 + $0x20] sm:$0xff]   ;;  %v2033_v19 = vld [vmem:[%s2516_s12 + $0x18] sm:$0xff]   ;;  %v2037_v23 = vld [vmem:[%s2516_s12 + $0x10] sm:$0xff]  }
  0x86   : > { %1873 = vmatpush3.bf16.msra.mxu0 %v2021_v7  ;;  %v2030_v16 = vld [vmem:[%s2516_s12 + $0xa0] sm:$0xff]   ;;  %v2034_v20 = vld [vmem:[%s2516_s12 + $0x98] sm:$0xff]   ;;  %v2038_v24 = vld [vmem:[%s2516_s12 + $0x90] sm:$0xff]  }
  0x87   : > { %1895 = vmatpush3.bf16.msra.mxu1 %v2022_v8  ;;  %1874 = vmatprep.subr.bf16.mxu0 %v2023_v9  ;;  %v2039_v25 = vld [vmem:[%s2516_s12 + $0x48] sm:$0xff]   ;;  %v2043_v29 = vld [vmem:[%s2516_s12 + $0x40] sm:$0xff]   ;;  %v862_v33 = vld [vmem:[%s2500_s27] sm:$0xff] }
  0x88   : > { %1896 = vmatprep.subr.bf16.mxu1 %v2024_v10  ;;  %v2040_v26 = vld [vmem:[%s2516_s12 + $0xc8] sm:$0xff]   ;;  %v2044_v30 = vld [vmem:[%s2516_s12 + $0xc0] sm:$0xff]   ;;  %v1794_v35 = vcombine.low %v862_v33, %v862_v33  ;;  %v1795_v36 = vcombine.high %v862_v33, %v862_v33  ;;  %v2051_v39 = vld [vmem:[%s2516_s12 + $0x178] sm:$0xff]  }
  0x89   : > { %v2041_v27 = vld [vmem:[%s2516_s12 + $0x8] sm:$0xff]   ;;  %v2045_v31 = vld [vmem:[%s2516_s12] sm:$0xff]   ;;  %v2052_v40 = vld [vmem:[%s2516_s12 + $0x1f8] sm:$0xff]  }
  0x8a   : > { %1875 = vmatpush3.bf16.msra.mxu0 %v2025_v11  ;;  %v2042_v28 = vld [vmem:[%s2516_s12 + $0x88] sm:$0xff]   ;;  %v2046_v32 = vld [vmem:[%s2516_s12 + $0x80] sm:$0xff]   ;;  %1438 = vmatprep.mubr.bf16.mxu0 %v1795_v36  ;;  %v2053_v41 = vld [vmem:[%s2516_s12 + $0x138] sm:$0xff]  }
  0x8b   : > { %1897 = vmatpush3.bf16.msra.mxu1 %v2026_v12  ;;  %1876 = vmatprep.subr.bf16.mxu0 %v2027_v13  ;;  %v863_v34 = vld [vmem:[%s2500_s27 + $0x8] sm:$0xff]  ;;  %v2054_v42 = vld [vmem:[%s2516_s12 + $0x1b8] sm:$0xff]   ;;  %v2055_v43 = vld [vmem:[%s2516_s12 + $0x170] sm:$0xff]  }
  0x8c   : > { %1898 = vmatprep.subr.bf16.mxu1 %v2028_v14  ;;  %v1796_v37 = vcombine.low %v863_v34, %v863_v34  ;;  %v1797_v38 = vcombine.high %v863_v34, %v863_v34  ;;  %v2056_v44 = vld [vmem:[%s2516_s12 + $0x1f0] sm:$0xff]   ;;  %v2059_v47 = vld [vmem:[%s2516_s12 + $0x168] sm:$0xff]   ;;  %v2063_v51 = vld [vmem:[%s2516_s12 + $0x160] sm:$0xff]  }
  0x8d   : > { %v2057_v45 = vld [vmem:[%s2516_s12 + $0x130] sm:$0xff]   ;;  %v2060_v48 = vld [vmem:[%s2516_s12 + $0x1e8] sm:$0xff]   ;;  %v2064_v52 = vld [vmem:[%s2516_s12 + $0x1e0] sm:$0xff]  }
  0x8e   : > { %1877 = vmatpush3.bf16.msra.mxu0 %v2029_v15  ;;  %1478 = vmatprep.mubr.bf16.mxu1 %v1797_v38  ;;  %v2058_v46 = vld [vmem:[%s2516_s12 + $0x1b0] sm:$0xff]   ;;  %v2061_v49 = vld [vmem:[%s2516_s12 + $0x128] sm:$0xff]   ;;  %v2065_v53 = vld [vmem:[%s2516_s12 + $0x120] sm:$0xff]  }
  0x8f   : > { %1899 = vmatpush3.bf16.msra.mxu1 %v2030_v16  ;;  %1878 = vmatprep.subr.bf16.mxu0 %v2031_v17  ;;  %v2062_v50 = vld [vmem:[%s2516_s12 + $0x1a8] sm:$0xff]   ;;  %v2066_v54 = vld [vmem:[%s2516_s12 + $0x1a0] sm:$0xff]   ;;  %v2067_v55 = vld [vmem:[%s2516_s12 + $0x158] sm:$0xff]  }
  0x90   : > { %1900 = vmatprep.subr.bf16.mxu1 %v2032_v18  ;;  %v2068_v56 = vld [vmem:[%s2516_s12 + $0x1d8] sm:$0xff]   ;;  %v2071_v59 = vld [vmem:[%s2516_s12 + $0x150] sm:$0xff]   ;;  %v2075_v63 = vld [vmem:[%s2516_s12 + $0x148] sm:$0xff]  }
  0x91   : > { %v2069_v57 = vld [vmem:[%s2516_s12 + $0x118] sm:$0xff]   ;;  %v2072_v60 = vld [vmem:[%s2516_s12 + $0x1d0] sm:$0xff]   ;;  %v2076_v0 = vld [vmem:[%s2516_s12 + $0x1c8] sm:$0xff]  }
  0x92   : > { %1879 = vmatpush3.bf16.msra.mxu0 %v2033_v19  ;;  %v2070_v58 = vld [vmem:[%s2516_s12 + $0x198] sm:$0xff]   ;;  %v2073_v61 = vld [vmem:[%s2516_s12 + $0x110] sm:$0xff]   ;;  %v2077_v1 = vld [vmem:[%s2516_s12 + $0x108] sm:$0xff]  }
  0x93   : > { %1901 = vmatpush3.bf16.msra.mxu1 %v2034_v20  ;;  %1880 = vmatprep.subr.bf16.mxu0 %v2035_v21  ;;  %v2074_v62 = vld [vmem:[%s2516_s12 + $0x190] sm:$0xff]   ;;  %v2078_v2 = vld [vmem:[%s2516_s12 + $0x188] sm:$0xff]   ;;  %v2079_v3 = vld [vmem:[%s2516_s12 + $0x140] sm:$0xff]  }
  0x94   : > { %1902 = vmatprep.subr.bf16.mxu1 %v2036_v22  ;;  %v2080_v4 = vld [vmem:[%s2516_s12 + $0x1c0] sm:$0xff]   ;;  %v864_v7 = vld [vmem:[%s2500_s27 + $0x10] sm:$0xff]  ;;  %v865_v10 = vld [vmem:[%s2500_s27 + $0x18] sm:$0xff] }
  0x95   : > { %v2081_v5 = vld [vmem:[%s2516_s12 + $0x100] sm:$0xff]   ;;  %v1798_v8 = vcombine.low %v864_v7, %v864_v7  ;;  %v1799_v9 = vcombine.high %v864_v7, %v864_v7  ;;  %v1800_v11 = vcombine.low %v865_v10, %v865_v10  ;;  %v1801_v12 = vcombine.high %v865_v10, %v865_v10  ;;  %v861_v33 = vld [vmem:[#allocation2] sm:$0xff] }
  0x96   : > { %1881 = vmatpush3.bf16.msra.mxu0 %v2037_v23  ;;  %v2082_v6 = vld [vmem:[%s2516_s12 + $0x180] sm:$0xff]  }
  0x97   : > { %1903 = vmatpush3.bf16.msra.mxu1 %v2038_v24  ;;  %1882 = vmatprep.subr.bf16.mxu0 %v2039_v25 }
  0x98   : > { %1904 = vmatprep.subr.bf16.mxu1 %v2040_v26 }
  0x9a   : > { %1883 = vmatpush3.bf16.msra.mxu0 %v2041_v27 }
  0x9b   : > { %1905 = vmatpush3.bf16.msra.mxu1 %v2042_v28  ;;  %1884 = vmatprep.subr.bf16.mxu0 %v2043_v29 }
  0x9c   : > { %1906 = vmatprep.subr.bf16.mxu1 %v2044_v30 }
  0x9e   : > { %1885 = vmatpush3.bf16.msra.mxu0 %v2045_v31 }
  0x9f   : > { %1907 = vmatpush3.bf16.msra.mxu1 %v2046_v32  ;;  %1914 = vmatprep.subr.bf16.mxu0 %v2051_v39 }
  0xa0   : > { %1936 = vmatprep.subr.bf16.mxu1 %v2052_v40 }
  0xa1   : > { %1439 = vmatmul.mubr.bf16.vlgmr.msra.gmra.mxu0 %v1794_v35 }
  0xa2   : > { %1479 = vmatmul.mubr.bf16.vlgmr.msra.gmra.mxu1 %v1796_v37  ;;  %1915 = vmatpush3.bf16.msra.mxu0 %v2053_v41 }
  0xa3   : > { %1937 = vmatpush3.bf16.msra.mxu1 %v2054_v42  ;;  %1916 = vmatprep.subr.bf16.mxu0 %v2055_v43 }
  0xa4   : > { %1938 = vmatprep.subr.bf16.mxu1 %v2056_v44  ;;  %1518 = vmatprep.mubr.bf16.mxu0 %v1799_v9 }
  0xa5   : > { %1558 = vmatprep.mubr.bf16.mxu1 %v1801_v12 }
  0xa6   : > { %1917 = vmatpush3.bf16.msra.mxu0 %v2057_v45 }
  0xa7   : > { %1939 = vmatpush3.bf16.msra.mxu1 %v2058_v46  ;;  %1918 = vmatprep.subr.bf16.mxu0 %v2059_v47 }
  0xa8   : > { %1940 = vmatprep.subr.bf16.mxu1 %v2060_v48 }
  0xaa   : > { %1919 = vmatpush3.bf16.msra.mxu0 %v2061_v49 }
  0xab   : > { %1941 = vmatpush3.bf16.msra.mxu1 %v2062_v50  ;;  %1920 = vmatprep.subr.bf16.mxu0 %v2063_v51 }
  0xac   : > { %1942 = vmatprep.subr.bf16.mxu1 %v2064_v52 }
  0xae   : > { %1921 = vmatpush3.bf16.msra.mxu0 %v2065_v53 }
  0xaf   : > { %1943 = vmatpush3.bf16.msra.mxu1 %v2066_v54  ;;  %1922 = vmatprep.subr.bf16.mxu0 %v2067_v55 }
  0xb0   : > { %1944 = vmatprep.subr.bf16.mxu1 %v2068_v56 }
  0xb2   : > { %1923 = vmatpush3.bf16.msra.mxu0 %v2069_v57 }
  0xb3   : > { %1945 = vmatpush3.bf16.msra.mxu1 %v2070_v58  ;;  %1924 = vmatprep.subr.bf16.mxu0 %v2071_v59 }
  0xb4   : > { %1946 = vmatprep.subr.bf16.mxu1 %v2072_v60 }
  0xb6   : > { %1925 = vmatpush3.bf16.msra.mxu0 %v2073_v61 }
  0xb7   : > { %1947 = vmatpush3.bf16.msra.mxu1 %v2074_v62  ;;  %1926 = vmatprep.subr.bf16.mxu0 %v2075_v63 }
  0xb8   : > { %1948 = vmatprep.subr.bf16.mxu1 %v2076_v0 }
  0xba   : > { %1927 = vmatpush3.bf16.msra.mxu0 %v2077_v1 }
  0xbb   : > { %1949 = vmatpush3.bf16.msra.mxu1 %v2078_v2  ;;  %1928 = vmatprep.subr.bf16.mxu0 %v2079_v3 }
  0xbc   : > { %1950 = vmatprep.subr.bf16.mxu1 %v2080_v4 }
  0xbe   : > { %1929 = vmatpush3.bf16.msra.mxu0 %v2081_v5 }
  0xbf   : > { %1951 = vmatpush3.bf16.msra.mxu1 %v2082_v6 }
  0xc1   : > { %1519 = vmatmul.mubr.bf16.vlgmr.msra.gmra.mxu0 %v1798_v8 }
  0xc2   : > { %1559 = vmatmul.mubr.bf16.vlgmr.msra.gmra.mxu1 %v1800_v11 }
 0x161   : > { %v1886_v13 = vpop.f32.mrf.mxu0 }
 0x162   : > { %v1908_v14 = vpop.f32.mrf.mxu1 }
 0x163   : > { %v1887_v15 = vpop.f32.mrf.mxu0 }
 0x164   : > { %v1909_v16 = vpop.f32.mrf.mxu1  ;;  %v1888_v21 = vadd.f32 %v1887_v15, %v1886_v13 }
 0x165   : > { %v1889_v17 = vpop.f32.mrf.mxu0  ;;  %v1910_v22 = vadd.f32 %v1909_v16, %v1908_v14 }
 0x166   : > { %v1911_v18 = vpop.f32.mrf.mxu1 }
 0x167   : > { %v1890_v19 = vpop.f32.mrf.mxu0  ;;  %v1481_v27 = vadd.f32 %v1910_v22, %v1888_v21 }
 0x168   : > { %v1912_v20 = vpop.f32.mrf.mxu1 }
 0x181   : > { %v1930_v23 = vpop.f32.mrf.mxu0 }
 0x182   : > { %v1952_v24 = vpop.f32.mrf.mxu1 }
 0x183   : > { %v1931_v25 = vpop.f32.mrf.mxu0 }
 0x184   : > { %v1953_v26 = vpop.f32.mrf.mxu1  ;;  %v1932_v28 = vadd.f32 %v1931_v25, %v1930_v23 }
 0x185   : > { %v1933_v29 = vpop.f32.mrf.mxu0  ;;  %v1954_v32 = vadd.f32 %v1953_v26, %v1952_v24 }
 0x186   : > { %v1955_v30 = vpop.f32.mrf.mxu1  ;;  %v1521_v31 = vadd.f32 %v1932_v28, %v1481_v27 }
 0x187   : > { %v1934_v34 = vpop.f32.mrf.mxu0 }
 0x188   : > { %v1956_v35 = vpop.f32.mrf.mxu1  ;;  %v1561_v36 = vadd.f32 %v1954_v32, %v1521_v31  ;;  %1571 = sbr.rel (%p1866_p13) target bundleno = 419 (0x1a3), region = 77 }
 0x18a   : > { %v1566_v37 = vadd.f32 %v1561_v36, %v861_v33 }
 0x18c   : > { %1567 = vst [vmem:[#allocation2] sm:$0xff] %v1566_v37 }
 0x193   : > { %v1572_v38 = vld [vmem:[#allocation2] sm:$0xff] }
 0x194   : > { %1573 = vst [vmem:[%s2506_s15] sm:$0xff] %v1572_v38  ;;  %v1574_v39 = vrot.slane %v1572_v38, 4  ;;  %v1581_v40 = vmul.f32 %v1572_v38, %v1572_v38 }
 0x196   : > { %v1575_v41 = vadd.f32 %v1574_v39, %v1572_v38  ;;  %v1582_v42 = vrot.slane %v1581_v40, 4 }
 0x198   : > { %v1576_v43 = vrot.slane %v1575_v41, 2  ;;  %v1583_v44 = vadd.f32 %v1582_v42, %v1581_v40 }
 0x19a   : > { %v1577_v45 = vadd.f32 %v1576_v43, %v1575_v41  ;;  %v1584_v46 = vrot.slane %v1583_v44, 2 }
 0x19c   : > { %v1578_v47 = vrot.slane %v1577_v45, 1  ;;  %v1585_v48 = vadd.f32 %v1584_v46, %v1583_v44 }
 0x19e   : > { %v1579_v49 = vadd.f32 %v1578_v47, %v1577_v45  ;;  %v1586_v50 = vrot.slane %v1585_v48, 1 }
 0x1a0   : > { %1580 = vst [vmem:[%s847_s8] sm:$0x1] %v1579_v49  ;;  %v1587_v51 = vadd.f32 %v1586_v50, %v1585_v48 }
 0x1a2   : > { %1588 = vst [vmem:[%s854_s11] sm:$0x1] %v1587_v51 }
 0x1a3 PF: > { %s15_s21 = sadd.s32 1, %s2141_s21   ;;  %s2625_s15 = smov %s2121_s16 }
 0x1a4   : > { %p12_p0 = scmp.ge.s32.totalorder %s15_s21, 38   ;;  %s2626_s16 = smov %s2220_s28 }
 0x1a5   : > { %s2627_s17 = smov %s2133_s19  ;;  %s2628_s18 = smov %s2137_s20 }
 0x1a6   : > { %s2629_s19 = smov %s2632_s22  ;;  %s2630_s20 = smov %s2636_s23 }
 0x1a7   :  { %14 = sbr.rel (!%p12_p0) target bundleno = 4 (0x4), region = 139 }

// kernel: rebuild_encoder_forward.32
= control target key start
LH: loop header
LB: loop body
LE: loop exit
PB: predicated region body
PF: predicated region fallthrough
CT: control target
= control target key end

     0   :  { %s1805_s15 = smov 0   ;;  %s1807_s16 = smov 0   ;;  %s2175_s0 = inlined_call_operand.vmem [shape: bf16[8,4608], index: 0, kind: input, shape index: {}]   ;;  %s2176_s1 = inlined_call_operand.vmem [shape: bf16[4608,512], index: 1, kind: input, shape index: {}]   ;;  %s2177_s2 = inlined_call_operand.vmem [shape: f32[8,512], index: 2, kind: output, shape index: {0}]   ;;  %s2178_s3 = inlined_call_operand.vmem [shape: f32[1,1,512], index: 3, kind: output, shape index: {1}]   ;;  %s2179_s4 = inlined_call_operand.vmem [shape: f32[1,1,512], index: 4, kind: output, shape index: {2}]  }
   0x1   :  { %s1809_s17 = smov 0   ;;  %s1811_s18 = smov 0  }
   0x2   :  { %s1813_s19 = smov 0   ;;  %s1815_s20 = smov 0  }
   0x3   :  { %s1817_s21 = smov 0  }
   0x4 LB: > { %s27_s22 = sadd.s32 1, %s1769_s19  ;;  %s30_s23 = sadd.s32 1, %s1773_s20  ;;  %s1777_s21 = sphi %s1817_s21, %s15_s21   ;;  %s1773_s20 = sphi %s1815_s20, %s2185_s20   ;;  %s1769_s19 = sphi %s1813_s19, %s2184_s19   ;;  %s1765_s18 = sphi %s1811_s18, %s2183_s18   ;;  %s1761_s17 = sphi %s1809_s17, %s2182_s17   ;;  %s1757_s16 = sphi %s1807_s16, %s2181_s16   ;;  %s1753_s15 = sphi %s1805_s15, %s2180_s15  }
   0x5   : > { %p28_p0 = scmp.ge.s32.totalorder %s27_s22, 6  ;;  %p78_p1 = scmp.ne.s32.totalorder %s1757_s16, %s1753_s15 }
   0x6   : > { %p79_p2 = scmp.eq.s32.totalorder %s1777_s21, 0  ;;  %s71_s27 = sadd.s32 1, %s1757_s16 }
   0x7   : > { %s2187_s22 = smov (%p28_p0, %s27_s22), 0  ;;  %s2189_s23 = smov (!%p28_p0, %s30_s23), %s1773_s20 }
   0x8   : > { %p80_p3 = por %p79_p2, %p78_p1  ;;  %p32_p4 = scmp.ge.s32.totalorder %s2189_s23, 4 }
   0x9   : > { %s66_s24 = ssub.s32 %s1769_s19, %s2187_s22  ;;  %p1479_p6 = scmp.ge.s32.totalorder %s1777_s21, 24 }
   0xa   : > { %s2191_s23 = smov (%p32_p4, %s2189_s23), 0 }
   0xb   : > { %s67_s25 = ssub.s32 %s1773_s20, %s2191_s23  ;;  %188 = sbr.rel (%p1479_p6) target bundleno = 87 (0x57), region = 16 }
   0xc   : > { %s68_s26 = sor.u32 %s67_s25, %s66_s24 }
   0xd   : > { %p69_p5 = scmp.eq.s32.totalorder %s68_s26, 0 }
   0xf   : > { %s1856_s28 = scalar_select %p69_p5, %s1757_s16, %s71_s27  }
  0x10   : > { %204 = sbr.rel (!%p80_p3) target bundleno = 87 (0x57), region = 24  ;;  %s206_s29 = sand.u32 (%p80_p3), 1, %s1757_s16  }
  0x11   : > { %s1543_s30 = smul.u32 (%p80_p3), 384, %s1769_s19 }
  0x12   : > { %s1610_s5 = smul.u32 (%p80_p3), 384, %s206_s29 }
  0x13   : > { %s211_s6 = sadd.s32 (%p80_p3), %s1773_s20, %s1543_s30 }
  0x14   : > { %s1481_s7 = sshll.u32 (%p80_p3), %s211_s6, 2  ;;  %s1870_s11 = scalar_lea.vmem (%p80_p3), [#allocation3], %s1610_s5 }
  0x15   : > { %s1865_s10 = scalar_lea.vmem %s2176_s1, %s1481_s7 }
  0x16   : > { %v230_v0 = vld [vmem:[%s1865_s10] sm:$0xf]  ;;  %v232_v1 = vld [vmem:[%s1865_s10 + $0x10] sm:$0xf] }
  0x17   : > { %v234_v2 = vld [vmem:[%s1865_s10 + $0x20] sm:$0xf]  ;;  %231 = vst [vmem:[%s1870_s11] sm:$0xf] %v230_v0  ;;  %233 = vst [vmem:[%s1870_s11 + $0x4] sm:$0xf] %v232_v1 }
  0x18   : > { %235 = vst [vmem:[%s1870_s11 + $0x8] sm:$0xf] %v234_v2  ;;  %v236_v3 = vld [vmem:[%s1865_s10 + $0x30] sm:$0xf]  ;;  %v238_v4 = vld [vmem:[%s1865_s10 + $0x40] sm:$0xf] }
  0x19   : > { %v240_v5 = vld [vmem:[%s1865_s10 + $0x50] sm:$0xf]  ;;  %237 = vst [vmem:[%s1870_s11 + $0xc] sm:$0xf] %v236_v3  ;;  %239 = vst [vmem:[%s1870_s11 + $0x10] sm:$0xf] %v238_v4 }
  0x1a   : > { %241 = vst [vmem:[%s1870_s11 + $0x14] sm:$0xf] %v240_v5  ;;  %v242_v6 = vld [vmem:[%s1865_s10 + $0x60] sm:$0xf]  ;;  %v244_v7 = vld [vmem:[%s1865_s10 + $0x70] sm:$0xf] }
  0x1b   : > { %v246_v8 = vld [vmem:[%s1865_s10 + $0x80] sm:$0xf]  ;;  %243 = vst [vmem:[%s1870_s11 + $0x18] sm:$0xf] %v242_v6  ;;  %245 = vst [vmem:[%s1870_s11 + $0x1c] sm:$0xf] %v244_v7 }
  0x1c   : > { %247 = vst [vmem:[%s1870_s11 + $0x20] sm:$0xf] %v246_v8  ;;  %v248_v9 = vld [vmem:[%s1865_s10 + $0x90] sm:$0xf]  ;;  %v250_v10 = vld [vmem:[%s1865_s10 + $0xa0] sm:$0xf] }
  0x1d   : > { %v252_v11 = vld [vmem:[%s1865_s10 + $0xb0] sm:$0xf]  ;;  %249 = vst [vmem:[%s1870_s11 + $0x24] sm:$0xf] %v248_v9  ;;  %251 = vst [vmem:[%s1870_s11 + $0x28] sm:$0xf] %v250_v10 }
  0x1e   : > { %253 = vst [vmem:[%s1870_s11 + $0x2c] sm:$0xf] %v252_v11  ;;  %v254_v12 = vld [vmem:[%s1865_s10 + $0xc0] sm:$0xf]  ;;  %v256_v13 = vld [vmem:[%s1865_s10 + $0xd0] sm:$0xf] }
  0x1f   : > { %v258_v14 = vld [vmem:[%s1865_s10 + $0xe0] sm:$0xf]  ;;  %255 = vst [vmem:[%s1870_s11 + $0x30] sm:$0xf] %v254_v12  ;;  %257 = vst [vmem:[%s1870_s11 + $0x34] sm:$0xf] %v256_v13 }
  0x20   : > { %259 = vst [vmem:[%s1870_s11 + $0x38] sm:$0xf] %v258_v14  ;;  %v260_v15 = vld [vmem:[%s1865_s10 + $0xf0] sm:$0xf]  ;;  %v262_v16 = vld [vmem:[%s1865_s10 + $0x100] sm:$0xf] }
  0x21   : > { %v264_v17 = vld [vmem:[%s1865_s10 + $0x110] sm:$0xf]  ;;  %261 = vst [vmem:[%s1870_s11 + $0x3c] sm:$0xf] %v260_v15  ;;  %263 = vst [vmem:[%s1870_s11 + $0x40] sm:$0xf] %v262_v16 }
  0x22   : > { %265 = vst [vmem:[%s1870_s11 + $0x44] sm:$0xf] %v264_v17  ;;  %v266_v18 = vld [vmem:[%s1865_s10 + $0x120] sm:$0xf]  ;;  %v268_v19 = vld [vmem:[%s1865_s10 + $0x130] sm:$0xf] }
  0x23   : > { %v270_v20 = vld [vmem:[%s1865_s10 + $0x140] sm:$0xf]  ;;  %267 = vst [vmem:[%s1870_s11 + $0x48] sm:$0xf] %v266_v18  ;;  %269 = vst [vmem:[%s1870_s11 + $0x4c] sm:$0xf] %v268_v19 }
  0x24   : > { %271 = vst [vmem:[%s1870_s11 + $0x50] sm:$0xf] %v270_v20  ;;  %v272_v21 = vld [vmem:[%s1865_s10 + $0x150] sm:$0xf]  ;;  %v274_v22 = vld [vmem:[%s1865_s10 + $0x160] sm:$0xf] }
  0x25   : > { %v276_v23 = vld [vmem:[%s1865_s10 + $0x170] sm:$0xf]  ;;  %273 = vst [vmem:[%s1870_s11 + $0x54] sm:$0xf] %v272_v21  ;;  %275 = vst [vmem:[%s1870_s11 + $0x58] sm:$0xf] %v274_v22 }
  0x26   : > { %277 = vst [vmem:[%s1870_s11 + $0x5c] sm:$0xf] %v276_v23  ;;  %v278_v24 = vld [vmem:[%s1865_s10 + $0x180] sm:$0xf]  ;;  %v280_v25 = vld [vmem:[%s1865_s10 + $0x190] sm:$0xf] }
  0x27   : > { %v282_v26 = vld [vmem:[%s1865_s10 + $0x1a0] sm:$0xf]  ;;  %279 = vst [vmem:[%s1870_s11 + $0x60] sm:$0xf] %v278_v24  ;;  %281 = vst [vmem:[%s1870_s11 + $0x64] sm:$0xf] %v280_v25 }
  0x28   : > { %283 = vst [vmem:[%s1870_s11 + $0x68] sm:$0xf] %v282_v26  ;;  %v284_v27 = vld [vmem:[%s1865_s10 + $0x1b0] sm:$0xf]  ;;  %v286_v28 = vld [vmem:[%s1865_s10 + $0x1c0] sm:$0xf] }
  0x29   : > { %v288_v29 = vld [vmem:[%s1865_s10 + $0x1d0] sm:$0xf]  ;;  %285 = vst [vmem:[%s1870_s11 + $0x6c] sm:$0xf] %v284_v27  ;;  %287 = vst [vmem:[%s1870_s11 + $0x70] sm:$0xf] %v286_v28 }
  0x2a   : > { %289 = vst [vmem:[%s1870_s11 + $0x74] sm:$0xf] %v288_v29  ;;  %v290_v30 = vld [vmem:[%s1865_s10 + $0x1e0] sm:$0xf]  ;;  %v292_v31 = vld [vmem:[%s1865_s10 + $0x1f0] sm:$0xf] }
  0x2b   : > { %v294_v32 = vld [vmem:[%s1865_s10 + $0x200] sm:$0xf]  ;;  %291 = vst [vmem:[%s1870_s11 + $0x78] sm:$0xf] %v290_v30  ;;  %293 = vst [vmem:[%s1870_s11 + $0x7c] sm:$0xf] %v292_v31 }
  0x2c   : > { %295 = vst [vmem:[%s1870_s11 + $0x80] sm:$0xf] %v294_v32  ;;  %v296_v33 = vld [vmem:[%s1865_s10 + $0x210] sm:$0xf]  ;;  %v298_v34 = vld [vmem:[%s1865_s10 + $0x220] sm:$0xf] }
  0x2d   : > { %v300_v35 = vld [vmem:[%s1865_s10 + $0x230] sm:$0xf]  ;;  %297 = vst [vmem:[%s1870_s11 + $0x84] sm:$0xf] %v296_v33  ;;  %299 = vst [vmem:[%s1870_s11 + $0x88] sm:$0xf] %v298_v34 }
  0x2e   : > { %301 = vst [vmem:[%s1870_s11 + $0x8c] sm:$0xf] %v300_v35  ;;  %v302_v36 = vld [vmem:[%s1865_s10 + $0x240] sm:$0xf]  ;;  %v304_v37 = vld [vmem:[%s1865_s10 + $0x250] sm:$0xf] }
  0x2f   : > { %v306_v38 = vld [vmem:[%s1865_s10 + $0x260] sm:$0xf]  ;;  %303 = vst [vmem:[%s1870_s11 + $0x90] sm:$0xf] %v302_v36  ;;  %305 = vst [vmem:[%s1870_s11 + $0x94] sm:$0xf] %v304_v37 }
  0x30   : > { %307 = vst [vmem:[%s1870_s11 + $0x98] sm:$0xf] %v306_v38  ;;  %v308_v39 = vld [vmem:[%s1865_s10 + $0x270] sm:$0xf]  ;;  %v310_v40 = vld [vmem:[%s1865_s10 + $0x280] sm:$0xf] }
  0x31   : > { %v312_v41 = vld [vmem:[%s1865_s10 + $0x290] sm:$0xf]  ;;  %309 = vst [vmem:[%s1870_s11 + $0x9c] sm:$0xf] %v308_v39  ;;  %311 = vst [vmem:[%s1870_s11 + $0xa0] sm:$0xf] %v310_v40 }
  0x32   : > { %313 = vst [vmem:[%s1870_s11 + $0xa4] sm:$0xf] %v312_v41  ;;  %v314_v42 = vld [vmem:[%s1865_s10 + $0x2a0] sm:$0xf]  ;;  %v316_v43 = vld [vmem:[%s1865_s10 + $0x2b0] sm:$0xf] }
  0x33   : > { %v318_v44 = vld [vmem:[%s1865_s10 + $0x2c0] sm:$0xf]  ;;  %315 = vst [vmem:[%s1870_s11 + $0xa8] sm:$0xf] %v314_v42  ;;  %317 = vst [vmem:[%s1870_s11 + $0xac] sm:$0xf] %v316_v43 }
  0x34   : > { %319 = vst [vmem:[%s1870_s11 + $0xb0] sm:$0xf] %v318_v44  ;;  %v320_v45 = vld [vmem:[%s1865_s10 + $0x2d0] sm:$0xf]  ;;  %v322_v46 = vld [vmem:[%s1865_s10 + $0x2e0] sm:$0xf] }
  0x35   : > { %v324_v47 = vld [vmem:[%s1865_s10 + $0x2f0] sm:$0xf]  ;;  %321 = vst [vmem:[%s1870_s11 + $0xb4] sm:$0xf] %v320_v45  ;;  %323 = vst [vmem:[%s1870_s11 + $0xb8] sm:$0xf] %v322_v46 }
  0x36   : > { %325 = vst [vmem:[%s1870_s11 + $0xbc] sm:$0xf] %v324_v47  ;;  %v326_v48 = vld [vmem:[%s1865_s10 + $0x300] sm:$0xf]  ;;  %v328_v49 = vld [vmem:[%s1865_s10 + $0x310] sm:$0xf] }
  0x37   : > { %v330_v50 = vld [vmem:[%s1865_s10 + $0x320] sm:$0xf]  ;;  %327 = vst [vmem:[%s1870_s11 + $0xc0] sm:$0xf] %v326_v48  ;;  %329 = vst [vmem:[%s1870_s11 + $0xc4] sm:$0xf] %v328_v49 }
  0x38   : > { %331 = vst [vmem:[%s1870_s11 + $0xc8] sm:$0xf] %v330_v50  ;;  %v332_v51 = vld [vmem:[%s1865_s10 + $0x330] sm:$0xf]  ;;  %v334_v52 = vld [vmem:[%s1865_s10 + $0x340] sm:$0xf] }
  0x39   : > { %v336_v53 = vld [vmem:[%s1865_s10 + $0x350] sm:$0xf]  ;;  %333 = vst [vmem:[%s1870_s11 + $0xcc] sm:$0xf] %v332_v51  ;;  %335 = vst [vmem:[%s1870_s11 + $0xd0] sm:$0xf] %v334_v52 }
  0x3a   : > { %337 = vst [vmem:[%s1870_s11 + $0xd4] sm:$0xf] %v336_v53  ;;  %v338_v54 = vld [vmem:[%s1865_s10 + $0x360] sm:$0xf]  ;;  %v340_v55 = vld [vmem:[%s1865_s10 + $0x370] sm:$0xf] }
  0x3b   : > { %v342_v56 = vld [vmem:[%s1865_s10 + $0x380] sm:$0xf]  ;;  %339 = vst [vmem:[%s1870_s11 + $0xd8] sm:$0xf] %v338_v54  ;;  %341 = vst [vmem:[%s1870_s11 + $0xdc] sm:$0xf] %v340_v55 }
  0x3c   : > { %343 = vst [vmem:[%s1870_s11 + $0xe0] sm:$0xf] %v342_v56  ;;  %v344_v57 = vld [vmem:[%s1865_s10 + $0x390] sm:$0xf]  ;;  %v346_v58 = vld [vmem:[%s1865_s10 + $0x3a0] sm:$0xf] }
  0x3d   : > { %v348_v59 = vld [vmem:[%s1865_s10 + $0x3b0] sm:$0xf]  ;;  %345 = vst [vmem:[%s1870_s11 + $0xe4] sm:$0xf] %v344_v57  ;;  %347 = vst [vmem:[%s1870_s11 + $0xe8] sm:$0xf] %v346_v58 }
  0x3e   : > { %349 = vst [vmem:[%s1870_s11 + $0xec] sm:$0xf] %v348_v59  ;;  %v350_v60 = vld [vmem:[%s1865_s10 + $0x3c0] sm:$0xf]  ;;  %v352_v61 = vld [vmem:[%s1865_s10 + $0x3d0] sm:$0xf] }
  0x3f   : > { %v354_v62 = vld [vmem:[%s1865_s10 + $0x3e0] sm:$0xf]  ;;  %351 = vst [vmem:[%s1870_s11 + $0xf0] sm:$0xf] %v350_v60  ;;  %353 = vst [vmem:[%s1870_s11 + $0xf4] sm:$0xf] %v352_v61 }
  0x40   : > { %355 = vst [vmem:[%s1870_s11 + $0xf8] sm:$0xf] %v354_v62  ;;  %v356_v63 = vld [vmem:[%s1865_s10 + $0x3f0] sm:$0xf]  ;;  %v358_v0 = vld [vmem:[%s1865_s10 + $0x400] sm:$0xf] }
  0x41   : > { %v360_v1 = vld [vmem:[%s1865_s10 + $0x410] sm:$0xf]  ;;  %357 = vst [vmem:[%s1870_s11 + $0xfc] sm:$0xf] %v356_v63  ;;  %359 = vst [vmem:[%s1870_s11 + $0x100] sm:$0xf] %v358_v0 }
  0x42   : > { %361 = vst [vmem:[%s1870_s11 + $0x104] sm:$0xf] %v360_v1  ;;  %v362_v2 = vld [vmem:[%s1865_s10 + $0x420] sm:$0xf]  ;;  %v364_v3 = vld [vmem:[%s1865_s10 + $0x430] sm:$0xf] }
  0x43   : > { %v366_v4 = vld [vmem:[%s1865_s10 + $0x440] sm:$0xf]  ;;  %363 = vst [vmem:[%s1870_s11 + $0x108] sm:$0xf] %v362_v2  ;;  %365 = vst [vmem:[%s1870_s11 + $0x10c] sm:$0xf] %v364_v3 }
  0x44   : > { %367 = vst [vmem:[%s1870_s11 + $0x110] sm:$0xf] %v366_v4  ;;  %v368_v5 = vld [vmem:[%s1865_s10 + $0x450] sm:$0xf]  ;;  %v370_v6 = vld [vmem:[%s1865_s10 + $0x460] sm:$0xf] }
  0x45   : > { %v372_v7 = vld [vmem:[%s1865_s10 + $0x470] sm:$0xf]  ;;  %369 = vst [vmem:[%s1870_s11 + $0x114] sm:$0xf] %v368_v5  ;;  %371 = vst [vmem:[%s1870_s11 + $0x118] sm:$0xf] %v370_v6 }
  0x46   : > { %373 = vst [vmem:[%s1870_s11 + $0x11c] sm:$0xf] %v372_v7  ;;  %v374_v8 = vld [vmem:[%s1865_s10 + $0x480] sm:$0xf]  ;;  %v376_v9 = vld [vmem:[%s1865_s10 + $0x490] sm:$0xf] }
  0x47   : > { %v378_v10 = vld [vmem:[%s1865_s10 + $0x4a0] sm:$0xf]  ;;  %375 = vst [vmem:[%s1870_s11 + $0x120] sm:$0xf] %v374_v8  ;;  %377 = vst [vmem:[%s1870_s11 + $0x124] sm:$0xf] %v376_v9 }
  0x48   : > { %379 = vst [vmem:[%s1870_s11 + $0x128] sm:$0xf] %v378_v10  ;;  %v380_v11 = vld [vmem:[%s1865_s10 + $0x4b0] sm:$0xf]  ;;  %v382_v12 = vld [vmem:[%s1865_s10 + $0x4c0] sm:$0xf] }
  0x49   : > { %v384_v13 = vld [vmem:[%s1865_s10 + $0x4d0] sm:$0xf]  ;;  %381 = vst [vmem:[%s1870_s11 + $0x12c] sm:$0xf] %v380_v11  ;;  %383 = vst [vmem:[%s1870_s11 + $0x130] sm:$0xf] %v382_v12 }
  0x4a   : > { %385 = vst [vmem:[%s1870_s11 + $0x134] sm:$0xf] %v384_v13  ;;  %v386_v14 = vld [vmem:[%s1865_s10 + $0x4e0] sm:$0xf]  ;;  %v388_v15 = vld [vmem:[%s1865_s10 + $0x4f0] sm:$0xf] }
  0x4b   : > { %v390_v16 = vld [vmem:[%s1865_s10 + $0x500] sm:$0xf]  ;;  %387 = vst [vmem:[%s1870_s11 + $0x138] sm:$0xf] %v386_v14  ;;  %389 = vst [vmem:[%s1870_s11 + $0x13c] sm:$0xf] %v388_v15 }
  0x4c   : > { %391 = vst [vmem:[%s1870_s11 + $0x140] sm:$0xf] %v390_v16  ;;  %v392_v17 = vld [vmem:[%s1865_s10 + $0x510] sm:$0xf]  ;;  %v394_v18 = vld [vmem:[%s1865_s10 + $0x520] sm:$0xf] }
  0x4d   : > { %v396_v19 = vld [vmem:[%s1865_s10 + $0x530] sm:$0xf]  ;;  %393 = vst [vmem:[%s1870_s11 + $0x144] sm:$0xf] %v392_v17  ;;  %395 = vst [vmem:[%s1870_s11 + $0x148] sm:$0xf] %v394_v18 }
  0x4e   : > { %397 = vst [vmem:[%s1870_s11 + $0x14c] sm:$0xf] %v396_v19  ;;  %v398_v20 = vld [vmem:[%s1865_s10 + $0x540] sm:$0xf]  ;;  %v400_v21 = vld [vmem:[%s1865_s10 + $0x550] sm:$0xf] }
  0x4f   : > { %v402_v22 = vld [vmem:[%s1865_s10 + $0x560] sm:$0xf]  ;;  %399 = vst [vmem:[%s1870_s11 + $0x150] sm:$0xf] %v398_v20  ;;  %401 = vst [vmem:[%s1870_s11 + $0x154] sm:$0xf] %v400_v21 }
  0x50   : > { %403 = vst [vmem:[%s1870_s11 + $0x158] sm:$0xf] %v402_v22  ;;  %v404_v23 = vld [vmem:[%s1865_s10 + $0x570] sm:$0xf]  ;;  %v406_v24 = vld [vmem:[%s1865_s10 + $0x580] sm:$0xf] }
  0x51   : > { %v408_v25 = vld [vmem:[%s1865_s10 + $0x590] sm:$0xf]  ;;  %405 = vst [vmem:[%s1870_s11 + $0x15c] sm:$0xf] %v404_v23  ;;  %407 = vst [vmem:[%s1870_s11 + $0x160] sm:$0xf] %v406_v24 }
  0x52   : > { %409 = vst [vmem:[%s1870_s11 + $0x164] sm:$0xf] %v408_v25  ;;  %v410_v26 = vld [vmem:[%s1865_s10 + $0x5a0] sm:$0xf]  ;;  %v412_v27 = vld [vmem:[%s1865_s10 + $0x5b0] sm:$0xf] }
  0x53   : > { %v414_v28 = vld [vmem:[%s1865_s10 + $0x5c0] sm:$0xf]  ;;  %411 = vst [vmem:[%s1870_s11 + $0x168] sm:$0xf] %v410_v26  ;;  %413 = vst [vmem:[%s1870_s11 + $0x16c] sm:$0xf] %v412_v27 }
  0x54   : > { %415 = vst [vmem:[%s1870_s11 + $0x170] sm:$0xf] %v414_v28  ;;  %v416_v29 = vld [vmem:[%s1865_s10 + $0x5d0] sm:$0xf]  ;;  %v418_v30 = vld [vmem:[%s1865_s10 + $0x5e0] sm:$0xf] }
  0x55   : > { %v420_v31 = vld [vmem:[%s1865_s10 + $0x5f0] sm:$0xf]  ;;  %417 = vst [vmem:[%s1870_s11 + $0x174] sm:$0xf] %v416_v29  ;;  %419 = vst [vmem:[%s1870_s11 + $0x178] sm:$0xf] %v418_v30 }
  0x56   : > { %421 = vst [vmem:[%s1870_s11 + $0x17c] sm:$0xf] %v420_v31 }
  0x57 PF: > { %p1482_p7 = scmp.ge.s32.totalorder %s1777_s21, 1  ;;  %p636_p8 = scmp.lt.s32.totalorder %s1777_s21, 25 }
  0x59   : > { %p637_p9 = pnand %p1482_p7, %p636_p8 }
  0x5a   : > { %s643_s12 = sand.u32 (!%p637_p9), 1, %s1753_s15   ;;  %s694_s13 = smul.u32 (!%p637_p9), 6, %s1761_s17 }
  0x5b   : > { %640 = sbr.rel (%p637_p9) target bundleno = 397 (0x18d), region = 65  ;;  %p707_p10 = scmp.lt.s32.totalorder (!%p637_p9), %s1765_s18, 3 }
  0x5c   : > { %s1611_s14 = smul.u32 (!%p637_p9), 384, %s643_s12  ;;  %p697_p11 = scmp.lt.s32.totalorder (!%p637_p9), %s694_s13, 35 }
  0x5d   : > { %p1485_p12 = scmp.ne.s32.totalorder (!%p637_p9), %s1761_s17, 0 }
  0x5e   : > { %s2088_s12 = scalar_lea.vmem (!%p637_p9), [#allocation3], %s1611_s14 }
  0x60   : > { %s2193_s13 = smov (!%p697_p11, %s694_s13), 35  ;;  %s2195_s18 = smov (!%p707_p10, %s1765_s18), 3 }
  0x61   : > { %s1483_s24 = sshll.u32 %s2193_s13, 2  ;;  %s1484_s29 = sshll.u32 %s2195_s18, 3 }
  0x62   : > { %s2072_s27 = scalar_lea.vmem %s2175_s0, %s1483_s24  ;;  %s2078_s15 = scalar_lea.vmem %s2177_s2, %s1484_s29 }
  0x63   : > { %s719_s8 = scalar_lea.vmem %s2178_s3, %s2195_s18  ;;  %s726_s11 = scalar_lea.vmem %s2179_s4, %s2195_s18 }
  0x64   : > { %731 = sbr.rel (%p1485_p12) target bundleno = 107 (0x6b), region = 73 }
  0x69   : > { %v1779_v32 = vmov 0.0  }
  0x6a   : > { %732 = vst [vmem:[#allocation2] sm:$0xff] %v1779_v32 }
  0x6b PF: > { %v1669_v33 = vld [vmem:[%s2088_s12 + $0x78] sm:$0xff]   ;;  %v1673_v37 = vld [vmem:[%s2088_s12 + $0x70] sm:$0xff]   ;;  %v1677_v41 = vld [vmem:[%s2088_s12 + $0x68] sm:$0xff]   ;;  %p1540_p13 = scmp.ne.s32.totalorder %s1761_s17, 5 }
  0x6c   : > { %v1670_v34 = vld [vmem:[%s2088_s12 + $0xf8] sm:$0xff]   ;;  %1544 = vmatprep.subr.bf16.mxu0 %v1669_v33  ;;  %v1674_v38 = vld [vmem:[%s2088_s12 + $0xf0] sm:$0xff]   ;;  %v1678_v42 = vld [vmem:[%s2088_s12 + $0xe8] sm:$0xff]  }
  0x6d   : > { %v1671_v35 = vld [vmem:[%s2088_s12 + $0x38] sm:$0xff]   ;;  %1566 = vmatprep.subr.bf16.mxu1 %v1670_v34  ;;  %v1675_v39 = vld [vmem:[%s2088_s12 + $0x30] sm:$0xff]   ;;  %v1679_v43 = vld [vmem:[%s2088_s12 + $0x28] sm:$0xff]  }
  0x6e   : > { %v1672_v36 = vld [vmem:[%s2088_s12 + $0xb8] sm:$0xff]   ;;  %1545 = vmatpush3.bf16.msra.mxu0 %v1671_v35  ;;  %v1676_v40 = vld [vmem:[%s2088_s12 + $0xb0] sm:$0xff]   ;;  %v1680_v44 = vld [vmem:[%s2088_s12 + $0xa8] sm:$0xff]  }
  0x6f   : > { %1567 = vmatpush3.bf16.msra.mxu1 %v1672_v36  ;;  %1546 = vmatprep.subr.bf16.mxu0 %v1673_v37  ;;  %v1681_v45 = vld [vmem:[%s2088_s12 + $0x60] sm:$0xff]   ;;  %v1685_v49 = vld [vmem:[%s2088_s12 + $0x58] sm:$0xff]   ;;  %v1689_v53 = vld [vmem:[%s2088_s12 + $0x50] sm:$0xff]  }
  0x70   : > { %1568 = vmatprep.subr.bf16.mxu1 %v1674_v38  ;;  %v1682_v46 = vld [vmem:[%s2088_s12 + $0xe0] sm:$0xff]   ;;  %v1686_v50 = vld [vmem:[%s2088_s12 + $0xd8] sm:$0xff]   ;;  %v1690_v54 = vld [vmem:[%s2088_s12 + $0xd0] sm:$0xff]  }
  0x71   : > { %v1683_v47 = vld [vmem:[%s2088_s12 + $0x20] sm:$0xff]   ;;  %v1687_v51 = vld [vmem:[%s2088_s12 + $0x18] sm:$0xff]   ;;  %v1691_v55 = vld [vmem:[%s2088_s12 + $0x10] sm:$0xff]  }
  0x72   : > { %1547 = vmatpush3.bf16.msra.mxu0 %v1675_v39  ;;  %v1684_v48 = vld [vmem:[%s2088_s12 + $0xa0] sm:$0xff]   ;;  %v1688_v52 = vld [vmem:[%s2088_s12 + $0x98] sm:$0xff]   ;;  %v1692_v56 = vld [vmem:[%s2088_s12 + $0x90] sm:$0xff]  }
  0x73   : > { %1569 = vmatpush3.bf16.msra.mxu1 %v1676_v40  ;;  %1548 = vmatprep.subr.bf16.mxu0 %v1677_v41  ;;  %v1693_v57 = vld [vmem:[%s2088_s12 + $0x48] sm:$0xff]   ;;  %v1697_v61 = vld [vmem:[%s2088_s12 + $0x40] sm:$0xff]   ;;  %v734_v1 = vld [vmem:[%s2072_s27] sm:$0xff] }
  0x74   : > { %1570 = vmatprep.subr.bf16.mxu1 %v1678_v42  ;;  %v1694_v58 = vld [vmem:[%s2088_s12 + $0xc8] sm:$0xff]   ;;  %v1698_v62 = vld [vmem:[%s2088_s12 + $0xc0] sm:$0xff]   ;;  %v1486_v3 = vcombine.low %v734_v1, %v734_v1  ;;  %v1487_v4 = vcombine.high %v734_v1, %v734_v1  ;;  %v1705_v7 = vld [vmem:[%s2088_s12 + $0x178] sm:$0xff]  }
  0x75   : > { %v1695_v59 = vld [vmem:[%s2088_s12 + $0x8] sm:$0xff]   ;;  %v1699_v63 = vld [vmem:[%s2088_s12] sm:$0xff]   ;;  %v1706_v8 = vld [vmem:[%s2088_s12 + $0x138] sm:$0xff]  }
  0x76   : > { %1549 = vmatpush3.bf16.msra.mxu0 %v1679_v43  ;;  %v1696_v60 = vld [vmem:[%s2088_s12 + $0x88] sm:$0xff]   ;;  %v1700_v0 = vld [vmem:[%s2088_s12 + $0x80] sm:$0xff]   ;;  %1174 = vmatprep.mubr.bf16.mxu0 %v1487_v4  ;;  %v1707_v9 = vld [vmem:[%s2088_s12 + $0x170] sm:$0xff]  }
  0x77   : > { %1571 = vmatpush3.bf16.msra.mxu1 %v1680_v44  ;;  %1550 = vmatprep.subr.bf16.mxu0 %v1681_v45  ;;  %v735_v2 = vld [vmem:[%s2072_s27 + $0x8] sm:$0xff]  ;;  %v1708_v10 = vld [vmem:[%s2088_s12 + $0x130] sm:$0xff]   ;;  %v1709_v11 = vld [vmem:[%s2088_s12 + $0x168] sm:$0xff]  }
  0x78   : > { %1572 = vmatprep.subr.bf16.mxu1 %v1682_v46  ;;  %v1488_v5 = vcombine.low %v735_v2, %v735_v2  ;;  %v1489_v6 = vcombine.high %v735_v2, %v735_v2  ;;  %v1710_v12 = vld [vmem:[%s2088_s12 + $0x128] sm:$0xff]   ;;  %v1711_v13 = vld [vmem:[%s2088_s12 + $0x160] sm:$0xff]   ;;  %v1713_v15 = vld [vmem:[%s2088_s12 + $0x158] sm:$0xff]  }
  0x79   : > { %v1712_v14 = vld [vmem:[%s2088_s12 + $0x120] sm:$0xff]   ;;  %v736_v16 = vld [vmem:[%s2072_s27 + $0x10] sm:$0xff]  ;;  %v1714_v18 = vld [vmem:[%s2088_s12 + $0x118] sm:$0xff]  }
  0x7a   : > { %1551 = vmatpush3.bf16.msra.mxu0 %v1683_v47  ;;  %1214 = vmatprep.mubr.bf16.mxu1 %v1489_v6  ;;  %v1491_v17 = vcombine.high %v736_v16, %v736_v16  ;;  %v1715_v19 = vld [vmem:[%s2088_s12 + $0x150] sm:$0xff]   ;;  %v1717_v21 = vld [vmem:[%s2088_s12 + $0x148] sm:$0xff]   ;;  %v1719_v23 = vld [vmem:[%s2088_s12 + $0x140] sm:$0xff]   ;;  %v1490_v25 = vcombine.low %v736_v16, %v736_v16 }
  0x7b   : > { %1573 = vmatpush3.bf16.msra.mxu1 %v1684_v48  ;;  %1552 = vmatprep.subr.bf16.mxu0 %v1685_v49  ;;  %v1716_v20 = vld [vmem:[%s2088_s12 + $0x110] sm:$0xff]   ;;  %v1718_v22 = vld [vmem:[%s2088_s12 + $0x108] sm:$0xff]   ;;  %v1720_v24 = vld [vmem:[%s2088_s12 + $0x100] sm:$0xff]  }
  0x7c   : > { %1574 = vmatprep.subr.bf16.mxu1 %v1686_v50  ;;  %v733_v40 = vld [vmem:[#allocation2] sm:$0xff] }
  0x7e   : > { %1553 = vmatpush3.bf16.msra.mxu0 %v1687_v51 }
  0x7f   : > { %1575 = vmatpush3.bf16.msra.mxu1 %v1688_v52  ;;  %1554 = vmatprep.subr.bf16.mxu0 %v1689_v53 }
  0x80   : > { %1576 = vmatprep.subr.bf16.mxu1 %v1690_v54 }
  0x82   : > { %1555 = vmatpush3.bf16.msra.mxu0 %v1691_v55 }
  0x83   : > { %1577 = vmatpush3.bf16.msra.mxu1 %v1692_v56  ;;  %1556 = vmatprep.subr.bf16.mxu0 %v1693_v57 }
  0x84   : > { %1578 = vmatprep.subr.bf16.mxu1 %v1694_v58 }
  0x86   : > { %1557 = vmatpush3.bf16.msra.mxu0 %v1695_v59 }
  0x87   : > { %1579 = vmatpush3.bf16.msra.mxu1 %v1696_v60  ;;  %1558 = vmatprep.subr.bf16.mxu0 %v1697_v61 }
  0x88   : > { %1580 = vmatprep.subr.bf16.mxu1 %v1698_v62 }
  0x8a   : > { %1559 = vmatpush3.bf16.msra.mxu0 %v1699_v63 }
  0x8b   : > { %1581 = vmatpush3.bf16.msra.mxu1 %v1700_v0  ;;  %1588 = vmatprep.subr.bf16.mxu0 %v1705_v7 }
  0x8d   : > { %1175 = vmatmul.mubr.bf16.vlgmr.msra.gmra.mxu0 %v1486_v3 }
  0x8e   : > { %1215 = vmatmul.mubr.bf16.vlgmr.msra.gmra.mxu1 %v1488_v5  ;;  %1589 = vmatpush3.bf16.msra.mxu0 %v1706_v8 }
  0x8f   : > { %1590 = vmatprep.subr.bf16.mxu0 %v1707_v9  ;;  %1254 = vmatprep.mubr.bf16.mxu0 %v1491_v17 }
  0x92   : > { %1591 = vmatpush3.bf16.msra.mxu0 %v1708_v10 }
  0x93   : > { %1592 = vmatprep.subr.bf16.mxu0 %v1709_v11 }
  0x96   : > { %1593 = vmatpush3.bf16.msra.mxu0 %v1710_v12 }
  0x97   : > { %1594 = vmatprep.subr.bf16.mxu0 %v1711_v13 }
  0x9a   : > { %1595 = vmatpush3.bf16.msra.mxu0 %v1712_v14 }
  0x9b   : > { %1596 = vmatprep.subr.bf16.mxu0 %v1713_v15 }
  0x9e   : > { %1597 = vmatpush3.bf16.msra.mxu0 %v1714_v18 }
  0x9f   : > { %1598 = vmatprep.subr.bf16.mxu0 %v1715_v19 }
  0xa2   : > { %1599 = vmatpush3.bf16.msra.mxu0 %v1716_v20 }
  0xa3   : > { %1600 = vmatprep.subr.bf16.mxu0 %v1717_v21 }
  0xa6   : > { %1601 = vmatpush3.bf16.msra.mxu0 %v1718_v22 }
  0xa7   : > { %1602 = vmatprep.subr.bf16.mxu0 %v1719_v23 }
  0xaa   : > { %1603 = vmatpush3.bf16.msra.mxu0 %v1720_v24 }
  0xad   : > { %1255 = vmatmul.mubr.bf16.vlgmr.msra.gmra.mxu0 %v1490_v25 }
 0x14d   : > { %v1560_v26 = vpop.f32.mrf.mxu0 }
 0x14e   : > { %v1582_v27 = vpop.f32.mrf.mxu1 }
 0x14f   : > { %v1561_v28 = vpop.f32.mrf.mxu0 }
 0x150   : > { %v1583_v29 = vpop.f32.mrf.mxu1  ;;  %v1562_v34 = vadd.f32 %v1561_v28, %v1560_v26 }
 0x151   : > { %v1563_v30 = vpop.f32.mrf.mxu0  ;;  %v1584_v35 = vadd.f32 %v1583_v29, %v1582_v27 }
 0x152   : > { %v1585_v31 = vpop.f32.mrf.mxu1 }
 0x153   : > { %v1564_v32 = vpop.f32.mrf.mxu0  ;;  %v1217_v38 = vadd.f32 %v1584_v35, %v1562_v34 }
 0x154   : > { %v1586_v33 = vpop.f32.mrf.mxu1 }
 0x16d   : > { %v1604_v36 = vpop.f32.mrf.mxu0 }
 0x16f   : > { %v1605_v37 = vpop.f32.mrf.mxu0 }
 0x170   : > { %v1606_v39 = vadd.f32 %v1605_v37, %v1604_v36 }
 0x171   : > { %v1607_v41 = vpop.f32.mrf.mxu0 }
 0x172   : > { %v1257_v42 = vadd.f32 %v1606_v39, %v1217_v38  ;;  %1267 = sbr.rel (%p1540_p13) target bundleno = 397 (0x18d), region = 77 }
 0x173   : > { %v1608_v43 = vpop.f32.mrf.mxu0 }
 0x174   : > { %v1262_v44 = vadd.f32 %v1257_v42, %v733_v40 }
 0x176   : > { %1263 = vst [vmem:[#allocation2] sm:$0xff] %v1262_v44 }
 0x17d   : > { %v1268_v45 = vld [vmem:[#allocation2] sm:$0xff] }
 0x17e   : > { %1269 = vst [vmem:[%s2078_s15] sm:$0xff] %v1268_v45  ;;  %v1270_v46 = vrot.slane %v1268_v45, 4  ;;  %v1277_v47 = vmul.f32 %v1268_v45, %v1268_v45 }
 0x180   : > { %v1271_v48 = vadd.f32 %v1270_v46, %v1268_v45  ;;  %v1278_v49 = vrot.slane %v1277_v47, 4 }
 0x182   : > { %v1272_v50 = vrot.slane %v1271_v48, 2  ;;  %v1279_v51 = vadd.f32 %v1278_v49, %v1277_v47 }
 0x184   : > { %v1273_v52 = vadd.f32 %v1272_v50, %v1271_v48  ;;  %v1280_v53 = vrot.slane %v1279_v51, 2 }
 0x186   : > { %v1274_v54 = vrot.slane %v1273_v52, 1  ;;  %v1281_v55 = vadd.f32 %v1280_v53, %v1279_v51 }
 0x188   : > { %v1275_v56 = vadd.f32 %v1274_v54, %v1273_v52  ;;  %v1282_v57 = vrot.slane %v1281_v55, 1 }
 0x18a   : > { %1276 = vst [vmem:[%s719_s8] sm:$0x1] %v1275_v56  ;;  %v1283_v58 = vadd.f32 %v1282_v57, %v1281_v55 }
 0x18c   : > { %1284 = vst [vmem:[%s726_s11] sm:$0x1] %v1283_v58 }
 0x18d PF: > { %s15_s21 = sadd.s32 1, %s1777_s21   ;;  %s2180_s15 = smov %s1757_s16 }
 0x18e   : > { %p12_p0 = scmp.ge.s32.totalorder %s15_s21, 26   ;;  %s2181_s16 = smov %s1856_s28 }
 0x18f   : > { %s2182_s17 = smov %s1769_s19  ;;  %s2183_s18 = smov %s1773_s20 }
 0x190   : > { %s2184_s19 = smov %s2187_s22  ;;  %s2185_s20 = smov %s2191_s23 }
 0x191   :  { %14 = sbr.rel (!%p12_p0) target bundleno = 4 (0x4), region = 139 }

</bundles_post_ra>
